<compile_context>
chip_gen: v7x
topology: tpu7x:2x2x1
jax: 0.10.0
libtpu: 0.0.40
codegen_flags: <defaults>
</compile_context>

<pallas_src>
import jax
import jax.numpy as jnp
from jax.experimental import pallas as pl
from jax.experimental.pallas import tpu as pltpu

# ----------------------------- configuration --------------------------------
IN_CHANNELS = 32
SQUARE_K = 3
BAND_K = 11
BRANCH_RATIO = 0.125
GC = int(IN_CHANNELS * BRANCH_RATIO)          # 4
C_ID = IN_CHANNELS - 3 * GC                   # 20
C = IN_CHANNELS
PAD = BAND_K // 2                             # 5  (max halo)
SQ_OFF = PAD - SQUARE_K // 2                  # 4  (3x3 window start in padded coords)

N, H, W = 2, 16, 16
HP, WP = H + 2 * PAD, W + 2 * PAD             # 26, 26
WC = W * C                                    # 512 = 4 * 128 (lane-dense)

# Merged sparse taps (dh, dw) over the padded tile, grouped by dw so each lane
# shift is shared by all dh taps of that column.
#   dw == PAD           -> full H column (11x1 band + 3x3 centre col + identity)
#   |dw - PAD| <= 1     -> 3 rows (3x3 off-centre columns)
#   otherwise           -> centre row only (1x11 band)
# 11 + 2*3 + 8*1 = 25 taps instead of the 32 naive ones.
TAPS_BY_DW = []
for _dw in range(BAND_K):
    if _dw == PAD:
        _dhs = list(range(BAND_K))
    elif abs(_dw - PAD) <= SQUARE_K // 2:
        _dhs = [PAD - 1, PAD, PAD + 1]
    else:
        _dhs = [PAD]
    TAPS_BY_DW.append((_dw, _dhs))
TAP_LIST = [(dh, dw) for dw, dhs in TAPS_BY_DW for dh in dhs]
NTAPS = len(TAP_LIST)                         # 25


# ------------------------------- kernel --------------------------------------
def inception_dw_kernel(x_ref, w_ref, b_ref, o_ref, xp_ref):
    # x_ref : (1, H, WC)    unpadded lane-dense input tile (one batch item)
    # w_ref : (NTAPS, WC)   per-tap weights, pre-tiled across W (zeros outside
    #                       each branch's channels; identity folded into (5,5))
    # b_ref : (1, WC)       per-channel bias tiled across W (zero on identity)
    # o_ref : (1, H, WC)
    # xp_ref: (HP, WP*C)    VMEM scratch holding the zero-padded halo tile

    # Build the halo tile in VMEM (no wrapper-side jnp.pad / extra HBM pass).
    xp_ref[...] = jnp.zeros_like(xp_ref)
    xp_ref[PAD:PAD + H, PAD * C:PAD * C + WC] = x_ref[0]

    # Start the accumulator from the (tiled, identity-masked) bias.
    acc = jnp.broadcast_to(b_ref[...], (H, WC))

    t = 0
    for dw, dhs in TAPS_BY_DW:
        lo = min(dhs)
        span = max(dhs) - lo + H
        # One lane-shifted load per dw column, shared by all its dh taps.
        xs = xp_ref[lo:lo + span, dw * C:dw * C + WC]
        for dh in dhs:
            acc = acc + xs[dh - lo:dh - lo + H, :] * w_ref[t:t + 1, :]
            t += 1

    o_ref[0] = acc.astype(o_ref.dtype)


# --------------------------- weight preparation -------------------------------
def _merged_tap_weights(w_hw, b_hw, w_w, b_w, w_h, b_h):
    """Fold the 4 branches into (NTAPS, WC) tap weights and a (1, WC) bias."""
    wall = jnp.zeros((BAND_K, BAND_K, C), jnp.float32)
    # identity passthrough -> centre tap, weight 1 on the identity channels
    wall = wall.at[PAD, PAD, :C_ID].set(1.0)
    # 3x3 depthwise branch
    wall = wall.at[SQ_OFF:SQ_OFF + SQUARE_K, SQ_OFF:SQ_OFF + SQUARE_K,
                   C_ID:C_ID + GC].add(jnp.transpose(w_hw[:, 0], (1, 2, 0)))
    # 1x11 depthwise branch (band along W)
    wall = wall.at[PAD, :, C_ID + GC:C_ID + 2 * GC].add(
        jnp.transpose(w_w[:, 0, 0], (1, 0)))
    # 11x1 depthwise branch (band along H)
    wall = wall.at[:, PAD, C_ID + 2 * GC:C_ID + 3 * GC].add(
        jnp.transpose(w_h[:, 0, :, 0], (1, 0)))

    w_taps = jnp.stack([wall[dh, dw] for dh, dw in TAP_LIST])      # (NTAPS, C)
    w_flat = jnp.tile(w_taps[:, None, :], (1, W, 1)).reshape(NTAPS, WC)

    b_chan = (jnp.zeros((C,), jnp.float32)
              .at[C_ID:C_ID + GC].set(b_hw)
              .at[C_ID + GC:C_ID + 2 * GC].set(b_w)
              .at[C_ID + 2 * GC:C_ID + 3 * GC].set(b_h))
    b_flat = jnp.tile(b_chan[None, :], (1, W))                     # (1, WC)
    return w_flat, b_flat


# ------------------------------- wrapper --------------------------------------
@jax.jit
def inception_dw_conv2d(x_nchw, w_hw, b_hw, w_w, b_w, w_h, b_h):
    """x_nchw: (N, C, H, W) float32. Returns (N, C, H, W) matching PyTorch."""
    # NCHW -> lane-dense (N, H, W*C).  The boundary transposes only exist
    # because the module contract is NCHW; a fused pipeline would stay in
    # this layout across layers.
    x_flat = jnp.transpose(x_nchw, (0, 2, 3, 1)).reshape(N, H, WC)
    w_flat, b_flat = _merged_tap_weights(w_hw, b_hw, w_w, b_w, w_h, b_h)

    out_flat = pl.pallas_call(
        inception_dw_kernel,
        out_shape=jax.ShapeDtypeStruct((N, H, WC), jnp.float32),
        grid=(N,),
        in_specs=[
            pl.BlockSpec((1, H, WC), lambda n: (n, 0, 0)),
            pl.BlockSpec((NTAPS, WC), lambda n: (0, 0)),
            pl.BlockSpec((1, WC), lambda n: (0, 0)),
        ],
        out_specs=pl.BlockSpec((1, H, WC), lambda n: (n, 0, 0)),
        scratch_shapes=[pltpu.VMEM((HP, WP * C), jnp.float32)],
        compiler_params=pltpu.CompilerParams(
            dimension_semantics=("parallel",)),   # v7x: split batch over 2 TCs
    )(x_flat, w_flat, b_flat)

    return jnp.transpose(out_flat.reshape(N, H, W, C), (0, 3, 1, 2))


# ------------------------------ reference -------------------------------------
def reference_forward(x, w_hw, b_hw, w_w, b_w, w_h, b_h):
    x_id = x[:, :C_ID]
    x_hw = x[:, C_ID:C_ID + GC]
    x_w = x[:, C_ID + GC:C_ID + 2 * GC]
    x_h = x[:, C_ID + 2 * GC:C_ID + 3 * GC]

    def dwconv(inp, w, b, pad):
        y = jax.lax.conv_general_dilated(
            inp, w, window_strides=(1, 1), padding=pad,
            dimension_numbers=("NCHW", "OIHW", "NCHW"),
            feature_group_count=GC)
        return y + b[None, :, None, None]

    y_hw = dwconv(x_hw, w_hw, b_hw, [(1, 1), (1, 1)])
    y_w = dwconv(x_w, w_w, b_w, [(0, 0), (PAD, PAD)])
    y_h = dwconv(x_h, w_h, b_h, [(PAD, PAD), (0, 0)])
    return jnp.concatenate([x_id, y_hw, y_w, y_h], axis=1)


# -------------------------------- main -----------------------------------------
if __name__ == "__main__":
    key = jax.random.PRNGKey(0)
    kx, k1, k2, k3, k4, k5, k6 = jax.random.split(key, 7)

    x = jax.random.normal(kx, (N, IN_CHANNELS, H, W), jnp.float32)

    # Deterministic parameter init (shapes match the PyTorch module's convs).
    w_hw = jax.random.normal(k1, (GC, 1, SQUARE_K, SQUARE_K), jnp.float32) * 0.1
    b_hw = jax.random.normal(k2, (GC,), jnp.float32) * 0.1
    w_w = jax.random.normal(k3, (GC, 1, 1, BAND_K), jnp.float32) * 0.1
    b_w = jax.random.normal(k4, (GC,), jnp.float32) * 0.1
    w_h = jax.random.normal(k5, (GC, 1, BAND_K, 1), jnp.float32) * 0.1
    b_h = jax.random.normal(k6, (GC,), jnp.float32) * 0.1

    out = inception_dw_conv2d(x, w_hw, b_hw, w_w, b_w, w_h, b_h)
    out = jax.block_until_ready(out)

    ref = reference_forward(x, w_hw, b_hw, w_w, b_w, w_h, b_h)
    assert out.shape == (N, IN_CHANNELS, H, W)
    assert jnp.allclose(out, ref, atol=1e-4, rtol=1e-4), "mismatch vs reference"

    print("KERNEL_OK")
</pallas_src>

<mosaic_0001>
module attributes {stable_mosaic.version = 11 : i64} {
  func.func @inception_dw_kernel(%arg0: i32, %arg1: memref<1x16x512xf32, #tpu.memory_space<vmem>>, %arg2: memref<25x512xf32, #tpu.memory_space<vmem>>, %arg3: memref<1x512xf32, #tpu.memory_space<vmem>>, %arg4: memref<1x16x512xf32, #tpu.memory_space<vmem>>, %arg5: memref<26x832xf32, #tpu.memory_space<vmem>>) attributes {dimension_semantics = [#tpu.dimension_semantics<parallel>], iteration_bounds = array<i64: 2>, scalar_prefetch = 0 : i64, scratch_operands = 1 : i64, tpu.core_type = #tpu.core_type<tc>, window_params = [{transform_indices = @transform_0, window_bounds = array<i64: 1, 16, 512>}, {pipeline_mode = #tpu.pipeline_mode<synchronous>, transform_indices = @transform_1, window_bounds = array<i64: 25, 512>}, {pipeline_mode = #tpu.pipeline_mode<synchronous>, transform_indices = @transform_2, window_bounds = array<i64: 1, 512>}, {transform_indices = @transform_3, window_bounds = array<i64: 1, 16, 512>}]} {
    %cst = arith.constant 0.000000e+00 : f32
    %0 = vector.broadcast %cst : f32 to vector<26x832xf32>
    %c0 = arith.constant 0 : index
    %c0_0 = arith.constant 0 : index
    %1 = vector.load %arg5[%c0, %c0_0] : memref<26x832xf32, #tpu.memory_space<vmem>>, vector<26x832xf32>
    tpu.vector_store %arg5[%c0, %c0_0], %0 {strides = array<i32>} : memref<26x832xf32, #tpu.memory_space<vmem>>, vector<26x832xf32>,
    %c0_1 = arith.constant 0 : index
    %c0_2 = arith.constant 0 : index
    %c0_3 = arith.constant 0 : index
    %2 = vector.load %arg1[%c0_1, %c0_2, %c0_3] : memref<1x16x512xf32, #tpu.memory_space<vmem>>, vector<1x16x512xf32>
    %3 = vector.shape_cast %2 : vector<1x16x512xf32> to vector<16x512xf32>
    %c5 = arith.constant 5 : index
    %c160 = arith.constant 160 : index
    %4 = vector.load %arg5[%c5, %c160] : memref<26x832xf32, #tpu.memory_space<vmem>>, vector<16x512xf32>
    tpu.vector_store %arg5[%c5, %c160], %3 {strides = array<i32>} : memref<26x832xf32, #tpu.memory_space<vmem>>, vector<16x512xf32>,
    %c0_4 = arith.constant 0 : index
    %c0_5 = arith.constant 0 : index
    %5 = vector.load %arg3[%c0_4, %c0_5] : memref<1x512xf32, #tpu.memory_space<vmem>>, vector<1x512xf32>
    %6 = vector.shape_cast %5 : vector<1x512xf32> to vector<1x512xf32>
    %7 = vector.broadcast %6 : vector<1x512xf32> to vector<16x512xf32>
    %c5_6 = arith.constant 5 : index
    %c0_7 = arith.constant 0 : index
    %8 = vector.load %arg5[%c5_6, %c0_7] : memref<26x832xf32, #tpu.memory_space<vmem>>, vector<16x512xf32>
    %c0_8 = arith.constant 0 : index
    %c0_9 = arith.constant 0 : index
    %9 = vector.load %arg2[%c0_8, %c0_9] : memref<25x512xf32, #tpu.memory_space<vmem>>, vector<1x512xf32>
    %10 = vector.broadcast %9 : vector<1x512xf32> to vector<16x512xf32>
    %11 = arith.mulf %8, %10 : vector<16x512xf32>
    %12 = arith.addf %7, %11 : vector<16x512xf32>
    %c5_10 = arith.constant 5 : index
    %c32 = arith.constant 32 : index
    %13 = vector.load %arg5[%c5_10, %c32] : memref<26x832xf32, #tpu.memory_space<vmem>>, vector<16x512xf32>
    %c1 = arith.constant 1 : index
    %c0_11 = arith.constant 0 : index
    %14 = vector.load %arg2[%c1, %c0_11] : memref<25x512xf32, #tpu.memory_space<vmem>>, vector<1x512xf32>
    %15 = vector.broadcast %14 : vector<1x512xf32> to vector<16x512xf32>
    %16 = arith.mulf %13, %15 : vector<16x512xf32>
    %17 = arith.addf %12, %16 : vector<16x512xf32>
    %c5_12 = arith.constant 5 : index
    %c64 = arith.constant 64 : index
    %18 = vector.load %arg5[%c5_12, %c64] : memref<26x832xf32, #tpu.memory_space<vmem>>, vector<16x512xf32>
    %c2 = arith.constant 2 : index
    %c0_13 = arith.constant 0 : index
    %19 = vector.load %arg2[%c2, %c0_13] : memref<25x512xf32, #tpu.memory_space<vmem>>, vector<1x512xf32>
    %20 = vector.broadcast %19 : vector<1x512xf32> to vector<16x512xf32>
    %21 = arith.mulf %18, %20 : vector<16x512xf32>
    %22 = arith.addf %17, %21 : vector<16x512xf32>
    %c5_14 = arith.constant 5 : index
    %c96 = arith.constant 96 : index
    %23 = vector.load %arg5[%c5_14, %c96] : memref<26x832xf32, #tpu.memory_space<vmem>>, vector<16x512xf32>
    %c3 = arith.constant 3 : index
    %c0_15 = arith.constant 0 : index
    %24 = vector.load %arg2[%c3, %c0_15] : memref<25x512xf32, #tpu.memory_space<vmem>>, vector<1x512xf32>
    %25 = vector.broadcast %24 : vector<1x512xf32> to vector<16x512xf32>
    %26 = arith.mulf %23, %25 : vector<16x512xf32>
    %27 = arith.addf %22, %26 : vector<16x512xf32>
    %c4 = arith.constant 4 : index
    %c128 = arith.constant 128 : index
    %28 = vector.load %arg5[%c4, %c128] : memref<26x832xf32, #tpu.memory_space<vmem>>, vector<18x512xf32>
    %29 = vector.extract_strided_slice %28 {offsets = [0, 0], sizes = [16, 512], strides = [1, 1]} : vector<18x512xf32> to vector<16x512xf32>
    %c4_16 = arith.constant 4 : index
    %c0_17 = arith.constant 0 : index
    %30 = vector.load %arg2[%c4_16, %c0_17] : memref<25x512xf32, #tpu.memory_space<vmem>>, vector<1x512xf32>
    %31 = vector.broadcast %30 : vector<1x512xf32> to vector<16x512xf32>
    %32 = arith.mulf %29, %31 : vector<16x512xf32>
    %33 = arith.addf %27, %32 : vector<16x512xf32>
    %34 = vector.extract_strided_slice %28 {offsets = [1, 0], sizes = [16, 512], strides = [1, 1]} : vector<18x512xf32> to vector<16x512xf32>
    %c5_18 = arith.constant 5 : index
    %c0_19 = arith.constant 0 : index
    %35 = vector.load %arg2[%c5_18, %c0_19] : memref<25x512xf32, #tpu.memory_space<vmem>>, vector<1x512xf32>
    %36 = vector.broadcast %35 : vector<1x512xf32> to vector<16x512xf32>
    %37 = arith.mulf %34, %36 : vector<16x512xf32>
    %38 = arith.addf %33, %37 : vector<16x512xf32>
    %39 = vector.extract_strided_slice %28 {offsets = [2, 0], sizes = [16, 512], strides = [1, 1]} : vector<18x512xf32> to vector<16x512xf32>
    %c6 = arith.constant 6 : index
    %c0_20 = arith.constant 0 : index
    %40 = vector.load %arg2[%c6, %c0_20] : memref<25x512xf32, #tpu.memory_space<vmem>>, vector<1x512xf32>
    %41 = vector.broadcast %40 : vector<1x512xf32> to vector<16x512xf32>
    %42 = arith.mulf %39, %41 : vector<16x512xf32>
    %43 = arith.addf %38, %42 : vector<16x512xf32>
    %c0_21 = arith.constant 0 : index
    %c160_22 = arith.constant 160 : index
    %44 = vector.load %arg5[%c0_21, %c160_22] : memref<26x832xf32, #tpu.memory_space<vmem>>, vector<26x512xf32>
    %45 = vector.extract_strided_slice %44 {offsets = [0, 0], sizes = [16, 512], strides = [1, 1]} : vector<26x512xf32> to vector<16x512xf32>
    %c7 = arith.constant 7 : index
    %c0_23 = arith.constant 0 : index
    %46 = vector.load %arg2[%c7, %c0_23] : memref<25x512xf32, #tpu.memory_space<vmem>>, vector<1x512xf32>
    %47 = vector.broadcast %46 : vector<1x512xf32> to vector<16x512xf32>
    %48 = arith.mulf %45, %47 : vector<16x512xf32>
    %49 = arith.addf %43, %48 : vector<16x512xf32>
    %50 = vector.extract_strided_slice %44 {offsets = [1, 0], sizes = [16, 512], strides = [1, 1]} : vector<26x512xf32> to vector<16x512xf32>
    %c8 = arith.constant 8 : index
    %c0_24 = arith.constant 0 : index
    %51 = vector.load %arg2[%c8, %c0_24] : memref<25x512xf32, #tpu.memory_space<vmem>>, vector<1x512xf32>
    %52 = vector.broadcast %51 : vector<1x512xf32> to vector<16x512xf32>
    %53 = arith.mulf %50, %52 : vector<16x512xf32>
    %54 = arith.addf %49, %53 : vector<16x512xf32>
    %55 = vector.extract_strided_slice %44 {offsets = [2, 0], sizes = [16, 512], strides = [1, 1]} : vector<26x512xf32> to vector<16x512xf32>
    %c9 = arith.constant 9 : index
    %c0_25 = arith.constant 0 : index
    %56 = vector.load %arg2[%c9, %c0_25] : memref<25x512xf32, #tpu.memory_space<vmem>>, vector<1x512xf32>
    %57 = vector.broadcast %56 : vector<1x512xf32> to vector<16x512xf32>
    %58 = arith.mulf %55, %57 : vector<16x512xf32>
    %59 = arith.addf %54, %58 : vector<16x512xf32>
    %60 = vector.extract_strided_slice %44 {offsets = [3, 0], sizes = [16, 512], strides = [1, 1]} : vector<26x512xf32> to vector<16x512xf32>
    %c10 = arith.constant 10 : index
    %c0_26 = arith.constant 0 : index
    %61 = vector.load %arg2[%c10, %c0_26] : memref<25x512xf32, #tpu.memory_space<vmem>>, vector<1x512xf32>
    %62 = vector.broadcast %61 : vector<1x512xf32> to vector<16x512xf32>
    %63 = arith.mulf %60, %62 : vector<16x512xf32>
    %64 = arith.addf %59, %63 : vector<16x512xf32>
    %65 = vector.extract_strided_slice %44 {offsets = [4, 0], sizes = [16, 512], strides = [1, 1]} : vector<26x512xf32> to vector<16x512xf32>
    %c11 = arith.constant 11 : index
    %c0_27 = arith.constant 0 : index
    %66 = vector.load %arg2[%c11, %c0_27] : memref<25x512xf32, #tpu.memory_space<vmem>>, vector<1x512xf32>
    %67 = vector.broadcast %66 : vector<1x512xf32> to vector<16x512xf32>
    %68 = arith.mulf %65, %67 : vector<16x512xf32>
    %69 = arith.addf %64, %68 : vector<16x512xf32>
    %70 = vector.extract_strided_slice %44 {offsets = [5, 0], sizes = [16, 512], strides = [1, 1]} : vector<26x512xf32> to vector<16x512xf32>
    %c12 = arith.constant 12 : index
    %c0_28 = arith.constant 0 : index
    %71 = vector.load %arg2[%c12, %c0_28] : memref<25x512xf32, #tpu.memory_space<vmem>>, vector<1x512xf32>
    %72 = vector.broadcast %71 : vector<1x512xf32> to vector<16x512xf32>
    %73 = arith.mulf %70, %72 : vector<16x512xf32>
    %74 = arith.addf %69, %73 : vector<16x512xf32>
    %75 = vector.extract_strided_slice %44 {offsets = [6, 0], sizes = [16, 512], strides = [1, 1]} : vector<26x512xf32> to vector<16x512xf32>
    %c13 = arith.constant 13 : index
    %c0_29 = arith.constant 0 : index
    %76 = vector.load %arg2[%c13, %c0_29] : memref<25x512xf32, #tpu.memory_space<vmem>>, vector<1x512xf32>
    %77 = vector.broadcast %76 : vector<1x512xf32> to vector<16x512xf32>
    %78 = arith.mulf %75, %77 : vector<16x512xf32>
    %79 = arith.addf %74, %78 : vector<16x512xf32>
    %80 = vector.extract_strided_slice %44 {offsets = [7, 0], sizes = [16, 512], strides = [1, 1]} : vector<26x512xf32> to vector<16x512xf32>
    %c14 = arith.constant 14 : index
    %c0_30 = arith.constant 0 : index
    %81 = vector.load %arg2[%c14, %c0_30] : memref<25x512xf32, #tpu.memory_space<vmem>>, vector<1x512xf32>
    %82 = vector.broadcast %81 : vector<1x512xf32> to vector<16x512xf32>
    %83 = arith.mulf %80, %82 : vector<16x512xf32>
    %84 = arith.addf %79, %83 : vector<16x512xf32>
    %85 = vector.extract_strided_slice %44 {offsets = [8, 0], sizes = [16, 512], strides = [1, 1]} : vector<26x512xf32> to vector<16x512xf32>
    %c15 = arith.constant 15 : index
    %c0_31 = arith.constant 0 : index
    %86 = vector.load %arg2[%c15, %c0_31] : memref<25x512xf32, #tpu.memory_space<vmem>>, vector<1x512xf32>
    %87 = vector.broadcast %86 : vector<1x512xf32> to vector<16x512xf32>
    %88 = arith.mulf %85, %87 : vector<16x512xf32>
    %89 = arith.addf %84, %88 : vector<16x512xf32>
    %90 = vector.extract_strided_slice %44 {offsets = [9, 0], sizes = [16, 512], strides = [1, 1]} : vector<26x512xf32> to vector<16x512xf32>
    %c16 = arith.constant 16 : index
    %c0_32 = arith.constant 0 : index
    %91 = vector.load %arg2[%c16, %c0_32] : memref<25x512xf32, #tpu.memory_space<vmem>>, vector<1x512xf32>
    %92 = vector.broadcast %91 : vector<1x512xf32> to vector<16x512xf32>
    %93 = arith.mulf %90, %92 : vector<16x512xf32>
    %94 = arith.addf %89, %93 : vector<16x512xf32>
    %95 = vector.extract_strided_slice %44 {offsets = [10, 0], sizes = [16, 512], strides = [1, 1]} : vector<26x512xf32> to vector<16x512xf32>
    %c17 = arith.constant 17 : index
    %c0_33 = arith.constant 0 : index
    %96 = vector.load %arg2[%c17, %c0_33] : memref<25x512xf32, #tpu.memory_space<vmem>>, vector<1x512xf32>
    %97 = vector.broadcast %96 : vector<1x512xf32> to vector<16x512xf32>
    %98 = arith.mulf %95, %97 : vector<16x512xf32>
    %99 = arith.addf %94, %98 : vector<16x512xf32>
    %c4_34 = arith.constant 4 : index
    %c192 = arith.constant 192 : index
    %100 = vector.load %arg5[%c4_34, %c192] : memref<26x832xf32, #tpu.memory_space<vmem>>, vector<18x512xf32>
    %101 = vector.extract_strided_slice %100 {offsets = [0, 0], sizes = [16, 512], strides = [1, 1]} : vector<18x512xf32> to vector<16x512xf32>
    %c18 = arith.constant 18 : index
    %c0_35 = arith.constant 0 : index
    %102 = vector.load %arg2[%c18, %c0_35] : memref<25x512xf32, #tpu.memory_space<vmem>>, vector<1x512xf32>
    %103 = vector.broadcast %102 : vector<1x512xf32> to vector<16x512xf32>
    %104 = arith.mulf %101, %103 : vector<16x512xf32>
    %105 = arith.addf %99, %104 : vector<16x512xf32>
    %106 = vector.extract_strided_slice %100 {offsets = [1, 0], sizes = [16, 512], strides = [1, 1]} : vector<18x512xf32> to vector<16x512xf32>
    %c19 = arith.constant 19 : index
    %c0_36 = arith.constant 0 : index
    %107 = vector.load %arg2[%c19, %c0_36] : memref<25x512xf32, #tpu.memory_space<vmem>>, vector<1x512xf32>
    %108 = vector.broadcast %107 : vector<1x512xf32> to vector<16x512xf32>
    %109 = arith.mulf %106, %108 : vector<16x512xf32>
    %110 = arith.addf %105, %109 : vector<16x512xf32>
    %111 = vector.extract_strided_slice %100 {offsets = [2, 0], sizes = [16, 512], strides = [1, 1]} : vector<18x512xf32> to vector<16x512xf32>
    %c20 = arith.constant 20 : index
    %c0_37 = arith.constant 0 : index
    %112 = vector.load %arg2[%c20, %c0_37] : memref<25x512xf32, #tpu.memory_space<vmem>>, vector<1x512xf32>
    %113 = vector.broadcast %112 : vector<1x512xf32> to vector<16x512xf32>
    %114 = arith.mulf %111, %113 : vector<16x512xf32>
    %115 = arith.addf %110, %114 : vector<16x512xf32>
    %c5_38 = arith.constant 5 : index
    %c224 = arith.constant 224 : index
    %116 = vector.load %arg5[%c5_38, %c224] : memref<26x832xf32, #tpu.memory_space<vmem>>, vector<16x512xf32>
    %c21 = arith.constant 21 : index
    %c0_39 = arith.constant 0 : index
    %117 = vector.load %arg2[%c21, %c0_39] : memref<25x512xf32, #tpu.memory_space<vmem>>, vector<1x512xf32>
    %118 = vector.broadcast %117 : vector<1x512xf32> to vector<16x512xf32>
    %119 = arith.mulf %116, %118 : vector<16x512xf32>
    %120 = arith.addf %115, %119 : vector<16x512xf32>
    %c5_40 = arith.constant 5 : index
    %c256 = arith.constant 256 : index
    %121 = vector.load %arg5[%c5_40, %c256] : memref<26x832xf32, #tpu.memory_space<vmem>>, vector<16x512xf32>
    %c22 = arith.constant 22 : index
    %c0_41 = arith.constant 0 : index
    %122 = vector.load %arg2[%c22, %c0_41] : memref<25x512xf32, #tpu.memory_space<vmem>>, vector<1x512xf32>
    %123 = vector.broadcast %122 : vector<1x512xf32> to vector<16x512xf32>
    %124 = arith.mulf %121, %123 : vector<16x512xf32>
    %125 = arith.addf %120, %124 : vector<16x512xf32>
    %c5_42 = arith.constant 5 : index
    %c288 = arith.constant 288 : index
    %126 = vector.load %arg5[%c5_42, %c288] : memref<26x832xf32, #tpu.memory_space<vmem>>, vector<16x512xf32>
    %c23 = arith.constant 23 : index
    %c0_43 = arith.constant 0 : index
    %127 = vector.load %arg2[%c23, %c0_43] : memref<25x512xf32, #tpu.memory_space<vmem>>, vector<1x512xf32>
    %128 = vector.broadcast %127 : vector<1x512xf32> to vector<16x512xf32>
    %129 = arith.mulf %126, %128 : vector<16x512xf32>
    %130 = arith.addf %125, %129 : vector<16x512xf32>
    %c5_44 = arith.constant 5 : index
    %c320 = arith.constant 320 : index
    %131 = vector.load %arg5[%c5_44, %c320] : memref<26x832xf32, #tpu.memory_space<vmem>>, vector<16x512xf32>
    %c24 = arith.constant 24 : index
    %c0_45 = arith.constant 0 : index
    %132 = vector.load %arg2[%c24, %c0_45] : memref<25x512xf32, #tpu.memory_space<vmem>>, vector<1x512xf32>
    %133 = vector.broadcast %132 : vector<1x512xf32> to vector<16x512xf32>
    %134 = arith.mulf %131, %133 : vector<16x512xf32>
    %135 = arith.addf %130, %134 : vector<16x512xf32>
    %c0_46 = arith.constant 0 : index
    %c0_47 = arith.constant 0 : index
    %c0_48 = arith.constant 0 : index
    %136 = vector.load %arg4[%c0_46, %c0_47, %c0_48] : memref<1x16x512xf32, #tpu.memory_space<vmem>>, vector<1x16x512xf32>
    %137 = vector.shape_cast %136 : vector<1x16x512xf32> to vector<16x512xf32>
    %138 = vector.shape_cast %135 : vector<16x512xf32> to vector<1x16x512xf32>
    tpu.vector_store %arg4[%c0_46, %c0_47, %c0_48], %138 {strides = array<i32>} : memref<1x16x512xf32, #tpu.memory_space<vmem>>, vector<1x16x512xf32>,
    return
  }
  func.func @transform_0(%arg0: i32) -> (i32, i32, i32) {
    %c0_i32 = arith.constant 0 : i32
    %c0_i32_0 = arith.constant 0 : i32
    %c0_i32_1 = arith.constant 0 : i32
    return %arg0, %c0_i32, %c0_i32_0 : i32, i32, i32
  }
  func.func @transform_1(%arg0: i32) -> (i32, i32) {
    %c0_i32 = arith.constant 0 : i32
    %c0_i32_0 = arith.constant 0 : i32
    %c0_i32_1 = arith.constant 0 : i32
    return %c0_i32, %c0_i32_0 : i32, i32
  }
  func.func @transform_2(%arg0: i32) -> (i32, i32) {
    %c0_i32 = arith.constant 0 : i32
    %c0_i32_0 = arith.constant 0 : i32
    %c0_i32_1 = arith.constant 0 : i32
    return %c0_i32, %c0_i32_0 : i32, i32
  }
  func.func @transform_3(%arg0: i32) -> (i32, i32, i32) {
    %c0_i32 = arith.constant 0 : i32
    %c0_i32_0 = arith.constant 0 : i32
    %c0_i32_1 = arith.constant 0 : i32
    return %arg0, %c0_i32, %c0_i32_0 : i32, i32, i32
  }
}

</mosaic_0001>

<bundles_post_ra>
// kernel: tile.11
= control target key start
LH: loop header
LB: loop body
LE: loop exit
PB: predicated region body
PF: predicated region fallthrough
CT: control target
= control target key end

     0   :  { %s90_s6 = smov 3  ;;  %s93_s7 = smov 12  ;;  %vm95_vm0 = vcmask 1043458   ;;  %vm100_vm1 = vcmask 1045508   ;;  %vm105_vm2 = vcmask 1047558   ;;  %vm312_vm3 = vcmask 1042433   ;;  %s2341_s0 = inlined_call_operand.vmem [shape: f32[25,16,1,1,32], index: 0, kind: input, shape index: {}]   ;;  %s2342_s1 = inlined_call_operand.vmem [shape: f32[25,512], index: 1, kind: output, shape index: {}]  }
   0x1   :  { %v1064_v0 = vld [vmem:[%s2341_s0 + $0x3] ss:$16 sm:%s90_s6]   ;;  %s98_s12 = smov 48  ;;  %s103_s13 = smov 192  ;;  %v1114_v54 = vld [vmem:[%s2341_s0 + $0x18b] sm:$0x1]  }
   0x2   :  { %v1065_v1 = vld [vmem:[%s2341_s0 + $0x3] ss:$16 sm:%s93_s7]   ;;  %s135_s18 = smov 3  ;;  %s138_s21 = smov 12  ;;  %vm317_vm4 = vcmask 1044483   ;;  %vm322_vm5 = vcmask 1046533  }
   0x3   :  { %v96_v2 = vsel %vm95_vm0, %v1065_v1, %v1064_v0  ;;  %v1066_v3 = vld [vmem:[%s2341_s0 + $0x3] ss:$16 sm:%s98_s12]   ;;  %s143_s22 = smov 48  ;;  %s148_s27 = smov 192  ;;  %v1118_v62 = vld [vmem:[%s2341_s0 + $0x48] sm:$0x80]  }
   0x4   :  { %v1067_v4 = vld [vmem:[%s2341_s0 + $0x3] ss:$16 sm:%s103_s13]   ;;  %v101_v5 = vsel %vm100_vm1, %v1066_v3, %v96_v2  ;;  %s112_s28 = smov 3  ;;  %s1289_s29 = smov 96   ;;  %vm326_vm6 = vcmask 1047559   ;;  %vm3_vm7 = vcmask 261120  }
   0x5   :  { %v1073_v6 = vld [vmem:[%s2341_s0 + $0x103] ss:$16 sm:%s135_s18]   ;;  %v106_v7 = vsel %vm105_vm2, %v1067_v4, %v101_v5  ;;  %s115_s3 = smov 12  ;;  %s120_s4 = smov 48  ;;  %vm109_vm8 = vcmask 1048320   ;;  %vm422_vm9 = vcmask 785920  }
   0x6   :  { %v1074_v8 = vld [vmem:[%s2341_s0 + $0x103] ss:$16 sm:%s138_s21]   ;;  %107 = vrot.lane.b32.xlu0 %v106_v7, %s1289_s29  ;;  %s125_s9 = smov 192  ;;  %s158_s10 = smov 3  ;;  %v2_v7 = vld [vmem:[%s2341_s0] ss:$4 sm:$0xff]  }
   0x7   :  { %v1075_v9 = vld [vmem:[%s2341_s0 + $0x103] ss:$16 sm:%s143_s22]   ;;  %v141_v10 = vsel %vm95_vm0, %v1074_v8, %v1073_v6  ;;  %s161_s15 = smov 12  ;;  %s166_s16 = smov 48  ;;  %vm735_vm10 = vcmask 523520  }
   0x8   :  { %v1076_v11 = vld [vmem:[%s2341_s0 + $0x103] ss:$16 sm:%s148_s27]   ;;  %v146_v12 = vsel %vm100_vm1, %v1075_v9, %v141_v10  ;;  %s171_s19 = smov 192  ;;  %s183_s20 = smov 3  ;;  %v1079_v22 = vld [vmem:[%s2341_s0 - $0x9] ss:$16 sm:%s161_s15]  }
   0x9   :  { %v1068_v13 = vld [vmem:[%s2341_s0 + $0x83] ss:$16 sm:%s112_s28]   ;;  %v151_v15 = vsel %vm105_vm2, %v1076_v11, %v146_v12  ;;  %v1080_v23 = vld [vmem:[%s2341_s0 - $0x9] ss:$16 sm:%s166_s16]   ;;  %s186_s25 = smov 12  ;;  %s191_s26 = smov 48 }
   0xa   :  { %v1069_v14 = vld [vmem:[%s2341_s0 + $0x83] ss:$16 sm:%s115_s3]   ;;  %152 = vrot.lane.b32.xlu1 %v151_v15, %s1289_s29  ;;  %s196_s30 = smov 192  ;;  %s208_s2 = smov 3 }
   0xb   :  { %v118_v16 = vsel %vm95_vm0, %v1069_v14, %v1068_v13  ;;  %v1070_v17 = vld [vmem:[%s2341_s0 + $0x83] ss:$16 sm:%s120_s4]   ;;  %v1081_v25 = vld [vmem:[%s2341_s0 - $0x9] ss:$16 sm:%s171_s19]   ;;  %s211_s7 = smov 12  ;;  %s216_s8 = smov 48 }
   0xc   :  { %v1071_v18 = vld [vmem:[%s2341_s0 + $0x83] ss:$16 sm:%s125_s9]   ;;  %v123_v19 = vsel %vm100_vm1, %v1070_v17, %v118_v16  ;;  %v1084_v27 = vld [vmem:[%s2341_s0 + $0x87] ss:$16 sm:%s183_s20]   ;;  %s221_s13 = smov 192  ;;  %s233_s16 = smov 3 }
   0xd   :  { %v1078_v20 = vld [vmem:[%s2341_s0 + $0x183] ss:$-380 sm:%s158_s10]   ;;  %v128_v21 = vsel %vm105_vm2, %v1071_v18, %v123_v19  ;;  %s236_s17 = smov 12  ;;  %s241_s22 = smov 48  ;;  %v1035_v17 = vld [vmem:[%s2341_s0 + $0x60] ss:$4 sm:$0xff]  }
   0xe   :  { %129 = vrot.lane.b32.xlu0 %v128_v21, %s1289_s29  ;;  %v164_v24 = vsel %vm95_vm0, %v1079_v22, %v1078_v20  ;;  %v1085_v28 = vld [vmem:[%s2341_s0 + $0x87] ss:$16 sm:%s186_s25]   ;;  %s246_s23 = smov 192  ;;  %s261_s3 = smov 12 }
   0xf   :  { %v169_v26 = vsel %vm100_vm1, %v1080_v23, %v164_v24  ;;  %v189_v30 = vsel %vm95_vm0, %v1085_v28, %v1084_v27  ;;  %v1086_v31 = vld [vmem:[%s2341_s0 + $0x87] ss:$16 sm:%s191_s26]   ;;  %s258_s26 = smov 3  ;;  %v1097_v42 = vld [vmem:[%s2341_s0 - $0x15] ss:$16 sm:%s236_s17]   ;;  %s266_s4 = smov 48 }
  0x10   :  { %v174_v29 = vsel %vm105_vm2, %v1081_v25, %v169_v26  ;;  %v1087_v32 = vld [vmem:[%s2341_s0 + $0x387] ss:$-112 sm:%s196_s30]   ;;  %v194_v33 = vsel %vm100_vm1, %v1086_v31, %v189_v30  ;;  %v1098_v45 = vld [vmem:[%s2341_s0 - $0x15] ss:$16 sm:%s241_s22]   ;;  %s271_s9 = smov 192  ;;  %s283_s12 = smov 3 }
  0x11   :  { %175 = vrot.lane.b32.xlu1 %v174_v29, %s1289_s29  ;;  %v1090_v34 = vld [vmem:[%s2341_s0 + $0x107] ss:$16 sm:%s208_s2]   ;;  %v199_v35 = vsel %vm105_vm2, %v1087_v32, %v194_v33  ;;  %s291_s18 = smov 48  ;;  %s296_s19 = smov 192  ;;  %v1047_v24 = vld [vmem:[%s2341_s0 + $0xe0] ss:$4 sm:$0xff]  }
  0x12   :  { %v1091_v36 = vld [vmem:[%s2341_s0 + $0x107] ss:$16 sm:%s211_s7]   ;;  %200 = vrot.lane.b32.xlu0 %v199_v35, %s1289_s29  ;;  %s310_s24 = smov 6  ;;  %s315_s30 = smov 24  ;;  %v1059_v30 = vld [vmem:[%s2341_s0 + $0x160] ss:$4 sm:$0xff]  }
  0x13   :  { %v1092_v37 = vld [vmem:[%s2341_s0 + $0x107] ss:$16 sm:%s216_s8]   ;;  %v214_v38 = vsel %vm95_vm0, %v1091_v36, %v1090_v34  ;;  %v1099_v46 = vld [vmem:[%s2341_s0 - $0x15] ss:$16 sm:%s246_s23]   ;;  %s320_s2 = smov 96  ;;  %s366_s22 = smov 12 }
  0x14   :  { %v1093_v39 = vld [vmem:[%s2341_s0 + $0x407] ss:$-112 sm:%s221_s13]   ;;  %v219_v40 = vsel %vm100_vm1, %v1092_v37, %v214_v38  ;;  %v1102_v48 = vld [vmem:[%s2341_s0 + $0x8b] ss:$16 sm:%s258_s26]   ;;  %s286_s13 = smov 12  ;;  %s388_s11 = smov 3 }
  0x15   :  { %v1096_v41 = vld [vmem:[%s2341_s0 + $0x187] ss:$-16 sm:%s233_s16]   ;;  %v224_v43 = vsel %vm105_vm2, %v1093_v39, %v219_v40  ;;  %v1103_v50 = vld [vmem:[%s2341_s0 + $0x8b] ss:$16 sm:%s261_s3]   ;;  %s391_s14 = smov 12  ;;  %s403_s15 = smov 3 }
  0x16   :  { %v239_v44 = vsel %vm95_vm0, %v1097_v42, %v1096_v41  ;;  %225 = vrot.lane.b32.xlu1 %v224_v43, %s1289_s29  ;;  %v1104_v51 = vld [vmem:[%s2341_s0 + $0x8b] ss:$16 sm:%s266_s4]   ;;  %v264_v52 = vsel %vm95_vm0, %v1103_v50, %v1102_v48  ;;  %4 = vst.msk [vmem:[%s2342_s1] ss:$8 sm:$0xf] %vm3_vm7, %v2_v7   ;;  %s428_s16 = smov 12 }
  0x17   :  { %v244_v47 = vsel %vm100_vm1, %v1098_v45, %v239_v44  ;;  %v1105_v53 = vld [vmem:[%s2341_s0 + $0xb] ss:$16 sm:%s271_s9]   ;;  %v269_v55 = vsel %vm100_vm1, %v1104_v51, %v264_v52  ;;  %s338_s9 = smov 3  ;;  %v1116_v3 = vld [vmem:[%s2341_s0 - $0x21] ss:$16 sm:%s315_s30]   ;;  %s371_s30 = smov 48 }
  0x18   :  { %v249_v49 = vsel %vm105_vm2, %v1099_v46, %v244_v47  ;;  %v1108_v56 = vld [vmem:[%s2341_s0 + $0x10b] ss:$16 sm:%s283_s12]   ;;  %v274_v58 = vsel %vm105_vm2, %v1105_v53, %v269_v55  ;;  %s341_s12 = smov 12  ;;  %v1117_v4 = vld [vmem:[%s2341_s0 - $0x21] ss:$16 sm:%s320_s2]   ;;  %s376_s2 = smov 192 }
  0x19   :  { %250 = vrot.lane.b32.xlu0 %v249_v49, %s1289_s29  ;;  %v1109_v57 = vld [vmem:[%s2341_s0 + $0x10b] ss:$16 sm:%s286_s13]   ;;  %s346_s13 = smov 48  ;;  %1028 = vst.msk [vmem:[%s2342_s1 - $0x1f] ss:$8 sm:$0xf0] %vm3_vm7, %v2_v7  }
  0x1a   :  { %v289_v59 = vsel %vm95_vm0, %v1109_v57, %v1108_v56  ;;  %v1110_v60 = vld [vmem:[%s2341_s0 + $0x10b] ss:$16 sm:%s291_s18]   ;;  %275 = vrot.lane.b32.xlu1 %v274_v58, %s1289_s29  ;;  %s351_s18 = smov 192  ;;  %1037 = vst.msk [vmem:[%s2342_s1 - $0x19] ss:$8 sm:$0xf0] %vm3_vm7, %v1035_v17  }
  0x1b   :  { %v1111_v61 = vld [vmem:[%s2341_s0 + $0x8b] ss:$16 sm:%s296_s19]   ;;  %v294_v63 = vsel %vm100_vm1, %v1110_v60, %v289_v59  ;;  %s363_s19 = smov 3  ;;  %v1122_v6 = vld [vmem:[%s2341_s0 + $0x8f] ss:$16 sm:%s338_s9]   ;;  %s425_s9 = smov 3 }
  0x1c   :  { %v1115_v0 = vld [vmem:[%s2341_s0 + $0x15b] ss:$16 sm:%s310_s24]   ;;  %v299_v1 = vsel %vm105_vm2, %v1111_v61, %v294_v63  ;;  %v1123_v9 = vld [vmem:[%s2341_s0 + $0x8f] ss:$16 sm:%s341_s12]   ;;  %s433_s17 = smov 48  ;;  %s438_s24 = smov 192 }
  0x1d   :  { %v313_v2 = vsel %vm312_vm3, %v1115_v0, %v1114_v54  ;;  %300 = vrot.lane.b32.xlu0 %v299_v1, %s1289_s29  ;;  %v1124_v10 = vld [vmem:[%s2341_s0 + $0x28f] ss:$-112 sm:%s346_s13]   ;;  %v344_v12 = vsel %vm95_vm0, %v1123_v9, %v1122_v6  ;;  %1036 = vst.msk [vmem:[%s2342_s1 + $0x6] ss:$8 sm:$0xf] %vm3_vm7, %v1035_v17   ;;  %s451_s3 = smov 12 }
  0x1e   :  { %v318_v5 = vsel %vm317_vm4, %v1116_v3, %v313_v2  ;;  %v1125_v13 = vld [vmem:[%s2341_s0 + $0xf] ss:$16 sm:%s351_s18]   ;;  %v349_v15 = vsel %vm100_vm1, %v1124_v10, %v344_v12  ;;  %v1138_v27 = vld [vmem:[%s2341_s0 + $0x2] ss:$16 sm:%s403_s15]   ;;  %s456_s10 = smov 48  ;;  %s474_s26 = smov 12 }
  0x1f   :  { %v323_v8 = vsel %vm322_vm5, %v1117_v4, %v318_v5  ;;  %v1128_v14 = vld [vmem:[%s2341_s0 + $0x10f] ss:$16 sm:%s363_s19]   ;;  %v354_v18 = vsel %vm105_vm2, %v1125_v13, %v349_v15  ;;  %1049 = vst.msk [vmem:[%s2342_s1 + $0x7] ss:$8 sm:$0xf0] %vm3_vm7, %v1047_v24   ;;  %s471_s19 = smov 3 }
  0x20   :  { %v327_v11 = vsel %vm326_vm6, %v1118_v62, %v323_v8  ;;  %v1129_v16 = vld [vmem:[%s2341_s0 + $0x10f] ss:$16 sm:%s366_s22]   ;;  %s406_s22 = smov 12  ;;  %1048 = vst.msk [vmem:[%s2342_s1 + $0x26] ss:$8 sm:$0xf] %vm3_vm7, %v1047_v24  }
  0x21   :  { %328 = vrot.lane.b32.xlu1 %v327_v11, %s1289_s29  ;;  %v369_v19 = vsel %vm95_vm0, %v1129_v16, %v1128_v14  ;;  %v1130_v20 = vld [vmem:[%s2341_s0 + $0x30f] ss:$-112 sm:%s371_s30]   ;;  %355 = vrot.lane.b32.xlu0 %v354_v18, %s1289_s29  ;;  %s411_s30 = smov 48  ;;  %s479_s27 = smov 48 }
  0x22   :  { %v1131_v21 = vld [vmem:[%s2341_s0 + $0x8f] ss:$16 sm:%s376_s2]   ;;  %v374_v22 = vsel %vm100_vm1, %v1130_v20, %v369_v19  ;;  %s416_s2 = smov 192  ;;  %v1139_v29 = vld [vmem:[%s2341_s0 + $0x2] ss:$16 sm:%s406_s22]   ;;  %s484_s7 = smov 192 }
  0x23   :  { %v1134_v23 = vld [vmem:[%s2341_s0 + $0x18f] ss:$-48 sm:%s388_s11]   ;;  %v379_v25 = vsel %vm105_vm2, %v1131_v21, %v374_v22  ;;  %v409_v31 = vsel %vm95_vm0, %v1139_v29, %v1138_v27  ;;  %v1140_v32 = vld [vmem:[%s2341_s0 + $0x2] ss:$16 sm:%s411_s30]   ;;  %s461_s11 = smov 192  ;;  %s509_s20 = smov 192 }
  0x24   :  { %v1135_v26 = vld [vmem:[%s2341_s0 + $0x14f] ss:$16 sm:%s391_s14]   ;;  %v1141_v33 = vld [vmem:[%s2341_s0 + $0x2] ss:$16 sm:%s416_s2]   ;;  %v414_v34 = vsel %vm100_vm1, %v1140_v32, %v409_v31  ;;  %s448_s2 = smov 3  ;;  %s524_s5 = smov 12 }
  0x25   :  { %380 = vrot.lane.b32.xlu1 %v379_v25, %s1289_s29  ;;  %v394_v28 = vsel %vm95_vm0, %v1135_v26, %v1134_v23  ;;  %1061 = vst.msk [vmem:[%s2342_s1 + $0x27] ss:$8 sm:$0xf0] %vm3_vm7, %v1059_v30   ;;  %1060 = vst.msk [vmem:[%s2342_s1 + $0x46] ss:$8 sm:$0xf] %vm3_vm7, %v1059_v30   ;;  %v419_v37 = vsel %vm105_vm2, %v1141_v33, %v414_v34 }
  0x26   :  { %395 = vrot.lane.b32.xlu0 %v394_v28, %s1289_s29  ;;  %v1142_v35 = vld [vmem:[%s2341_s0 + $0x82] ss:$16 sm:%s425_s9]   ;;  %v1056_v36 = vld [vmem:[%s2341_s0 + $0x140] ss:$4 sm:$0xff]   ;;  %s529_s6 = smov 48  ;;  %s534_s15 = smov 192 }
  0x27   :  { %v1143_v38 = vld [vmem:[%s2341_s0 + $0x82] ss:$16 sm:%s428_s16]   ;;  %1057 = vst.msk [vmem:[%s2342_s1 + $0x44] ss:$8 sm:$0xf] %vm3_vm7, %v1056_v36   ;;  %s1290_s16 = smov 64  }
  0x28   :  { %v1144_v39 = vld [vmem:[%s2341_s0 + $0x82] ss:$16 sm:%s433_s17]   ;;  %1058 = vst.msk [vmem:[%s2342_s1 + $0x25] ss:$8 sm:$0xf0] %vm3_vm7, %v1056_v36   ;;  %v431_v40 = vsel %vm95_vm0, %v1143_v38, %v1142_v35  ;;  %s559_s28 = smov 192 }
  0x29   :  { %420 = vrot.lane.b32.xlu1 %v419_v37, %s1290_s16  ;;  %v1145_v41 = vld [vmem:[%s2341_s0 + $0x82] ss:$16 sm:%s438_s24]   ;;  %v1029_v42 = vld [vmem:[%s2341_s0 + $0x20] ss:$4 sm:$0xff]   ;;  %v436_v43 = vsel %vm100_vm1, %v1144_v39, %v431_v40  ;;  %s574_s13 = smov 12  ;;  %s579_s14 = smov 48 }
  0x2a   :  { %v1147_v44 = vld [vmem:[%s2341_s0 + $0x102] ss:$16 sm:%s448_s2]   ;;  %1030 = vst.msk [vmem:[%s2342_s1 + $0x2] ss:$8 sm:$0xf] %vm3_vm7, %v1029_v42   ;;  %v441_v46 = vsel %vm105_vm2, %v1145_v41, %v436_v43  ;;  %s584_s24 = smov 192 }
  0x2b   :  { %v1148_v45 = vld [vmem:[%s2341_s0 + $0x102] ss:$16 sm:%s451_s3]   ;;  %1031 = vst.msk [vmem:[%s2342_s1 - $0x1d] ss:$8 sm:$0xf0] %vm3_vm7, %v1029_v42   ;;  %442 = vrot.lane.b32.xlu0 %v441_v46, %s1290_s16  ;;  %s623_s17 = smov 6 }
  0x2c   :  { %v454_v47 = vsel %vm95_vm0, %v1148_v45, %v1147_v44  ;;  %v1149_v48 = vld [vmem:[%s2341_s0 + $0x102] ss:$16 sm:%s456_s10]   ;;  %s496_s10 = smov 3  ;;  %v1032_v52 = vld [vmem:[%s2341_s0 + $0x40] ss:$4 sm:$0xff]   ;;  %s633_s25 = smov 96 }
  0x2d   :  { %v1150_v49 = vld [vmem:[%s2341_s0 + $0x102] ss:$16 sm:%s461_s11]   ;;  %v459_v50 = vsel %vm100_vm1, %v1149_v48, %v454_v47  ;;  %s499_s11 = smov 12  ;;  %v1153_v54 = vld [vmem:[%s2341_s0 - $0xa] ss:$16 sm:%s474_s26]   ;;  %s676_s18 = smov 3 }
  0x2e   :  { %v1152_v51 = vld [vmem:[%s2341_s0 + $0x182] ss:$-380 sm:%s471_s19]   ;;  %v464_v53 = vsel %vm105_vm2, %v1150_v49, %v459_v50  ;;  %s504_s19 = smov 48  ;;  %1033 = vst.msk [vmem:[%s2342_s1 + $0x4] ss:$8 sm:$0xf] %vm3_vm7, %v1032_v52  }
  0x2f   :  { %v1154_v55 = vld [vmem:[%s2341_s0 - $0xa] ss:$16 sm:%s479_s27]   ;;  %1034 = vst.msk [vmem:[%s2342_s1 - $0x1b] ss:$8 sm:$0xf0] %vm3_vm7, %v1032_v52   ;;  %465 = vrot.lane.b32.xlu1 %v464_v53, %s1290_s16  ;;  %v477_v56 = vsel %vm95_vm0, %v1153_v54, %v1152_v51  ;;  %s521_s27 = smov 3 }
  0x30   :  { %v1155_v57 = vld [vmem:[%s2341_s0 - $0xa] ss:$16 sm:%s484_s7]   ;;  %v1038_v58 = vld [vmem:[%s2341_s0 + $0x80] ss:$4 sm:$0xff]   ;;  %v482_v59 = vsel %vm100_vm1, %v1154_v55, %v477_v56  ;;  %s609_s7 = smov 192  ;;  %s679_s21 = smov 12 }
  0x31   :  { %v1158_v60 = vld [vmem:[%s2341_s0 + $0x86] ss:$16 sm:%s496_s10]   ;;  %1039 = vst.msk [vmem:[%s2342_s1 + $0x20] ss:$8 sm:$0xf] %vm3_vm7, %v1038_v58   ;;  %v487_v62 = vsel %vm105_vm2, %v1155_v57, %v482_v59  ;;  %s654_s10 = smov 12 }
  0x32   :  { %v1159_v61 = vld [vmem:[%s2341_s0 + $0x86] ss:$16 sm:%s499_s11]   ;;  %1040 = vst.msk [vmem:[%s2342_s1 + $0x1] ss:$8 sm:$0xf0] %vm3_vm7, %v1038_v58   ;;  %488 = vrot.lane.b32.xlu0 %v487_v62, %s1290_s16  ;;  %s659_s11 = smov 48 }
  0x33   :  { %v502_v63 = vsel %vm95_vm0, %v1159_v61, %v1158_v60  ;;  %v1160_v0 = vld [vmem:[%s2341_s0 + $0x86] ss:$16 sm:%s504_s19]   ;;  %s546_s19 = smov 3  ;;  %v1041_v4 = vld [vmem:[%s2341_s0 + $0xa0] ss:$4 sm:$0xff]   ;;  %s684_s26 = smov 48 }
  0x34   :  { %v1161_v1 = vld [vmem:[%s2341_s0 + $0x386] ss:$-112 sm:%s509_s20]   ;;  %v507_v2 = vsel %vm100_vm1, %v1160_v0, %v502_v63  ;;  %s549_s20 = smov 12  ;;  %1042 = vst.msk [vmem:[%s2342_s1 + $0x22] ss:$8 sm:$0xf] %vm3_vm7, %v1041_v4  }
  0x35   :  { %v1164_v3 = vld [vmem:[%s2341_s0 + $0x106] ss:$16 sm:%s521_s27]   ;;  %v512_v5 = vsel %vm105_vm2, %v1161_v1, %v507_v2  ;;  %s554_s27 = smov 48  ;;  %1043 = vst.msk [vmem:[%s2342_s1 + $0x3] ss:$8 sm:$0xf0] %vm3_vm7, %v1041_v4  }
  0x36   :  { %v1165_v6 = vld [vmem:[%s2341_s0 + $0x106] ss:$16 sm:%s524_s5]   ;;  %513 = vrot.lane.b32.xlu1 %v512_v5, %s1290_s16  ;;  %v1044_v10 = vld [vmem:[%s2341_s0 + $0xc0] ss:$4 sm:$0xff]   ;;  %s651_s5 = smov 3  ;;  %s701_s3 = smov 3 }
  0x37   :  { %v1166_v7 = vld [vmem:[%s2341_s0 + $0x106] ss:$16 sm:%s529_s6]   ;;  %v527_v8 = vsel %vm95_vm0, %v1165_v6, %v1164_v3  ;;  %s571_s6 = smov 3  ;;  %v1171_v13 = vld [vmem:[%s2341_s0 - $0x16] ss:$16 sm:%s549_s20]   ;;  %s719_s12 = smov 12 }
  0x38   :  { %v1167_v9 = vld [vmem:[%s2341_s0 + $0x406] ss:$-112 sm:%s534_s15]   ;;  %v532_v11 = vsel %vm100_vm1, %v1166_v7, %v527_v8  ;;  %1045 = vst.msk [vmem:[%s2342_s1 + $0x24] ss:$8 sm:$0xf] %vm3_vm7, %v1044_v10   ;;  %s724_s15 = smov 48 }
  0x39   :  { %v1170_v12 = vld [vmem:[%s2341_s0 + $0x186] ss:$-16 sm:%s546_s19]   ;;  %1046 = vst.msk [vmem:[%s2342_s1 + $0x5] ss:$8 sm:$0xf0] %vm3_vm7, %v1044_v10   ;;  %v537_v14 = vsel %vm105_vm2, %v1167_v9, %v532_v11  ;;  %s738_s22 = smov 3 }
  0x3a   :  { %v552_v15 = vsel %vm95_vm0, %v1171_v13, %v1170_v12  ;;  %v1172_v16 = vld [vmem:[%s2341_s0 - $0x16] ss:$16 sm:%s554_s27]   ;;  %538 = vrot.lane.b32.xlu0 %v537_v14, %s1290_s16  ;;  %s596_s27 = smov 3  ;;  %v1050_v20 = vld [vmem:[%s2341_s0 + $0x100] ss:$4 sm:$0xff]   ;;  %s751_s2 = smov 192 }
  0x3b   :  { %v1173_v17 = vld [vmem:[%s2341_s0 - $0x16] ss:$16 sm:%s559_s28]   ;;  %v557_v18 = vsel %vm100_vm1, %v1172_v16, %v552_v15  ;;  %s599_s28 = smov 12  ;;  %1051 = vst.msk [vmem:[%s2342_s1 + $0x40] ss:$8 sm:$0xf] %vm3_vm7, %v1050_v20  }
  0x3c   :  { %v1176_v19 = vld [vmem:[%s2341_s0 + $0x8a] ss:$16 sm:%s571_s6]   ;;  %v562_v21 = vsel %vm105_vm2, %v1173_v17, %v557_v18  ;;  %s604_s6 = smov 48  ;;  %1052 = vst.msk [vmem:[%s2342_s1 + $0x21] ss:$8 sm:$0xf0] %vm3_vm7, %v1050_v20  }
  0x3d   :  { %v1177_v22 = vld [vmem:[%s2341_s0 + $0x8a] ss:$16 sm:%s574_s13]   ;;  %563 = vrot.lane.b32.xlu1 %v562_v21, %s1290_s16  ;;  %v1053_v27 = vld [vmem:[%s2341_s0 + $0x120] ss:$4 sm:$0xff]   ;;  %s761_s4 = smov 3  ;;  %s809_s30 = smov 3 }
  0x3e   :  { %v1178_v23 = vld [vmem:[%s2341_s0 + $0x8a] ss:$16 sm:%s579_s14]   ;;  %v577_v25 = vsel %vm95_vm0, %v1177_v22, %v1176_v19  ;;  %1054 = vst.msk [vmem:[%s2342_s1 + $0x42] ss:$8 sm:$0xf] %vm3_vm7, %v1053_v27   ;;  %s847_s23 = smov 192 }
  0x3f   :  { %v1188_v24 = vld [vmem:[%s2341_s0 + $0x18a] sm:$0x1]   ;;  %v582_v28 = vsel %vm100_vm1, %v1178_v23, %v577_v25  ;;  %1055 = vst.msk [vmem:[%s2342_s1 + $0x23] ss:$8 sm:$0xf0] %vm3_vm7, %v1053_v27   ;;  %s936_s8 = smov 6 }
  0x40   :  { %v1179_v26 = vld [vmem:[%s2341_s0 + $0xa] ss:$16 sm:%s584_s24]   ;;  %s628_s24 = smov 24  ;;  %v1192_v37 = vld [vmem:[%s2341_s0 + $0x47] sm:$0x80]   ;;  %s941_s14 = smov 24 }
  0x41   :  { %v1182_v29 = vld [vmem:[%s2341_s0 + $0x10a] ss:$16 sm:%s596_s27]   ;;  %v587_v31 = vsel %vm105_vm2, %v1179_v26, %v582_v28  ;;  %v1190_v40 = vld [vmem:[%s2341_s0 - $0x22] ss:$16 sm:%s628_s24]   ;;  %s689_s27 = smov 192  ;;  %s859_s24 = smov 3 }
  0x42   :  { %v1183_v30 = vld [vmem:[%s2341_s0 + $0x10a] ss:$16 sm:%s599_s28]   ;;  %588 = vrot.lane.b32.xlu0 %v587_v31, %s1290_s16  ;;  %s1002_s13 = smov 192  ;;  %s1014_s19 = smov 3 }
  0x43   :  { %v602_v32 = vsel %vm95_vm0, %v1183_v30, %v1182_v29  ;;  %v1184_v33 = vld [vmem:[%s2341_s0 + $0x10a] ss:$16 sm:%s604_s6]   ;;  %v1191_v41 = vld [vmem:[%s2341_s0 - $0x22] ss:$16 sm:%s633_s25]   ;;  %s704_s6 = smov 12  ;;  %s741_s25 = smov 12 }
  0x44   :  { %v1185_v34 = vld [vmem:[%s2341_s0 + $0x8a] ss:$16 sm:%s609_s7]   ;;  %v607_v35 = vsel %vm100_vm1, %v1184_v33, %v602_v32  ;;  %v1196_v43 = vld [vmem:[%s2341_s0 + $0x8e] ss:$16 sm:%s651_s5]   ;;  %s716_s7 = smov 3  ;;  %s764_s5 = smov 12 }
  0x45   :  { %v1189_v36 = vld [vmem:[%s2341_s0 + $0x15a] ss:$16 sm:%s623_s17]   ;;  %v612_v38 = vsel %vm105_vm2, %v1185_v34, %v607_v35  ;;  %s664_s17 = smov 192  ;;  %v1197_v45 = vld [vmem:[%s2341_s0 + $0x8e] ss:$16 sm:%s654_s10]   ;;  %s769_s10 = smov 48 }
  0x46   :  { %v626_v39 = vsel %vm312_vm3, %v1189_v36, %v1188_v24  ;;  %613 = vrot.lane.b32.xlu1 %v612_v38, %s1290_s16  ;;  %v1198_v46 = vld [vmem:[%s2341_s0 + $0x28e] ss:$-112 sm:%s659_s11]   ;;  %v657_v48 = vsel %vm95_vm0, %v1197_v45, %v1196_v43  ;;  %s774_s11 = smov 192  ;;  %v1062_v33 = vld [vmem:[%s2341_s0 + $0x180] ss:$4 sm:$0xf]  }
  0x47   :  { %v631_v42 = vsel %vm317_vm4, %v1190_v40, %v626_v39  ;;  %v1199_v49 = vld [vmem:[%s2341_s0 + $0xe] ss:$16 sm:%s664_s17]   ;;  %v662_v51 = vsel %vm100_vm1, %v1198_v46, %v657_v48  ;;  %s729_s17 = smov 192  ;;  %v1212_v61 = vld [vmem:[%s2341_s0 + $0x1] ss:$16 sm:%s716_s7]   ;;  %s822_s7 = smov 192 }
  0x48   :  { %v636_v44 = vsel %vm322_vm5, %v1191_v41, %v631_v42  ;;  %v1202_v50 = vld [vmem:[%s2341_s0 + $0x10e] ss:$16 sm:%s676_s18]   ;;  %v667_v53 = vsel %vm105_vm2, %v1199_v49, %v662_v51  ;;  %v1213_v63 = vld [vmem:[%s2341_s0 + $0x1] ss:$16 sm:%s719_s12]   ;;  %s1291_s12 = smov 32   ;;  %s842_s18 = smov 48 }
  0x49   :  { %v640_v47 = vsel %vm326_vm6, %v1192_v37, %v636_v44  ;;  %v1203_v52 = vld [vmem:[%s2341_s0 + $0x10e] ss:$16 sm:%s679_s21]   ;;  %v722_v0 = vsel %vm95_vm0, %v1213_v63, %v1212_v61  ;;  %v1214_v1 = vld [vmem:[%s2341_s0 + $0x1] ss:$16 sm:%s724_s15]   ;;  %s784_s15 = smov 3  ;;  %s787_s21 = smov 12 }
  0x4a   :  { %641 = vrot.lane.b32.xlu0 %v640_v47, %s1290_s16  ;;  %v682_v54 = vsel %vm95_vm0, %v1203_v52, %v1202_v50  ;;  %v1204_v55 = vld [vmem:[%s2341_s0 + $0x30e] ss:$-112 sm:%s684_s26]   ;;  %668 = vrot.lane.b32.xlu1 %v667_v53, %s1290_s16  ;;  %s746_s26 = smov 48  ;;  %v727_v3 = vsel %vm100_vm1, %v1214_v1, %v722_v0 }
  0x4b   :  { %v1205_v56 = vld [vmem:[%s2341_s0 + $0x8e] ss:$16 sm:%s689_s27]   ;;  %v687_v57 = vsel %vm100_vm1, %v1204_v55, %v682_v54  ;;  %v1215_v2 = vld [vmem:[%s2341_s0 + $0x1] ss:$16 sm:%s729_s17]   ;;  %s797_s27 = smov 192  ;;  %s837_s17 = smov 12 }
  0x4c   :  { %v1208_v58 = vld [vmem:[%s2341_s0 + $0x18e] ss:$-48 sm:%s701_s3]   ;;  %v692_v59 = vsel %vm105_vm2, %v1205_v56, %v687_v57  ;;  %v1216_v4 = vld [vmem:[%s2341_s0 + $0x81] ss:$16 sm:%s738_s22]   ;;  %v732_v5 = vsel %vm105_vm2, %v1215_v2, %v727_v3  ;;  %s792_s22 = smov 48  ;;  %s922_s3 = smov 192 }
  0x4d   :  { %v1209_v60 = vld [vmem:[%s2341_s0 + $0x14e] ss:$16 sm:%s704_s6]   ;;  %v1217_v6 = vld [vmem:[%s2341_s0 + $0x81] ss:$16 sm:%s741_s25]   ;;  %s817_s6 = smov 48 }
  0x4e   :  { %693 = vrot.lane.b32.xlu0 %v692_v59, %s1290_s16  ;;  %v707_v62 = vsel %vm95_vm0, %v1209_v60, %v1208_v58  ;;  %v1218_v7 = vld [vmem:[%s2341_s0 + $0x81] ss:$16 sm:%s746_s26]   ;;  %v744_v8 = vsel %vm95_vm0, %v1217_v6, %v1216_v4  ;;  %1063 = vst.msk [vmem:[%s2342_s1 + $0x60] ss:$8 sm:$0xf] %vm3_vm7, %v1062_v33   ;;  %s909_s26 = smov 3 }
  0x4f   :  { %708 = vrot.lane.b32.xlu1 %v707_v62, %s1290_s16  ;;  %v1219_v9 = vld [vmem:[%s2341_s0 + $0x81] ss:$16 sm:%s751_s2]   ;;  %v749_v10 = vsel %vm100_vm1, %v1218_v7, %v744_v8  ;;  %s812_s2 = smov 12  ;;  %s917_s16 = smov 48  ;;  %v1262_v53 = vld [vmem:[%s2341_s0 + $0x189] sm:$0x1]  }
  0x50   :  { %v1221_v11 = vld [vmem:[%s2341_s0 + $0x101] ss:$16 sm:%s761_s4]   ;;  %v754_v13 = vsel %vm105_vm2, %v1219_v9, %v749_v10  ;;  %v1227_v20 = vld [vmem:[%s2341_s0 - $0xb] ss:$16 sm:%s787_s21]   ;;  %s867_s4 = smov 48  ;;  %s964_s21 = smov 3 }
  0x51   :  { %v1222_v12 = vld [vmem:[%s2341_s0 + $0x101] ss:$16 sm:%s764_s5]   ;;  %v1228_v21 = vld [vmem:[%s2341_s0 - $0xb] ss:$16 sm:%s792_s22]   ;;  %s872_s5 = smov 192  ;;  %s1017_s22 = smov 12 }
  0x52   :  { %733 = vrot.lane.b32.xlu0 %v732_v5, %s1291_s12  ;;  %v767_v14 = vsel %vm95_vm0, %v1222_v12, %v1221_v11  ;;  %v1223_v15 = vld [vmem:[%s2341_s0 + $0x101] ss:$16 sm:%s769_s10]   ;;  %s834_s10 = smov 3  ;;  %v1266_v63 = vld [vmem:[%s2341_s0 + $0x46] sm:$0x80]  }
  0x53   :  { %v1224_v16 = vld [vmem:[%s2341_s0 + $0x101] ss:$16 sm:%s774_s11]   ;;  %755 = vrot.lane.b32.xlu1 %v754_v13, %s1291_s12  ;;  %v772_v17 = vsel %vm100_vm1, %v1223_v15, %v767_v14  ;;  %s997_s11 = smov 48 }
  0x54   :  { %v1226_v18 = vld [vmem:[%s2341_s0 + $0x181] ss:$-380 sm:%s784_s15]   ;;  %v777_v19 = vsel %vm105_vm2, %v1224_v16, %v772_v17  ;;  %s946_s15 = smov 96 }
  0x55   :  { %v790_v22 = vsel %vm95_vm0, %v1227_v20, %v1226_v18  ;;  %v1229_v23 = vld [vmem:[%s2341_s0 - $0xb] ss:$16 sm:%s797_s27]   ;;  %s862_s27 = smov 12  ;;  %v1246_v44 = vld [vmem:[%s2341_s0 - $0x17] ss:$16 sm:%s867_s4]  }
  0x56   :  { %778 = vrot.lane.b32.xlu0 %v777_v19, %s1291_s12  ;;  %v795_v24 = vsel %vm100_vm1, %v1228_v21, %v790_v22  ;;  %v1232_v25 = vld [vmem:[%s2341_s0 + $0x85] ss:$16 sm:%s809_s30]  }
  0x57   :  { %v1233_v26 = vld [vmem:[%s2341_s0 + $0x85] ss:$16 sm:%s812_s2]   ;;  %v800_v27 = vsel %vm105_vm2, %v1229_v23, %v795_v24  ;;  %v1245_v41 = vld [vmem:[%s2341_s0 - $0x17] ss:$16 sm:%s862_s27]   ;;  %s912_s27 = smov 12 }
  0x58   :  { %v815_v28 = vsel %vm95_vm0, %v1233_v26, %v1232_v25  ;;  %v1234_v29 = vld [vmem:[%s2341_s0 + $0x85] ss:$16 sm:%s817_s6]   ;;  %801 = vrot.lane.b32.xlu1 %v800_v27, %s1291_s12  ;;  %s992_s6 = smov 12 }
  0x59   :  { %v1235_v30 = vld [vmem:[%s2341_s0 + $0x385] ss:$-112 sm:%s822_s7]   ;;  %v820_v31 = vsel %vm100_vm1, %v1234_v29, %v815_v28  ;;  %v1247_v45 = vld [vmem:[%s2341_s0 - $0x17] ss:$16 sm:%s872_s5]  }
  0x5a   :  { %v1238_v32 = vld [vmem:[%s2341_s0 + $0x105] ss:$16 sm:%s834_s10]   ;;  %v825_v34 = vsel %vm105_vm2, %v1235_v30, %v820_v31  ;;  %s884_s10 = smov 3  ;;  %v1256_v55 = vld [vmem:[%s2341_s0 + $0x109] ss:$16 sm:%s909_s26]   ;;  %s967_s26 = smov 12 }
  0x5b   :  { %v1239_v35 = vld [vmem:[%s2341_s0 + $0x105] ss:$16 sm:%s837_s17]   ;;  %826 = vrot.lane.b32.xlu0 %v825_v34, %s1291_s12  ;;  %s887_s17 = smov 12 }
  0x5c   :  { %v1240_v36 = vld [vmem:[%s2341_s0 + $0x105] ss:$16 sm:%s842_s18]   ;;  %v840_v37 = vsel %vm95_vm0, %v1239_v35, %v1238_v32  ;;  %s892_s18 = smov 48  ;;  %v1250_v47 = vld [vmem:[%s2341_s0 + $0x89] ss:$16 sm:%s884_s10]  }
  0x5d   :  { %v1241_v38 = vld [vmem:[%s2341_s0 + $0x405] ss:$-112 sm:%s847_s23]   ;;  %v845_v39 = vsel %vm100_vm1, %v1240_v36, %v840_v37  ;;  %s897_s23 = smov 192  ;;  %v1251_v49 = vld [vmem:[%s2341_s0 + $0x89] ss:$16 sm:%s887_s17]  }
  0x5e   :  { %v1244_v40 = vld [vmem:[%s2341_s0 + $0x185] ss:$-16 sm:%s859_s24]   ;;  %v850_v42 = vsel %vm105_vm2, %v1241_v38, %v845_v39  ;;  %v1252_v50 = vld [vmem:[%s2341_s0 + $0x89] ss:$16 sm:%s892_s18]   ;;  %v890_v51 = vsel %vm95_vm0, %v1251_v49, %v1250_v47 }
  0x5f   :  { %v865_v43 = vsel %vm95_vm0, %v1245_v41, %v1244_v40  ;;  %851 = vrot.lane.b32.xlu1 %v850_v42, %s1291_s12  ;;  %v1253_v52 = vld [vmem:[%s2341_s0 + $0x9] ss:$16 sm:%s897_s23]   ;;  %v895_v54 = vsel %vm100_vm1, %v1252_v50, %v890_v51 }
  0x60   :  { %v870_v46 = vsel %vm100_vm1, %v1246_v44, %v865_v43  ;;  %v1257_v56 = vld [vmem:[%s2341_s0 + $0x109] ss:$16 sm:%s912_s27]   ;;  %v900_v57 = vsel %vm105_vm2, %v1253_v52, %v895_v54  ;;  %s972_s27 = smov 48  ;;  %v1264_v2 = vld [vmem:[%s2341_s0 - $0x23] ss:$16 sm:%s941_s14]  }
  0x61   :  { %v875_v48 = vsel %vm105_vm2, %v1247_v45, %v870_v46  ;;  %v915_v58 = vsel %vm95_vm0, %v1257_v56, %v1256_v55  ;;  %v1258_v59 = vld [vmem:[%s2341_s0 + $0x109] ss:$16 sm:%s917_s16]   ;;  %v1265_v3 = vld [vmem:[%s2341_s0 - $0x23] ss:$16 sm:%s946_s15]   ;;  %s977_s16 = smov 192 }
  0x62   :  { %876 = vrot.lane.b32.xlu0 %v875_v48, %s1291_s12  ;;  %v1259_v60 = vld [vmem:[%s2341_s0 + $0x89] ss:$16 sm:%s922_s3]   ;;  %v920_v61 = vsel %vm100_vm1, %v1258_v59, %v915_v58  ;;  %s989_s3 = smov 3 }
  0x63   :  { %901 = vrot.lane.b32.xlu1 %v900_v57, %s1291_s12  ;;  %v1263_v62 = vld [vmem:[%s2341_s0 + $0x159] ss:$16 sm:%s936_s8]   ;;  %v925_v0 = vsel %vm105_vm2, %v1259_v60, %v920_v61 }
  0x64   :  { %v939_v1 = vsel %vm312_vm3, %v1263_v62, %v1262_v53  ;;  %v1270_v5 = vld [vmem:[%s2341_s0 + $0x8d] ss:$16 sm:%s964_s21]  }
  0x65   :  { %v944_v4 = vsel %vm317_vm4, %v1264_v2, %v939_v1  ;;  %v1271_v7 = vld [vmem:[%s2341_s0 + $0x8d] ss:$16 sm:%s967_s26]  }
  0x66   :  { %926 = vrot.lane.b32.xlu0 %v925_v0, %s1291_s12  ;;  %v949_v6 = vsel %vm322_vm5, %v1265_v3, %v944_v4  ;;  %v1272_v8 = vld [vmem:[%s2341_s0 + $0x28d] ss:$-112 sm:%s972_s27]   ;;  %v970_v10 = vsel %vm95_vm0, %v1271_v7, %v1270_v5 }
  0x67   :  { %v953_v9 = vsel %vm326_vm6, %v1266_v63, %v949_v6  ;;  %v1273_v11 = vld [vmem:[%s2341_s0 + $0xd] ss:$16 sm:%s977_s16]   ;;  %v975_v13 = vsel %vm100_vm1, %v1272_v8, %v970_v10 }
  0x68   :  { %v1276_v12 = vld [vmem:[%s2341_s0 + $0x10d] ss:$16 sm:%s989_s3]   ;;  %954 = vrot.lane.b32.xlu1 %v953_v9, %s1291_s12  ;;  %v980_v15 = vsel %vm105_vm2, %v1273_v11, %v975_v13 }
  0x69   :  { %v1277_v14 = vld [vmem:[%s2341_s0 + $0x10d] ss:$16 sm:%s992_s6]  }
  0x6a   :  { %v995_v16 = vsel %vm95_vm0, %v1277_v14, %v1276_v12  ;;  %v1278_v17 = vld [vmem:[%s2341_s0 + $0x30d] ss:$-112 sm:%s997_s11]   ;;  %981 = vrot.lane.b32.xlu0 %v980_v15, %s1291_s12 }
  0x6b   :  { %v1279_v18 = vld [vmem:[%s2341_s0 + $0x8d] ss:$16 sm:%s1002_s13]   ;;  %v1000_v19 = vsel %vm100_vm1, %v1278_v17, %v995_v16 }
  0x6c   :  { %v1282_v20 = vld [vmem:[%s2341_s0 + $0x18d] ss:$-48 sm:%s1014_s19]   ;;  %v1005_v21 = vsel %vm105_vm2, %v1279_v18, %v1000_v19 }
  0x6d   :  { %v1283_v22 = vld [vmem:[%s2341_s0 + $0x14d] ss:$16 sm:%s1017_s22]   ;;  %1006 = vrot.lane.b32.xlu1 %v1005_v21, %s1291_s12 }
  0x6e   :  { %v1020_v23 = vsel %vm95_vm0, %v1283_v22, %v1282_v20 }
  0x6f   :  { %1021 = vrot.lane.b32.xlu0 %v1020_v23, %s1291_s12 }
  0x78   :  { %v108_v24 = vpop.permute.xlu0 %107  }
  0x79   :  { %110 = vst.msk [vmem:[%s2342_s1] sm:$0xff] %vm109_vm8, %v108_v24  }
  0x7c   :  { %v153_v25 = vpop.permute.xlu1 %152  }
  0x7d   :  { %1077 = vst.msk [vmem:[%s2342_s1 + $0x40] sm:$0xff] %vm109_vm8, %v153_v25  }
  0x80   :  { %v130_v26 = vpop.permute.xlu0 %129  }
  0x81   :  { %1072 = vst.msk [vmem:[%s2342_s1 + $0x20] sm:$0xff] %vm109_vm8, %v130_v26  }
  0x83   :  { %v176_v27 = vpop.permute.xlu1 %175  }
  0x84   :  { %1082 = vst.msk [vmem:[%s2342_s1 + $0x60] ss:$-88 sm:$0x3] %vm109_vm8, %v176_v27   ;;  %1083 = vst.msk [vmem:[%s2342_s1 + $0x7] sm:$0xfc] %vm109_vm8, %v176_v27   ;;  %v201_v28 = vpop.permute.xlu0 %200  }
  0x85   :  { %1089 = vst.msk [vmem:[%s2342_s1 + $0x8] sm:$0x80] %vm109_vm8, %v201_v28   ;;  %1088 = vst.msk [vmem:[%s2342_s1 + $0x28] sm:$0x7f] %vm109_vm8, %v201_v28  }
  0x88   :  { %v226_v29 = vpop.permute.xlu1 %225  }
  0x89   :  { %1095 = vst.msk [vmem:[%s2342_s1 + $0x28] sm:$0x80] %vm109_vm8, %v226_v29   ;;  %1094 = vst.msk [vmem:[%s2342_s1 + $0x48] sm:$0x7f] %vm109_vm8, %v226_v29  }
  0x8b   :  { %v251_v30 = vpop.permute.xlu0 %250  }
  0x8c   :  { %1100 = vst.msk [vmem:[%s2342_s1 + $0x68] ss:$-25 sm:$0x3] %vm109_vm8, %v251_v30   ;;  %1101 = vst.msk [vmem:[%s2342_s1 + $0xe] sm:$0xfc] %vm109_vm8, %v251_v30   ;;  %v276_v31 = vpop.permute.xlu1 %275  }
  0x8d   :  { %1107 = vst.msk [vmem:[%s2342_s1 + $0x10] sm:$0xc0] %vm109_vm8, %v276_v31   ;;  %1106 = vst.msk [vmem:[%s2342_s1 + $0x30] sm:$0x3f] %vm109_vm8, %v276_v31  }
  0x8f   :  { %v301_v32 = vpop.permute.xlu0 %300  }
  0x90   :  { %1113 = vst.msk [vmem:[%s2342_s1 + $0x30] sm:$0xc0] %vm109_vm8, %v301_v32   ;;  %1112 = vst.msk [vmem:[%s2342_s1 + $0x50] sm:$0x3f] %vm109_vm8, %v301_v32  }
  0x93   :  { %v329_v33 = vpop.permute.xlu1 %328   ;;  %v356_v34 = vpop.permute.xlu0 %355  }
  0x94   :  { %1119 = vst.msk [vmem:[%s2342_s1 + $0x70] ss:$-26 sm:$0x3] %vm109_vm8, %v329_v33   ;;  %1120 = vst.msk [vmem:[%s2342_s1 + $0xd5] ss:$-63 sm:$0xc] %vm109_vm8, %v329_v33  }
  0x95   :  { %1121 = vst.msk [vmem:[%s2342_s1 + $0x15] sm:$0xf0] %vm109_vm8, %v329_v33   ;;  %1127 = vst.msk [vmem:[%s2342_s1 + $0x18] sm:$0xe0] %vm109_vm8, %v356_v34  }
  0x96   :  { %1126 = vst.msk [vmem:[%s2342_s1 + $0x38] sm:$0x1f] %vm109_vm8, %v356_v34  }
  0x97   :  { %v381_v35 = vpop.permute.xlu1 %380  }
  0x98   :  { %1133 = vst.msk [vmem:[%s2342_s1 + $0x38] sm:$0xe0] %vm109_vm8, %v381_v35   ;;  %1132 = vst.msk [vmem:[%s2342_s1 + $0x58] sm:$0x1f] %vm109_vm8, %v381_v35   ;;  %v396_v36 = vpop.permute.xlu0 %395  }
  0x99   :  { %1136 = vst.msk [vmem:[%s2342_s1 + $0x78] ss:$-27 sm:$0x3] %vm109_vm8, %v396_v36   ;;  %1137 = vst.msk [vmem:[%s2342_s1 + $0x5c] sm:$0xc] %vm109_vm8, %v396_v36  }
  0x9b   :  { %v421_v37 = vpop.permute.xlu1 %420  }
  0x9c   :  { %423 = vst.msk [vmem:[%s2342_s1] sm:$0xff] %vm422_vm9, %v421_v37  }
  0x9d   :  { %v443_v38 = vpop.permute.xlu0 %442  }
  0x9e   :  { %1146 = vst.msk [vmem:[%s2342_s1 + $0x20] sm:$0xff] %vm422_vm9, %v443_v38  }
  0xa1   :  { %v466_v39 = vpop.permute.xlu1 %465  }
  0xa2   :  { %1151 = vst.msk [vmem:[%s2342_s1 + $0x40] sm:$0xff] %vm422_vm9, %v466_v39  }
  0xa4   :  { %v489_v40 = vpop.permute.xlu0 %488  }
  0xa5   :  { %1156 = vst.msk [vmem:[%s2342_s1 + $0x60] ss:$-88 sm:$0x3] %vm422_vm9, %v489_v40   ;;  %1157 = vst.msk [vmem:[%s2342_s1 + $0x7] sm:$0xfc] %vm422_vm9, %v489_v40  }
  0xa8   :  { %v514_v41 = vpop.permute.xlu1 %513  }
  0xa9   :  { %1162 = vst.msk [vmem:[%s2342_s1 + $0x28] sm:$0x7f] %vm422_vm9, %v514_v41   ;;  %1163 = vst.msk [vmem:[%s2342_s1 + $0x8] sm:$0x80] %vm422_vm9, %v514_v41  }
  0xac   :  { %v539_v42 = vpop.permute.xlu0 %538  }
  0xad   :  { %1168 = vst.msk [vmem:[%s2342_s1 + $0x48] sm:$0x7f] %vm422_vm9, %v539_v42   ;;  %1169 = vst.msk [vmem:[%s2342_s1 + $0x28] sm:$0x80] %vm422_vm9, %v539_v42  }
  0xaf   :  { %v564_v43 = vpop.permute.xlu1 %563  }
  0xb0   :  { %1174 = vst.msk [vmem:[%s2342_s1 + $0x68] ss:$-25 sm:$0x3] %vm422_vm9, %v564_v43   ;;  %1175 = vst.msk [vmem:[%s2342_s1 + $0xe] sm:$0xfc] %vm422_vm9, %v564_v43  }
  0xb4   :  { %v589_v44 = vpop.permute.xlu0 %588  }
  0xb5   :  { %1180 = vst.msk [vmem:[%s2342_s1 + $0x30] sm:$0x3f] %vm422_vm9, %v589_v44   ;;  %1181 = vst.msk [vmem:[%s2342_s1 + $0x10] sm:$0xc0] %vm422_vm9, %v589_v44  }
  0xb8   :  { %v614_v45 = vpop.permute.xlu1 %613  }
  0xb9   :  { %1186 = vst.msk [vmem:[%s2342_s1 + $0x50] sm:$0x3f] %vm422_vm9, %v614_v45   ;;  %1187 = vst.msk [vmem:[%s2342_s1 + $0x30] sm:$0xc0] %vm422_vm9, %v614_v45  }
  0xbc   :  { %v642_v46 = vpop.permute.xlu0 %641   ;;  %v669_v47 = vpop.permute.xlu1 %668  }
  0xbd   :  { %1193 = vst.msk [vmem:[%s2342_s1 + $0x70] ss:$-26 sm:$0x3] %vm422_vm9, %v642_v46   ;;  %1194 = vst.msk [vmem:[%s2342_s1 + $0xd5] ss:$-63 sm:$0xc] %vm422_vm9, %v642_v46  }
  0xbe   :  { %1195 = vst.msk [vmem:[%s2342_s1 + $0x15] sm:$0xf0] %vm422_vm9, %v642_v46   ;;  %1200 = vst.msk [vmem:[%s2342_s1 + $0x38] sm:$0x1f] %vm422_vm9, %v669_v47  }
  0xbf   :  { %1201 = vst.msk [vmem:[%s2342_s1 + $0x18] sm:$0xe0] %vm422_vm9, %v669_v47  }
  0xc0   :  { %v694_v48 = vpop.permute.xlu0 %693  }
  0xc1   :  { %1206 = vst.msk [vmem:[%s2342_s1 + $0x58] sm:$0x1f] %vm422_vm9, %v694_v48   ;;  %1207 = vst.msk [vmem:[%s2342_s1 + $0x38] sm:$0xe0] %vm422_vm9, %v694_v48   ;;  %v709_v49 = vpop.permute.xlu1 %708  }
  0xc2   :  { %1210 = vst.msk [vmem:[%s2342_s1 + $0x78] ss:$-27 sm:$0x3] %vm422_vm9, %v709_v49   ;;  %1211 = vst.msk [vmem:[%s2342_s1 + $0x5c] sm:$0xc] %vm422_vm9, %v709_v49  }
  0xc4   :  { %v734_v50 = vpop.permute.xlu0 %733  }
  0xc5   :  { %736 = vst.msk [vmem:[%s2342_s1] sm:$0xff] %vm735_vm10, %v734_v50   ;;  %v756_v51 = vpop.permute.xlu1 %755  }
  0xc6   :  { %1220 = vst.msk [vmem:[%s2342_s1 + $0x20] sm:$0xff] %vm735_vm10, %v756_v51  }
  0xc8   :  { %v779_v52 = vpop.permute.xlu0 %778  }
  0xc9   :  { %1225 = vst.msk [vmem:[%s2342_s1 + $0x40] sm:$0xff] %vm735_vm10, %v779_v52  }
  0xca   :  { %v802_v53 = vpop.permute.xlu1 %801  }
  0xcb   :  { %1230 = vst.msk [vmem:[%s2342_s1 + $0x60] ss:$-88 sm:$0x3] %vm735_vm10, %v802_v53   ;;  %1231 = vst.msk [vmem:[%s2342_s1 + $0x7] sm:$0xfc] %vm735_vm10, %v802_v53  }
  0xcd   :  { %v827_v54 = vpop.permute.xlu0 %826  }
  0xce   :  { %1236 = vst.msk [vmem:[%s2342_s1 + $0x28] sm:$0x7f] %vm735_vm10, %v827_v54   ;;  %1237 = vst.msk [vmem:[%s2342_s1 + $0x8] sm:$0x80] %vm735_vm10, %v827_v54  }
  0xd1   :  { %v852_v55 = vpop.permute.xlu1 %851  }
  0xd2   :  { %1242 = vst.msk [vmem:[%s2342_s1 + $0x48] sm:$0x7f] %vm735_vm10, %v852_v55   ;;  %1243 = vst.msk [vmem:[%s2342_s1 + $0x28] sm:$0x80] %vm735_vm10, %v852_v55  }
  0xd4   :  { %v877_v56 = vpop.permute.xlu0 %876  }
  0xd5   :  { %1248 = vst.msk [vmem:[%s2342_s1 + $0x68] ss:$-25 sm:$0x3] %vm735_vm10, %v877_v56   ;;  %1249 = vst.msk [vmem:[%s2342_s1 + $0xe] sm:$0xfc] %vm735_vm10, %v877_v56   ;;  %v902_v57 = vpop.permute.xlu1 %901  }
  0xd6   :  { %1254 = vst.msk [vmem:[%s2342_s1 + $0x30] sm:$0x3f] %vm735_vm10, %v902_v57   ;;  %1255 = vst.msk [vmem:[%s2342_s1 + $0x10] sm:$0xc0] %vm735_vm10, %v902_v57  }
  0xd8   :  { %v927_v58 = vpop.permute.xlu0 %926  }
  0xd9   :  { %1260 = vst.msk [vmem:[%s2342_s1 + $0x50] sm:$0x3f] %vm735_vm10, %v927_v58   ;;  %1261 = vst.msk [vmem:[%s2342_s1 + $0x30] sm:$0xc0] %vm735_vm10, %v927_v58  }
  0xda   :  { %v955_v59 = vpop.permute.xlu1 %954  }
  0xdb   :  { %1267 = vst.msk [vmem:[%s2342_s1 + $0x70] ss:$-26 sm:$0x3] %vm735_vm10, %v955_v59   ;;  %1268 = vst.msk [vmem:[%s2342_s1 + $0xd5] ss:$-63 sm:$0xc] %vm735_vm10, %v955_v59  }
  0xdc   :  { %1269 = vst.msk [vmem:[%s2342_s1 + $0x15] sm:$0xf0] %vm735_vm10, %v955_v59   ;;  %v982_v60 = vpop.permute.xlu0 %981  }
  0xdd   :  { %1274 = vst.msk [vmem:[%s2342_s1 + $0x38] sm:$0x1f] %vm735_vm10, %v982_v60   ;;  %1275 = vst.msk [vmem:[%s2342_s1 + $0x18] sm:$0xe0] %vm735_vm10, %v982_v60  }
  0xdf   :  { %v1007_v61 = vpop.permute.xlu1 %1006  }
  0xe0   :  { %1280 = vst.msk [vmem:[%s2342_s1 + $0x58] sm:$0x1f] %vm735_vm10, %v1007_v61   ;;  %1281 = vst.msk [vmem:[%s2342_s1 + $0x38] sm:$0xe0] %vm735_vm10, %v1007_v61  }
  0xe1   :  { %v1022_v62 = vpop.permute.xlu0 %1021  }
  0xe2   :  { %1284 = vst.msk [vmem:[%s2342_s1 + $0x78] ss:$-27 sm:$0x3] %vm735_vm10, %v1022_v62   ;;  %1285 = vst.msk [vmem:[%s2342_s1 + $0x5c] sm:$0xc] %vm735_vm10, %v1022_v62  }

// kernel: inception_dw_conv2d.1
= control target key start
LH: loop header
LB: loop body
LE: loop exit
PB: predicated region body
PF: predicated region fallthrough
CT: control target
= control target key end

     0   :  { %s3802_s12 = smov 0   ;;  %s6569_s0 = inlined_call_operand.vmem [shape: f32[2,16,512], index: 0, kind: input, shape index: {}]   ;;  %s6570_s1 = inlined_call_operand.vmem [shape: f32[25,512], index: 1, kind: input, shape index: {}]   ;;  %s6571_s2 = inlined_call_operand.vmem [shape: f32[1,512], index: 2, kind: input, shape index: {}]   ;;  %s6572_s3 = inlined_call_operand.vmem [shape: f32[2,16,512], index: 3, kind: output, shape index: {}]  }
   0x1 LB: > { %s3679_s13 = sadd.s32 4294967295, %s3776_s12   ;;  %p3683_p0 = scmp.ge.s32.totalorder %s3776_s12, 1  ;;  %s3776_s12 = sphi %s3802_s12, %s13_s12  }
   0x2   : > { %p137_p1 = scmp.lt.s32.totalorder %s3776_s12, 3 }
   0x4   : > { %p138_p2 = pnand %p3683_p0, %p137_p1 }
   0x6   : > { %141 = sbr.rel (%p138_p2) target bundleno = 2667 (0xa6b), region = 32 }
   0xd   : > { %p161_p3 = scmp.lt.s32.totalorder %s3679_s13, 1  ;;  %v3778_v0 = vmov 0.0   ;;  %s3779_s18 = smov 32   ;;  %vm217_vm0 = vcmask 1044480   ;;  %v301_v19 = vlaneseq  ;;  %vm177_vm1 = vcmask 523264  }
   0xe   : > { %172 = vst [vmem:[#allocation2 + $0x8] sm:$0xff] %v3778_v0  ;;  %171 = vst [vmem:[#allocation2] sm:$0xff] %v3778_v0  ;;  %v3688_v25 = vld [vmem:[%s6570_s1 + $0x1] ss:$8 sm:$0xf]  ;;  %s3780_s23 = smov 64  }
   0xf   : > { %s7250_s13 = smov (!%p161_p3, %s3679_s13), 1  ;;  %173 = vst [vmem:[#allocation2 + $0x10] sm:$0xff] %v3778_v0  ;;  %174 = vst [vmem:[#allocation2 + $0x18] sm:$0xff] %v3778_v0  ;;  %v302_v22 = vshrl.u32 %v301_v19, 7  ;;  %s3781_s26 = smov 96   ;;  %vm279_vm2 = vcmask 1047813  }
  0x10   : > { %175 = vst [vmem:[#allocation2 + $0x20] sm:$0xff] %v3778_v0  ;;  %176 = vst [vmem:[#allocation2 + $0x28] sm:$0xff] %v3778_v0  ;;  %s3714_s14 = sshll.u32 %s7250_s13, 6  ;;  %v3689_v32 = vld [vmem:[%s6570_s1 + $0x2] ss:$8 sm:$0xf] }
  0x11   : > { %180 = vst [vmem:[#allocation2 + $0x40] sm:$0xff] %v3778_v0  ;;  %184 = vst [vmem:[#allocation2 + $0x60] sm:$0xff] %v3778_v0  ;;  %s165_s17 = scalar_lea.vmem %s6569_s0, %s3714_s14  ;;  %v3832_v23 = vsub.s32 1, %v302_v22  ;;  %v3834_v24 = vsub.s32 0, %v302_v22  ;;  %v3846_v28 = vsub.s32 3, %v302_v22  ;;  %v3848_v29 = vsub.s32 2, %v302_v22  ;;  %s6518_s30 = scalar_lea.vmem %s6572_s3, %s3714_s14 }
  0x12   : > { %186 = vst [vmem:[#allocation2 + $0x70] sm:$0xff] %v3778_v0  ;;  %187 = vst [vmem:[#allocation2 + $0x78] sm:$0xff] %v3778_v0  ;;  %v203_v1 = vld [vmem:[%s165_s17 + $0x10] sm:$0xff]  ;;  %v201_v2 = vld [vmem:[%s165_s17] sm:$0xff]  ;;  %vm254_vm3 = vcmask 261120   ;;  %vm284_vm4 = vcmask 261125  }
  0x13   : > { %188 = vst [vmem:[#allocation2 + $0x80] sm:$0xff] %v3778_v0  ;;  %189 = vst [vmem:[#allocation2 + $0x88] sm:$0xff] %v3778_v0  ;;  %v204_v3 = vld [vmem:[%s165_s17 + $0x18] sm:$0xff]  ;;  %v220_v4 = vrot.slane %v203_v1, 3  ;;  %v218_v5 = vrot.slane %v201_v2, 3  ;;  %v202_v6 = vld [vmem:[%s165_s17 + $0x8] sm:$0xff]  ;;  %v392_v26 = vrot.slane %v3688_v25, %v3832_v23  ;;  %v388_v27 = vrot.slane %v3688_v25, %v3834_v24 }
  0x14   : > { %190 = vst [vmem:[#allocation2 + $0x90] sm:$0xff] %v3778_v0  ;;  %191 = vst [vmem:[#allocation2 + $0x98] sm:$0xff] %v3778_v0  ;;  %v206_v7 = vld [vmem:[%s165_s17 + $0x28] sm:$0xff]  ;;  %v205_v8 = vld [vmem:[%s165_s17 + $0x20] sm:$0xff]  ;;  %v221_v9 = vrot.slane %v204_v3, 3  ;;  %v219_v10 = vrot.slane %v202_v6, 3  ;;  %v400_v30 = vrot.slane %v3688_v25, %v3846_v28  ;;  %v396_v31 = vrot.slane %v3688_v25, %v3848_v29 }
  0x15   : > { %194 = vst [vmem:[#allocation2 + $0xb0] sm:$0x3] %v3778_v0  ;;  %195 = vst [vmem:[#allocation2 + $0xb8] sm:$0x3] %v3778_v0  ;;  %234 = vrot.lane.b32.xlu1 %v220_v4, %s3779_s18  ;;  %230 = vrot.lane.b32.xlu0 %v218_v5, %s3779_s18  ;;  %v224_v11 = vrot.slane %v206_v7, 3  ;;  %v222_v12 = vrot.slane %v205_v8, 3  ;;  %v520_v33 = vrot.slane %v3689_v32, %v3834_v24 }
  0x16   : > { %196 = vst [vmem:[#allocation2 + $0xc0] sm:$0x3] %v3778_v0  ;;  %197 = vst [vmem:[#allocation2 + $0xc8] sm:$0x3] %v3778_v0  ;;  %v208_v13 = vld [vmem:[%s165_s17 + $0x38] sm:$0xff]  ;;  %v207_v14 = vld [vmem:[%s165_s17 + $0x30] sm:$0xff]  ;;  %v524_v34 = vrot.slane %v3689_v32, %v3832_v23  ;;  %v528_v35 = vrot.slane %v3689_v32, %v3848_v29  ;;  %v532_v36 = vrot.slane %v3689_v32, %v3846_v28 }
  0x17   : > { %198 = vst [vmem:[#allocation2 + $0xd0] sm:$0x3] %v3778_v0  ;;  %v225_v15 = vsel %vm217_vm0, %v219_v10, %v224_v11  ;;  %v223_v16 = vsel %vm217_vm0, %v218_v5, %v222_v12  ;;  %v228_v17 = vrot.slane %v208_v13, 3  ;;  %v226_v18 = vrot.slane %v207_v14, 3  ;;  %6747 = vst [vmem:[#allocation3_spill] sm:$0xff] %v3832_v23 }
  0x18   : > { %6748 = vst [vmem:[#allocation4_spill] sm:$0xff] %v3834_v24  ;;  %178 = vst.msk [vmem:[#allocation2 + $0x30] sm:$0xff] %vm177_vm1, %v3778_v0  ;;  %v3690_v37 = vld [vmem:[%s6570_s1 + $0x3] ss:$8 sm:$0xf]  ;;  %vm286_vm5 = vcmask 1047808  }
  0x19   : > { %236 = vrot.lane.b32.xlu1 %v221_v9, %s3779_s18  ;;  %232 = vrot.lane.b32.xlu0 %v219_v10, %s3779_s18  ;;  %v229_v20 = vsel %vm217_vm0, %v221_v9, %v228_v17  ;;  %v227_v21 = vsel %vm217_vm0, %v220_v4, %v226_v18  ;;  %185 = vst.msk [vmem:[#allocation2 + $0x68] sm:$0xff] %vm177_vm1, %v3778_v0  ;;  %192 = vst.msk [vmem:[#allocation2 + $0xa0] sm:$0xff] %vm177_vm1, %v3778_v0  ;;  %v3879_v42 = vld [vmem:[%s6570_s1 + $0x7] ss:$8 sm:$0xf]  ;;  %vm292_vm6 = vcmask 1044736  }
  0x1a   : > { %6749 = vst [vmem:[#allocation5_spill] sm:$0xff] %v3846_v28  ;;  %6750 = vst [vmem:[#allocation6_spill] sm:$0xff] %v3848_v29  ;;  %v655_v38 = vrot.slane %v3690_v37, %v3832_v23  ;;  %v651_v39 = vrot.slane %v3690_v37, %v3834_v24  ;;  %v663_v40 = vrot.slane %v3690_v37, %v3846_v28  ;;  %vm297_vm7 = vcmask 258048   ;;  %v321_v1 = vld [vmem:[#allocation2] sm:$0xe0] }
  0x1b   : > { %v659_v41 = vrot.slane %v3690_v37, %v3848_v29  ;;  %v1037_v43 = vrot.slane %v3879_v42, %v3834_v24  ;;  %v329_v6 = vld [vmem:[#allocation2 + $0x70] sm:$0x1f]  ;;  %vm477_vm8 = vcmask 785408   ;;  %vm1232_vm9 = vcmask 1043456  }
  0x1c   : > { %vm1389_vm10 = vcmask 1042432   ;;  %vm1546_vm11 = vcmask 1041408   ;;  %vm831_vm12 = vcmask 1040384   ;;  %vm970_vm13 = vcmask 1046528  }
  0x1d   : > { %240 = vrot.lane.b32.xlu1 %v225_v15, %s3779_s18  ;;  %238 = vrot.lane.b32.xlu0 %v223_v16, %s3779_s18  ;;  %vm2146_vm14 = vcmask 1045504  }
  0x21   : > { %244 = vrot.lane.b32.xlu1 %v229_v20, %s3779_s18  ;;  %242 = vrot.lane.b32.xlu0 %v227_v21, %s3779_s18 }
  0x25   : > { %248 = vrot.lane.b32.xlu1 %v224_v11, %s3779_s18  ;;  %246 = vrot.lane.b32.xlu0 %v222_v12, %s3779_s18 }
  0x29   : > { %252 = vrot.lane.b32.xlu1 %v228_v17, %s3779_s18  ;;  %250 = vrot.lane.b32.xlu0 %v226_v18, %s3779_s18 }
  0x2d   : > { %403 = vrot.lane.b32.xlu1 %v392_v26, %s3779_s18  ;;  %401 = vrot.lane.b32.xlu0 %v388_v27, %s3779_s18 }
  0x31   : > { %407 = vrot.lane.b32.xlu1 %v400_v30, %s3779_s18  ;;  %405 = vrot.lane.b32.xlu0 %v396_v31, %s3779_s18 }
  0x35   : > { %533 = vrot.lane.b32.xlu1 %v520_v33, %s3780_s23  ;;  %535 = vrot.lane.b32.xlu0 %v524_v34, %s3780_s23 }
  0x39   : > { %537 = vrot.lane.b32.xlu1 %v528_v35, %s3780_s23  ;;  %539 = vrot.lane.b32.xlu0 %v532_v36, %s3780_s23 }
  0x3d   : > { %666 = vrot.lane.b32.xlu1 %v655_v38, %s3781_s26  ;;  %664 = vrot.lane.b32.xlu0 %v651_v39, %s3781_s26 }
  0x41   : > { %670 = vrot.lane.b32.xlu1 %v663_v40, %s3781_s26  ;;  %668 = vrot.lane.b32.xlu0 %v659_v41, %s3781_s26 }
  0x45   : > { %1050 = vrot.lane.b32.xlu1 %v1037_v43, %s3779_s18 }
  0x87   : > { %v235_v44 = vpop.permute.xlu1 %234  ;;  %v231_v45 = vpop.permute.xlu0 %230 }
  0x88   : > { %280 = vst.msk [vmem:[#allocation2 + $0x8] sm:$0xe0] %vm279_vm2, %v231_v45 }
  0x8b   : > { %v237_v46 = vpop.permute.xlu1 %236  ;;  %v233_v47 = vpop.permute.xlu0 %232 }
  0x8c   : > { %v257_v48 = vsel %vm254_vm3, %v235_v44, %v237_v46  ;;  %285 = vst.msk [vmem:[#allocation2 + $0x28] sm:$0xe0] %vm284_vm4, %v237_v46  ;;  %v255_v49 = vsel %vm254_vm3, %v231_v45, %v233_v47  ;;  %v256_v50 = vsel %vm254_vm3, %v233_v47, %v235_v44 }
  0x8d   : > { %283 = vst [vmem:[#allocation2 + $0x20] sm:$0xe0] %v257_v48  ;;  %281 = vst [vmem:[#allocation2 + $0x10] sm:$0xe0] %v255_v49 }
  0x8e   : > { %282 = vst [vmem:[#allocation2 + $0x18] sm:$0xe0] %v256_v50 }
  0x8f   : > { %v241_v51 = vpop.permute.xlu1 %240  ;;  %v239_v52 = vpop.permute.xlu0 %238  ;;  %v322_v21 = vld [vmem:[#allocation2 + $0x8] sm:$0xe0] }
  0x90   : > { %v3890_v53 = vsel %vm254_vm3, %v239_v52, %v241_v51  ;;  %287 = vst.msk [vmem:[#allocation2 + $0x40] sm:$0xff] %vm286_vm5, %v239_v52 }
  0x91   : > { %288 = vst [vmem:[#allocation2 + $0x48] sm:$0xff] %v3890_v53 }
  0x93   : > { %v245_v54 = vpop.permute.xlu1 %244  ;;  %v243_v55 = vpop.permute.xlu0 %242 }
  0x94   : > { %291 = vst.msk [vmem:[#allocation2 + $0x60] sm:$0xff] %vm254_vm3, %v245_v54  ;;  %v3895_v56 = vsel %vm254_vm3, %v241_v51, %v243_v55  ;;  %v3898_v57 = vsel %vm254_vm3, %v243_v55, %v245_v54  ;;  %v323_v37 = vld [vmem:[#allocation2 + $0x10] sm:$0xe0]  ;;  %v379_v41 = vld [vmem:[#allocation2 + $0x20] sm:$0xe0] }
  0x95   : > { %289 = vst [vmem:[#allocation2 + $0x50] sm:$0xff] %v3895_v56  ;;  %290 = vst [vmem:[#allocation2 + $0x58] sm:$0xff] %v3898_v57  ;;  %v324_v43 = vld [vmem:[#allocation2 + $0x18] sm:$0xe0] }
  0x97   : > { %v249_v58 = vpop.permute.xlu1 %248  ;;  %v247_v59 = vpop.permute.xlu0 %246  ;;  %v3934_v47 = vld [vmem:[#allocation2 + $0x40] sm:$0xff] }
  0x98   : > { %v261_v60 = vsel %vm254_vm3, %v247_v59, %v249_v58  ;;  %293 = vst.msk [vmem:[#allocation2 + $0x78] sm:$0x1f] %vm292_vm6, %v247_v59 }
  0x99   : > { %294 = vst [vmem:[#allocation2 + $0x80] sm:$0x1f] %v261_v60 }
  0x9b   : > { %v253_v61 = vpop.permute.xlu1 %252  ;;  %v251_v62 = vpop.permute.xlu0 %250 }
  0x9c   : > { %298 = vst.msk [vmem:[#allocation2 + $0x98] sm:$0x1f] %vm297_vm7, %v253_v61  ;;  %v262_v63 = vsel %vm254_vm3, %v249_v58, %v251_v62  ;;  %v263_v0 = vsel %vm254_vm3, %v251_v62, %v253_v61 }
  0x9d   : > { %295 = vst [vmem:[#allocation2 + $0x88] sm:$0x1f] %v262_v63  ;;  %296 = vst [vmem:[#allocation2 + $0x90] sm:$0x1f] %v263_v0 }
  0x9f   : > { %v404_v2 = vpop.permute.xlu1 %403  ;;  %v402_v3 = vpop.permute.xlu0 %401  ;;  %v330_v27 = vld [vmem:[#allocation2 + $0x78] sm:$0x1f] }
  0xa0   : > { %v422_v4 = vmul.f32 0.0, %v402_v3  ;;  %v417_v5 = vmul.f32 %v402_v3, %v321_v1  ;;  %v427_v9 = vmul.f32 %v402_v3, %v329_v6  ;;  %v409_v20 = vsel %vm254_vm3, %v402_v3, %v404_v2  ;;  %v331_v51 = vld [vmem:[#allocation2 + $0x80] sm:$0x1f] }
  0xa1   : > { %v418_v22 = vmul.f32 %v409_v20, %v322_v21  ;;  %v428_v31 = vmul.f32 %v409_v20, %v330_v27  ;;  %v423_v48 = vmul.f32 %v409_v20, %v3934_v47 }
  0xa2   : > { %457 = vrot.lane.b32.xlu1 %v422_v4, %s3781_s26  ;;  %447 = vrot.lane.b32.xlu0 %v417_v5, %s3781_s26 }
  0xa3   : > { %v3907_v7 = vpop.permute.xlu1 %407  ;;  %v406_v8 = vpop.permute.xlu0 %405 }
  0xa4   : > { %v410_v36 = vsel %vm254_vm3, %v404_v2, %v406_v8  ;;  %v411_v40 = vsel %vm254_vm3, %v406_v8, %v3907_v7  ;;  %v421_v44 = vmul.f32 %v3907_v7, %v379_v41  ;;  %v332_v46 = vld [vmem:[#allocation2 + $0x88] sm:$0x1f]  ;;  %v381_v55 = vld [vmem:[#allocation2 + $0x90] sm:$0x1f] }
  0xa5   : > { %v419_v38 = vmul.f32 %v410_v36, %v323_v37  ;;  %v420_v45 = vmul.f32 %v411_v40, %v324_v43  ;;  %v430_v49 = vmul.f32 %v411_v40, %v332_v46  ;;  %v429_v52 = vmul.f32 %v410_v36, %v331_v51 }
  0xa6   : > { %467 = vrot.lane.b32.xlu0 %v427_v9, %s3781_s26  ;;  %v431_v58 = vmul.f32 %v3907_v7, %v381_v55 }
  0xa7   : > { %v534_v10 = vpop.permute.xlu1 %533  ;;  %v536_v11 = vpop.permute.xlu0 %535 }
  0xa8   : > { %v549_v12 = vmul.f32 %v534_v10, %v321_v1  ;;  %v554_v13 = vmul.f32 0.0, %v534_v10  ;;  %v559_v14 = vmul.f32 %v534_v10, %v329_v6  ;;  %v541_v26 = vsel %vm177_vm1, %v534_v10, %v536_v11 }
  0xa9   : > { %v550_v32 = vmul.f32 %v541_v26, %v322_v21  ;;  %v560_v34 = vmul.f32 %v541_v26, %v330_v27  ;;  %v555_v62 = vmul.f32 %v541_v26, %v3934_v47  ;;  %v3987_v26 = vld [vmem:[#allocation2 + $0x8] sm:$0xff] }
  0xaa   : > { %579 = vrot.lane.b32.xlu1 %v549_v12, %s3780_s23  ;;  %589 = vrot.lane.b32.xlu0 %v554_v13, %s3780_s23  ;;  %v424_v12 = vmul.f32 %v410_v36, %v3890_v53 }
  0xab   : > { %v3912_v15 = vpop.permute.xlu0 %539  ;;  %v538_v17 = vpop.permute.xlu1 %537 }
  0xac   : > { %v542_v50 = vsel %vm177_vm1, %v536_v11, %v538_v17  ;;  %v553_v59 = vmul.f32 %v3912_v15, %v379_v41  ;;  %v543_v60 = vsel %vm177_vm1, %v538_v17, %v3912_v15  ;;  %v563_v4 = vmul.f32 %v3912_v15, %v381_v55 }
  0xad   : > { %v551_v54 = vmul.f32 %v542_v50, %v323_v37  ;;  %v552_v61 = vmul.f32 %v543_v60, %v324_v43  ;;  %v562_v0 = vmul.f32 %v543_v60, %v332_v46  ;;  %v557_v17 = vmul.f32 %v543_v60, %v3895_v56 }
  0xae   : > { %599 = vrot.lane.b32.xlu1 %v559_v14, %s3780_s23  ;;  %v426_v14 = vmul.f32 %v3907_v7, %v3898_v57  ;;  %v556_v20 = vmul.f32 %v542_v50, %v3890_v53 }
  0xaf   : > { %v665_v16 = vpop.permute.xlu0 %664  ;;  %v667_v30 = vpop.permute.xlu1 %666 }
  0xb0   : > { %v685_v18 = vmul.f32 0.0, %v665_v16  ;;  %v680_v19 = vmul.f32 %v665_v16, %v321_v1  ;;  %v690_v25 = vmul.f32 %v665_v16, %v329_v6  ;;  %v672_v33 = vsel %vm477_vm8, %v665_v16, %v667_v30 }
  0xb1   : > { %v681_v35 = vmul.f32 %v672_v33, %v322_v21  ;;  %v691_v39 = vmul.f32 %v672_v33, %v330_v27  ;;  %v561_v1 = vmul.f32 %v542_v50, %v331_v51  ;;  %v686_v11 = vmul.f32 %v672_v33, %v3934_v47 }
  0xb2   : > { %720 = vrot.lane.b32.xlu1 %v685_v18, %s3779_s18  ;;  %710 = vrot.lane.b32.xlu0 %v680_v19, %s3779_s18  ;;  %v425_v18 = vmul.f32 %v411_v40, %v3895_v56  ;;  %v558_v21 = vmul.f32 %v3912_v15, %v3898_v57  ;;  %v1041_v15 = vrot.slane %v3879_v42, %v3832_v23 }
  0xb3   : > { %v669_v63 = vpop.permute.xlu0 %668  ;;  %v671_v3 = vpop.permute.xlu1 %670 }
  0xb4   : > { %v673_v2 = vsel %vm477_vm8, %v667_v30, %v669_v63  ;;  %v674_v6 = vsel %vm477_vm8, %v669_v63, %v671_v3  ;;  %v684_v9 = vmul.f32 %v671_v3, %v379_v41  ;;  %v694_v16 = vmul.f32 %v671_v3, %v381_v55 }
  0xb5   : > { %v682_v5 = vmul.f32 %v673_v2, %v323_v37  ;;  %v683_v8 = vmul.f32 %v674_v6, %v324_v43  ;;  %v693_v10 = vmul.f32 %v674_v6, %v332_v46  ;;  %v692_v13 = vmul.f32 %v673_v2, %v331_v51 }
  0xb6   : > { %449 = vrot.lane.b32.xlu1 %v418_v22, %s3781_s26  ;;  %730 = vrot.lane.b32.xlu0 %v690_v25, %s3779_s18  ;;  %v687_v19 = vmul.f32 %v673_v2, %v3890_v53  ;;  %v689_v7 = vmul.f32 %v671_v3, %v3898_v57  ;;  %v1045_v25 = vrot.slane %v3879_v42, %v3848_v29 }
  0xb7   : > { %v3981_v22 = vpop.permute.xlu1 %1050  ;;  %v688_v27 = vmul.f32 %v674_v6, %v3895_v56 }
  0xb8   : > { %v3992_v30 = vmul.f32 %v3981_v22, %v3987_v26 }
  0xba   : > { %469 = vrot.lane.b32.xlu1 %v428_v31, %s3781_s26  ;;  %581 = vrot.lane.b32.xlu0 %v550_v32, %s3780_s23  ;;  %v6573_v31 = vrot.slane %v3992_v30, 3  ;;  %v1049_v32 = vrot.slane %v3879_v42, %v3846_v28 }
  0xbe   : > { %601 = vrot.lane.b32.xlu0 %v560_v34, %s3780_s23  ;;  %712 = vrot.lane.b32.xlu1 %v681_v35, %s3779_s18 }
  0xc2   : > { %451 = vrot.lane.b32.xlu0 %v419_v38, %s3781_s26  ;;  %732 = vrot.lane.b32.xlu1 %v691_v39, %s3779_s18 }
  0xc6   : > { %455 = vrot.lane.b32.xlu0 %v421_v44, %s3781_s26  ;;  %453 = vrot.lane.b32.xlu1 %v420_v45, %s3781_s26 }
  0xca   : > { %459 = vrot.lane.b32.xlu0 %v423_v48, %s3781_s26  ;;  %473 = vrot.lane.b32.xlu1 %v430_v49, %s3781_s26 }
  0xce   : > { %471 = vrot.lane.b32.xlu0 %v429_v52, %s3781_s26  ;;  %583 = vrot.lane.b32.xlu1 %v551_v54, %s3780_s23 }
  0xd2   : > { %475 = vrot.lane.b32.xlu0 %v431_v58, %s3781_s26  ;;  %587 = vrot.lane.b32.xlu1 %v553_v59, %s3780_s23 }
  0xd6   : > { %585 = vrot.lane.b32.xlu0 %v552_v61, %s3780_s23  ;;  %591 = vrot.lane.b32.xlu1 %v555_v62, %s3780_s23 }
  0xda   : > { %605 = vrot.lane.b32.xlu0 %v562_v0, %s3780_s23  ;;  %603 = vrot.lane.b32.xlu1 %v561_v1, %s3780_s23 }
  0xde   : > { %607 = vrot.lane.b32.xlu1 %v563_v4, %s3780_s23  ;;  %714 = vrot.lane.b32.xlu0 %v682_v5, %s3779_s18 }
  0xe2   : > { %716 = vrot.lane.b32.xlu1 %v683_v8, %s3779_s18  ;;  %718 = vrot.lane.b32.xlu0 %v684_v9, %s3779_s18 }
  0xe6   : > { %736 = vrot.lane.b32.xlu1 %v693_v10, %s3779_s18  ;;  %722 = vrot.lane.b32.xlu0 %v686_v11, %s3779_s18 }
  0xea   : > { %461 = vrot.lane.b32.xlu1 %v424_v12, %s3781_s26  ;;  %734 = vrot.lane.b32.xlu0 %v692_v13, %s3779_s18 }
  0xee   : > { %465 = vrot.lane.b32.xlu1 %v426_v14, %s3781_s26  ;;  %738 = vrot.lane.b32.xlu0 %v694_v16, %s3779_s18 }
  0xf2   : > { %595 = vrot.lane.b32.xlu1 %v557_v17, %s3780_s23  ;;  %463 = vrot.lane.b32.xlu0 %v425_v18, %s3781_s26 }
  0xf6   : > { %724 = vrot.lane.b32.xlu1 %v687_v19, %s3779_s18  ;;  %593 = vrot.lane.b32.xlu0 %v556_v20, %s3780_s23 }
  0xfa   : > { %728 = vrot.lane.b32.xlu1 %v689_v7, %s3779_s18  ;;  %597 = vrot.lane.b32.xlu0 %v558_v21, %s3780_s23 }
  0xfe   : > { %1054 = vrot.lane.b32.xlu1 %v1045_v25, %s3779_s18  ;;  %726 = vrot.lane.b32.xlu0 %v688_v27, %s3779_s18  ;;  %v4099_v27 = vld [vmem:[#allocation2 + $0x18] sm:$0xff] }
 0x102   : > { %1101 = vrot.lane.b32.xlu1 %v6573_v31, %s3781_s26  ;;  %1052 = vrot.lane.b32.xlu0 %v1041_v15, %s3779_s18  ;;  %v4101_v15 = vld [vmem:[#allocation2 + $0x10] sm:$0xff] }
 0x106   : > { %1056 = vrot.lane.b32.xlu0 %v1049_v32, %s3779_s18 }
 0x114   : > { %v4006_v33 = vpop.permute.xlu0 %447  ;;  %v4008_v34 = vpop.permute.xlu1 %457 }
 0x115   : > { %6751 = vst [vmem:[#allocation7_spill] sm:$0xff] %v4008_v34 }
 0x118   : > { %v4010_v35 = vpop.permute.xlu0 %467 }
 0x11c   : > { %v4012_v36 = vpop.permute.xlu1 %579  ;;  %v4014_v37 = vpop.permute.xlu0 %589 }
 0x11d   : > { %6752 = vst [vmem:[#allocation8_spill] sm:$0xff] %v4014_v37 }
 0x120   : > { %v4016_v38 = vpop.permute.xlu1 %599 }
 0x124   : > { %v4018_v39 = vpop.permute.xlu1 %720  ;;  %v4020_v40 = vpop.permute.xlu0 %710 }
 0x125   : > { %6753 = vst [vmem:[#allocation9_spill] sm:$0xff] %v4018_v39 }
 0x128   : > { %v4022_v41 = vpop.permute.xlu1 %449  ;;  %v4024_v42 = vpop.permute.xlu0 %730 }
 0x129   : > { %6754 = vst [vmem:[#allocation10_spill] sm:$0xff] %v4022_v41 }
 0x12c   : > { %v4026_v43 = vpop.permute.xlu1 %469  ;;  %v4028_v44 = vpop.permute.xlu0 %581 }
 0x12d   : > { %6755 = vst [vmem:[#allocation11_spill] sm:$0xff] %v4028_v44 }
 0x130   : > { %v4030_v45 = vpop.permute.xlu1 %712  ;;  %v4032_v46 = vpop.permute.xlu0 %601 }
 0x131   : > { %6756 = vst [vmem:[#allocation12_spill] sm:$0xff] %v4030_v45 }
 0x134   : > { %v4034_v48 = vpop.permute.xlu1 %732  ;;  %v4036_v49 = vpop.permute.xlu0 %451 }
 0x135   : > { %6757 = vst [vmem:[#allocation13_spill] sm:$0xff] %v4036_v49 }
 0x138   : > { %v4038_v50 = vpop.permute.xlu1 %453  ;;  %v4040_v51 = vpop.permute.xlu0 %455 }
 0x139   : > { %6758 = vst [vmem:[#allocation14_spill] sm:$0xff] %v4038_v50  ;;  %6759 = vst [vmem:[#allocation15_spill] sm:$0xff] %v4040_v51  ;;  %v4202_v50 = vld [vmem:[#allocation2 + $0x78] sm:$0xff] }
 0x13c   : > { %v4042_v52 = vpop.permute.xlu1 %473  ;;  %v4044_v54 = vpop.permute.xlu0 %459 }
 0x13d   : > { %6760 = vst [vmem:[#allocation16_spill] sm:$0xff] %v4044_v54 }
 0x140   : > { %v4046_v55 = vpop.permute.xlu1 %583  ;;  %v4048_v58 = vpop.permute.xlu0 %471 }
 0x141   : > { %6761 = vst [vmem:[#allocation17_spill] sm:$0xff] %v4046_v55 }
 0x144   : > { %v4050_v59 = vpop.permute.xlu1 %587  ;;  %v4052_v60 = vpop.permute.xlu0 %475 }
 0x145   : > { %6762 = vst [vmem:[#allocation18_spill] sm:$0xff] %v4050_v59 }
 0x148   : > { %v4054_v61 = vpop.permute.xlu1 %591  ;;  %v4056_v62 = vpop.permute.xlu0 %585 }
 0x149   : > { %6763 = vst [vmem:[#allocation19_spill] sm:$0xff] %v4054_v61  ;;  %6764 = vst [vmem:[#allocation20_spill] sm:$0xff] %v4056_v62 }
 0x14c   : > { %v4058_v63 = vpop.permute.xlu1 %603  ;;  %v4060_v0 = vpop.permute.xlu0 %605 }
 0x150   : > { %v4062_v1 = vpop.permute.xlu1 %607  ;;  %v4064_v2 = vpop.permute.xlu0 %714 }
 0x151   : > { %6765 = vst [vmem:[#allocation21_spill] sm:$0xff] %v4062_v1  ;;  %6766 = vst [vmem:[#allocation22_spill] sm:$0xff] %v4064_v2 }
 0x154   : > { %v4066_v3 = vpop.permute.xlu1 %716  ;;  %v4068_v4 = vpop.permute.xlu0 %718 }
 0x155   : > { %6767 = vst [vmem:[#allocation23_spill] sm:$0xff] %v4066_v3  ;;  %6768 = vst [vmem:[#allocation24_spill] sm:$0xff] %v4068_v4  ;;  %v4121_v4 = vld [vmem:[#allocation2 + $0x60] sm:$0xff] }
 0x158   : > { %v4070_v5 = vpop.permute.xlu1 %736  ;;  %v4072_v6 = vpop.permute.xlu0 %722 }
 0x159   : > { %6769 = vst [vmem:[#allocation25_spill] sm:$0xff] %v4070_v5  ;;  %6770 = vst [vmem:[#allocation26_spill] sm:$0xff] %v4072_v6 }
 0x15c   : > { %v4074_v8 = vpop.permute.xlu1 %461  ;;  %v4076_v9 = vpop.permute.xlu0 %734 }
 0x15d   : > { %6771 = vst [vmem:[#allocation27_spill] sm:$0xff] %v4074_v8  ;;  %6772 = vst [vmem:[#allocation28_spill] sm:$0xff] %v4076_v9 }
 0x160   : > { %v4078_v10 = vpop.permute.xlu1 %465  ;;  %v4080_v11 = vpop.permute.xlu0 %738 }
 0x161   : > { %6773 = vst [vmem:[#allocation29_spill] sm:$0xff] %v4078_v10  ;;  %6774 = vst [vmem:[#allocation30_spill] sm:$0xff] %v4080_v11 }
 0x164   : > { %v4082_v12 = vpop.permute.xlu1 %595  ;;  %v4084_v13 = vpop.permute.xlu0 %463 }
 0x165   : > { %6775 = vst [vmem:[#allocation31_spill] sm:$0xff] %v4082_v12  ;;  %6776 = vst [vmem:[#allocation32_spill] sm:$0xff] %v4084_v13  ;;  %v4111_v13 = vld [vmem:[#allocation2 + $0x20] sm:$0xff] }
 0x168   : > { %v4086_v14 = vpop.permute.xlu1 %724  ;;  %v4088_v16 = vpop.permute.xlu0 %593 }
 0x169   : > { %6777 = vst [vmem:[#allocation33_spill] sm:$0xff] %v4086_v14  ;;  %6778 = vst [vmem:[#allocation34_spill] sm:$0xff] %v4088_v16  ;;  %v4107_v14 = vld [vmem:[#allocation2 + $0x28] sm:$0xff] }
 0x16c   : > { %v4090_v17 = vpop.permute.xlu0 %597  ;;  %v4092_v18 = vpop.permute.xlu1 %728 }
 0x16d   : > { %6779 = vst [vmem:[#allocation35_spill] sm:$0xff] %v4090_v17  ;;  %6780 = vst [vmem:[#allocation36_spill] sm:$0xff] %v4092_v18  ;;  %v1071_v18 = vmul.f32 %v3981_v22, %v3934_v47 }
 0x170   : > { %v4094_v19 = vpop.permute.xlu0 %726  ;;  %v1055_v20 = vpop.permute.xlu1 %1054 }
 0x171   : > { %6781 = vst [vmem:[#allocation37_spill] sm:$0xff] %v4094_v19 }
 0x174   : > { %v1053_v7 = vpop.permute.xlu0 %1052 }
 0x175   : > { %v1058_v21 = vsel %vm254_vm3, %v3981_v22, %v1053_v7  ;;  %v1059_v25 = vsel %vm254_vm3, %v1053_v7, %v1055_v20 }
 0x176   : > { %v1068_v32 = vmul.f32 %v1059_v25, %v4099_v27  ;;  %v1067_v31 = vmul.f32 %v1058_v21, %v4101_v15  ;;  %v1072_v10 = vmul.f32 %v1058_v21, %v3890_v53 }
 0x178   : > { %v1057_v17 = vpop.permute.xlu0 %1056  ;;  %v1088_v19 = vrot.slane %v1068_v32, 3  ;;  %v1087_v12 = vrot.slane %v1067_v31, 3  ;;  %v1091_v32 = vrot.slane %v1071_v18, 3  ;;  %v1073_v31 = vmul.f32 %v1059_v25, %v3895_v56 }
 0x179   : > { %v1070_v7 = vmul.f32 %v1057_v17, %v4107_v14  ;;  %v1060_v16 = vsel %vm254_vm3, %v1055_v20, %v1057_v17  ;;  %v1093_v6 = vrot.slane %v1072_v10, 3  ;;  %v6782_v20 = vrot.slane %v3992_v30, 3 }
 0x17a   : > { %1105 = vrot.lane.b32.xlu1 %v1088_v19, %s3781_s26  ;;  %1103 = vrot.lane.b32.xlu0 %v1087_v12, %s3781_s26  ;;  %v1069_v8 = vmul.f32 %v1060_v16, %v4111_v13  ;;  %v1074_v21 = vmul.f32 %v1060_v16, %v3898_v57  ;;  %v1095_v2 = vrot.slane %v1073_v31, 3 }
 0x17b   : > { %v1090_v22 = vrot.slane %v1070_v7, 3  ;;  %v1092_v3 = vsel %vm217_vm0, %v6782_v20, %v1091_v32  ;;  %v1075_v7 = vmul.f32 %v1057_v17, %v4121_v4  ;;  %v4152_v17 = vpop.permute.xlu1 %1101 }
 0x17c   : > { %v1089_v39 = vrot.slane %v1069_v8, 3  ;;  %v1094_v8 = vsel %vm217_vm0, %v1087_v12, %v1093_v6  ;;  %v1097_v18 = vrot.slane %v1074_v21, 3  ;;  %v1096_v10 = vsel %vm217_vm0, %v1088_v19, %v1095_v2 }
 0x17d   : > { %v1099_v25 = vrot.slane %v1075_v7, 3 }
 0x17e   : > { %1109 = vrot.lane.b32.xlu1 %v1090_v22, %s3781_s26  ;;  %1107 = vrot.lane.b32.xlu0 %v1089_v39, %s3781_s26  ;;  %v1098_v16 = vsel %vm217_vm0, %v1089_v39, %v1097_v18 }
 0x17f   : > { %v1100_v30 = vsel %vm217_vm0, %v1090_v22, %v1099_v25 }
 0x182   : > { %1113 = vrot.lane.b32.xlu1 %v1094_v8, %s3781_s26  ;;  %1111 = vrot.lane.b32.xlu0 %v1092_v3, %s3781_s26  ;;  %v3695_v3 = vld [vmem:[%s6570_s1 + $0x20] ss:$8 sm:$0xf] }
 0x183   : > { %v1173_v39 = vrot.slane %v3695_v3, %v3834_v24  ;;  %v1177_v12 = vrot.slane %v3695_v3, %v3832_v23 }
 0x186   : > { %1115 = vrot.lane.b32.xlu0 %v1096_v10, %s3781_s26  ;;  %1117 = vrot.lane.b32.xlu1 %v1098_v16, %s3781_s26 }
 0x18a   : > { %1119 = vrot.lane.b32.xlu0 %v1100_v30, %s3781_s26  ;;  %1121 = vrot.lane.b32.xlu1 %v1091_v32, %s3781_s26 }
 0x18e   : > { %1123 = vrot.lane.b32.xlu0 %v1093_v6, %s3781_s26  ;;  %1125 = vrot.lane.b32.xlu1 %v1095_v2, %s3781_s26  ;;  %v1181_v6 = vrot.slane %v3695_v3, %v3848_v29  ;;  %v1185_v2 = vrot.slane %v3695_v3, %v3846_v28 }
 0x192   : > { %1127 = vrot.lane.b32.xlu0 %v1097_v18, %s3781_s26  ;;  %1129 = vrot.lane.b32.xlu1 %v1099_v25, %s3781_s26 }
 0x196   : > { %1186 = vrot.lane.b32.xlu0 %v1173_v39, %s3779_s18  ;;  %1188 = vrot.lane.b32.xlu1 %v1177_v12, %s3779_s18 }
 0x19a   : > { %1190 = vrot.lane.b32.xlu0 %v1181_v6, %s3779_s18  ;;  %1192 = vrot.lane.b32.xlu1 %v1185_v2, %s3779_s18 }
 0x1ec   : > { %v4154_v19 = vpop.permute.xlu1 %1105  ;;  %v4156_v22 = vpop.permute.xlu0 %1103 }
 0x1ed   : > { %6783 = vst [vmem:[#allocation38_spill] sm:$0xff] %v4154_v19  ;;  %6784 = vst [vmem:[#allocation39_spill] sm:$0xff] %v4156_v22 }
 0x1f0   : > { %v4158_v32 = vpop.permute.xlu1 %1109  ;;  %v4160_v31 = vpop.permute.xlu0 %1107 }
 0x1f1   : > { %6785 = vst [vmem:[#allocation40_spill] sm:$0xff] %v4158_v32  ;;  %6786 = vst [vmem:[#allocation41_spill] sm:$0xff] %v4160_v31 }
 0x1f4   : > { %v4162_v21 = vpop.permute.xlu1 %1113  ;;  %v4164_v20 = vpop.permute.xlu0 %1111 }
 0x1f5   : > { %6787 = vst [vmem:[#allocation42_spill] sm:$0xff] %v4162_v21  ;;  %6788 = vst [vmem:[#allocation43_spill] sm:$0xff] %v4164_v20 }
 0x1f8   : > { %v4166_v7 = vpop.permute.xlu1 %1117  ;;  %v4168_v8 = vpop.permute.xlu0 %1115 }
 0x1f9   : > { %6789 = vst [vmem:[#allocation44_spill] sm:$0xff] %v4166_v7  ;;  %6790 = vst [vmem:[#allocation45_spill] sm:$0xff] %v4168_v8 }
 0x1fc   : > { %v4170_v18 = vpop.permute.xlu1 %1121  ;;  %v4172_v10 = vpop.permute.xlu0 %1119 }
 0x1fd   : > { %6791 = vst [vmem:[#allocation46_spill] sm:$0xff] %v4170_v18  ;;  %6792 = vst [vmem:[#allocation47_spill] sm:$0xff] %v4172_v10 }
 0x200   : > { %v4174_v16 = vpop.permute.xlu1 %1125  ;;  %v4176_v25 = vpop.permute.xlu0 %1123 }
 0x201   : > { %6793 = vst [vmem:[#allocation48_spill] sm:$0xff] %v4174_v16  ;;  %6794 = vst [vmem:[#allocation49_spill] sm:$0xff] %v4176_v25 }
 0x204   : > { %v4178_v30 = vpop.permute.xlu1 %1129  ;;  %v4180_v3 = vpop.permute.xlu0 %1127 }
 0x205   : > { %6795 = vst [vmem:[#allocation50_spill] sm:$0xff] %v4178_v30  ;;  %6796 = vst [vmem:[#allocation51_spill] sm:$0xff] %v4180_v3  ;;  %v4214_v3 = vld [vmem:[#allocation2 + $0x90] sm:$0xff] }
 0x208   : > { %v1189_v39 = vpop.permute.xlu1 %1188  ;;  %v1187_v12 = vpop.permute.xlu0 %1186 }
 0x209   : > { %v1202_v6 = vmul.f32 %v1187_v12, %v3987_v26  ;;  %v1194_v2 = vsel %vm254_vm3, %v1187_v12, %v1189_v39  ;;  %v1207_v19 = vmul.f32 %v1187_v12, %v3934_v47  ;;  %v1212_v49 = vmul.f32 %v1187_v12, %v4202_v50 }
 0x20a   : > { %v1203_v7 = vmul.f32 %v1194_v2, %v4101_v15 }
 0x20b   : > { %v1233_v8 = vrot.slane %v1202_v6, 4  ;;  %v1238_v55 = vrot.slane %v1207_v19, 4  ;;  %v4204_v19 = vld [vmem:[#allocation2 + $0x80] sm:$0xff]  ;;  %v1248_v18 = vrot.slane %v1212_v49, 4 }
 0x20c   : > { %v1193_v20 = vpop.permute.xlu1 %1192  ;;  %v1191_v21 = vpop.permute.xlu0 %1190  ;;  %v1234_v10 = vrot.slane %v1203_v7, 4  ;;  %v1208_v7 = vmul.f32 %v1194_v2, %v3890_v53 }
 0x20d   : > { %v1195_v32 = vsel %vm254_vm3, %v1189_v39, %v1191_v21  ;;  %v1196_v31 = vsel %vm254_vm3, %v1191_v21, %v1193_v20  ;;  %1258 = vrot.lane.b32.xlu0 %v1233_v8, %s3781_s26  ;;  %v1206_v6 = vmul.f32 %v1193_v20, %v4107_v14 }
 0x20e   : > { %1260 = vrot.lane.b32.xlu1 %v1234_v10, %s3781_s26  ;;  %v1205_v59 = vmul.f32 %v1196_v31, %v4111_v13  ;;  %v1204_v62 = vmul.f32 %v1195_v32, %v4099_v27  ;;  %v1209_v39 = vmul.f32 %v1195_v32, %v3895_v56  ;;  %v1240_v34 = vrot.slane %v1208_v7, 4 }
 0x20f   : > { %v1237_v21 = vrot.slane %v1206_v6, 4  ;;  %v1210_v54 = vmul.f32 %v1196_v31, %v3898_v57  ;;  %v1213_v6 = vmul.f32 %v1194_v2, %v4204_v19  ;;  %v1215_v12 = vmul.f32 %v1196_v31, %v4214_v3 }
 0x210   : > { %v1236_v37 = vrot.slane %v1205_v59, 4  ;;  %v1235_v61 = vrot.slane %v1204_v62, 4  ;;  %v1242_v51 = vrot.slane %v1209_v39, 4  ;;  %v1239_v59 = vsel %vm1232_vm9, %v1233_v8, %v1238_v55 }
 0x211   : > { %v1211_v62 = vmul.f32 %v1193_v20, %v4121_v4  ;;  %v1244_v7 = vrot.slane %v1210_v54, 4  ;;  %v1241_v30 = vsel %vm1232_vm9, %v1234_v10, %v1240_v34  ;;  %v1250_v2 = vrot.slane %v1213_v6, 4 }
 0x212   : > { %1264 = vrot.lane.b32.xlu1 %v1236_v37, %s3781_s26  ;;  %1262 = vrot.lane.b32.xlu0 %v1235_v61, %s3781_s26  ;;  %v1243_v39 = vsel %vm1232_vm9, %v1235_v61, %v1242_v51 }
 0x213   : > { %v1246_v8 = vrot.slane %v1211_v62, 4  ;;  %v1245_v54 = vsel %vm1232_vm9, %v1236_v37, %v1244_v7  ;;  %v1254_v62 = vrot.slane %v1215_v12, 4  ;;  %v3696_v37 = vld [vmem:[%s6570_s1 + $0x21] ss:$8 sm:$0xf] }
 0x215   : > { %v1247_v10 = vsel %vm1232_vm9, %v1237_v21, %v1246_v8 }
 0x216   : > { %1268 = vrot.lane.b32.xlu1 %v1239_v59, %s3781_s26  ;;  %1266 = vrot.lane.b32.xlu0 %v1237_v21, %s3781_s26  ;;  %v4212_v59 = vld [vmem:[#allocation2 + $0x88] sm:$0xff] }
 0x217   : > { %v1214_v16 = vmul.f32 %v1195_v32, %v4212_v59  ;;  %v1251_v32 = vsel %vm1232_vm9, %v1240_v34, %v1250_v2  ;;  %v1330_v34 = vrot.slane %v3696_v37, %v3834_v24 }
 0x219   : > { %v1252_v61 = vrot.slane %v1214_v16, 4  ;;  %v1255_v16 = vsel %vm1232_vm9, %v1244_v7, %v1254_v62 }
 0x21a   : > { %1270 = vrot.lane.b32.xlu0 %v1241_v30, %s3781_s26  ;;  %1272 = vrot.lane.b32.xlu1 %v1243_v39, %s3781_s26  ;;  %v4222_v30 = vld [vmem:[#allocation2 + $0x98] sm:$0xff]  ;;  %v1249_v39 = vsel %vm1232_vm9, %v1238_v55, %v1248_v18  ;;  %v1338_v18 = vrot.slane %v3696_v37, %v3848_v29 }
 0x21b   : > { %v1216_v49 = vmul.f32 %v1193_v20, %v4222_v30  ;;  %v1253_v31 = vsel %vm1232_vm9, %v1242_v51, %v1252_v61  ;;  %v1334_v20 = vrot.slane %v3696_v37, %v3832_v23  ;;  %v1342_v51 = vrot.slane %v3696_v37, %v3846_v28 }
 0x21d   : > { %v1256_v21 = vrot.slane %v1216_v49, 4 }
 0x21e   : > { %1274 = vrot.lane.b32.xlu0 %v1245_v54, %s3781_s26  ;;  %1276 = vrot.lane.b32.xlu1 %v1247_v10, %s3781_s26 }
 0x21f   : > { %v1257_v55 = vsel %vm1232_vm9, %v1246_v8, %v1256_v21 }
 0x222   : > { %1278 = vrot.lane.b32.xlu0 %v1249_v39, %s3781_s26  ;;  %1280 = vrot.lane.b32.xlu1 %v1251_v32, %s3781_s26 }
 0x226   : > { %1282 = vrot.lane.b32.xlu0 %v1253_v31, %s3781_s26  ;;  %1284 = vrot.lane.b32.xlu1 %v1255_v16, %s3781_s26 }
 0x22a   : > { %1286 = vrot.lane.b32.xlu0 %v1257_v55, %s3781_s26  ;;  %1343 = vrot.lane.b32.xlu1 %v1330_v34, %s3779_s18 }
 0x22e   : > { %1345 = vrot.lane.b32.xlu0 %v1334_v20, %s3779_s18  ;;  %1347 = vrot.lane.b32.xlu1 %v1338_v18, %s3779_s18 }
 0x232   : > { %1349 = vrot.lane.b32.xlu0 %v1342_v51, %s3779_s18 }
 0x27f   : > { %v4246_v6 = vpop.permute.xlu0 %1258 }
 0x280   : > { %v4248_v7 = vpop.permute.xlu1 %1260 }
 0x281   : > { %6797 = vst [vmem:[#allocation52_spill] sm:$0xff] %v4248_v7 }
 0x284   : > { %v4250_v8 = vpop.permute.xlu1 %1264  ;;  %v4252_v12 = vpop.permute.xlu0 %1262 }
 0x285   : > { %6798 = vst [vmem:[#allocation53_spill] sm:$0xff] %v4250_v8  ;;  %6799 = vst [vmem:[#allocation54_spill] sm:$0xff] %v4252_v12 }
 0x288   : > { %v4254_v54 = vpop.permute.xlu1 %1268  ;;  %v4256_v10 = vpop.permute.xlu0 %1266 }
 0x289   : > { %6800 = vst [vmem:[#allocation55_spill] sm:$0xff] %v4254_v54  ;;  %6801 = vst [vmem:[#allocation56_spill] sm:$0xff] %v4256_v10 }
 0x28c   : > { %v4258_v2 = vpop.permute.xlu1 %1272  ;;  %v4260_v61 = vpop.permute.xlu0 %1270 }
 0x28d   : > { %6802 = vst [vmem:[#allocation57_spill] sm:$0xff] %v4258_v2  ;;  %6803 = vst [vmem:[#allocation58_spill] sm:$0xff] %v4260_v61 }
 0x290   : > { %v4262_v62 = vpop.permute.xlu1 %1276  ;;  %v4264_v39 = vpop.permute.xlu0 %1274 }
 0x291   : > { %6804 = vst [vmem:[#allocation59_spill] sm:$0xff] %v4262_v62  ;;  %6805 = vst [vmem:[#allocation60_spill] sm:$0xff] %v4264_v39 }
 0x294   : > { %v4266_v32 = vpop.permute.xlu1 %1280  ;;  %v4268_v49 = vpop.permute.xlu0 %1278 }
 0x295   : > { %6806 = vst [vmem:[#allocation61_spill] sm:$0xff] %v4266_v32  ;;  %6807 = vst [vmem:[#allocation62_spill] sm:$0xff] %v4268_v49 }
 0x298   : > { %v4270_v37 = vpop.permute.xlu1 %1284  ;;  %v4272_v31 = vpop.permute.xlu0 %1282 }
 0x299   : > { %6808 = vst [vmem:[#allocation63_spill] sm:$0xff] %v4270_v37  ;;  %6809 = vst [vmem:[#allocation64_spill] sm:$0xff] %v4272_v31 }
 0x29c   : > { %v1344_v16 = vpop.permute.xlu1 %1343  ;;  %v4274_v21 = vpop.permute.xlu0 %1286 }
 0x29d   : > { %6810 = vst [vmem:[#allocation65_spill] sm:$0xff] %v4274_v21  ;;  %v1359_v34 = vmul.f32 %v1344_v16, %v3987_v26  ;;  %v1364_v8 = vmul.f32 %v1344_v16, %v3934_v47  ;;  %v1369_v25 = vmul.f32 %v1344_v16, %v4202_v50 }
 0x29f   : > { %v1390_v55 = vrot.slane %v1359_v34, 5  ;;  %v1395_v49 = vrot.slane %v1364_v8, 5 }
 0x2a0   : > { %v1348_v20 = vpop.permute.xlu1 %1347  ;;  %v1346_v18 = vpop.permute.xlu0 %1345 }
 0x2a1   : > { %v1351_v51 = vsel %vm254_vm3, %v1344_v16, %v1346_v18  ;;  %v1352_v62 = vsel %vm254_vm3, %v1346_v18, %v1348_v20  ;;  %1415 = vrot.lane.b32.xlu1 %v1390_v55, %s3781_s26 }
 0x2a2   : > { %v1360_v39 = vmul.f32 %v1351_v51, %v4101_v15  ;;  %v1361_v2 = vmul.f32 %v1352_v62, %v4099_v27  ;;  %v1365_v12 = vmul.f32 %v1351_v51, %v3890_v53  ;;  %v1371_v9 = vmul.f32 %v1352_v62, %v4212_v59 }
 0x2a4   : > { %v1391_v54 = vrot.slane %v1360_v39, 5  ;;  %v1392_v61 = vrot.slane %v1361_v2, 5  ;;  %v1350_v10 = vpop.permute.xlu0 %1349  ;;  %v1366_v2 = vmul.f32 %v1352_v62, %v3895_v56  ;;  %v1397_v39 = vrot.slane %v1365_v12, 5 }
 0x2a5   : > { %v1353_v34 = vsel %vm254_vm3, %v1348_v20, %v1350_v10  ;;  %v1363_v21 = vmul.f32 %v1350_v10, %v4107_v14  ;;  %v1396_v20 = vsel %vm1389_vm10, %v1390_v55, %v1395_v49  ;;  %v1368_v8 = vmul.f32 %v1350_v10, %v4121_v4 }
 0x2a6   : > { %1419 = vrot.lane.b32.xlu1 %v1392_v61, %s3781_s26  ;;  %1417 = vrot.lane.b32.xlu0 %v1391_v54, %s3781_s26  ;;  %v1362_v18 = vmul.f32 %v1353_v34, %v4111_v13  ;;  %v1367_v32 = vmul.f32 %v1353_v34, %v3898_v57  ;;  %v1399_v11 = vrot.slane %v1366_v2, 5  ;;  %v1398_v5 = vsel %vm1389_vm10, %v1391_v54, %v1397_v39 }
 0x2a7   : > { %v1394_v37 = vrot.slane %v1363_v21, 5  ;;  %v1370_v12 = vmul.f32 %v1351_v51, %v4204_v19  ;;  %v1403_v16 = vrot.slane %v1368_v8, 5  ;;  %v1372_v51 = vmul.f32 %v1353_v34, %v4214_v3 }
 0x2a8   : > { %v1393_v31 = vrot.slane %v1362_v18, 5  ;;  %v1401_v21 = vrot.slane %v1367_v32, 5  ;;  %v1405_v18 = vrot.slane %v1369_v25, 5  ;;  %v1400_v1 = vsel %vm1389_vm10, %v1392_v61, %v1399_v11 }
 0x2a9   : > { %v1407_v54 = vrot.slane %v1370_v12, 5  ;;  %v1404_v2 = vsel %vm1389_vm10, %v1394_v37, %v1403_v16  ;;  %v1373_v25 = vmul.f32 %v1350_v10, %v4222_v30  ;;  %v1411_v62 = vrot.slane %v1372_v51, 5 }
 0x2aa   : > { %1423 = vrot.lane.b32.xlu1 %v1394_v37, %s3781_s26  ;;  %1421 = vrot.lane.b32.xlu0 %v1393_v31, %s3781_s26  ;;  %v1402_v55 = vsel %vm1389_vm10, %v1393_v31, %v1401_v21  ;;  %v1406_v32 = vsel %vm1389_vm10, %v1395_v49, %v1405_v18 }
 0x2ab   : > { %v1408_v61 = vsel %vm1389_vm10, %v1397_v39, %v1407_v54  ;;  %v1413_v31 = vrot.slane %v1373_v25, 5  ;;  %v1412_v10 = vsel %vm1389_vm10, %v1401_v21, %v1411_v62 }
 0x2ad   : > { %v1414_v49 = vsel %vm1389_vm10, %v1403_v16, %v1413_v31 }
 0x2ae   : > { %1427 = vrot.lane.b32.xlu1 %v1398_v5, %s3781_s26  ;;  %1425 = vrot.lane.b32.xlu0 %v1396_v20, %s3781_s26  ;;  %v1409_v5 = vrot.slane %v1371_v9, 5  ;;  %v3697_v9 = vld [vmem:[%s6570_s1 + $0x22] ss:$8 sm:$0xf] }
 0x2af   : > { %v1491_v37 = vrot.slane %v3697_v9, %v3832_v23  ;;  %v1495_v34 = vrot.slane %v3697_v9, %v3848_v29  ;;  %v1499_v39 = vrot.slane %v3697_v9, %v3846_v28 }
 0x2b2   : > { %1429 = vrot.lane.b32.xlu0 %v1400_v1, %s3781_s26  ;;  %1431 = vrot.lane.b32.xlu1 %v1402_v55, %s3781_s26  ;;  %v1410_v1 = vsel %vm1389_vm10, %v1399_v11, %v1409_v5  ;;  %v1487_v11 = vrot.slane %v3697_v9, %v3834_v24 }
 0x2b6   : > { %1433 = vrot.lane.b32.xlu0 %v1404_v2, %s3781_s26  ;;  %1435 = vrot.lane.b32.xlu1 %v1406_v32, %s3781_s26 }
 0x2ba   : > { %1437 = vrot.lane.b32.xlu0 %v1408_v61, %s3781_s26  ;;  %1439 = vrot.lane.b32.xlu1 %v1410_v1, %s3781_s26 }
 0x2be   : > { %1441 = vrot.lane.b32.xlu0 %v1412_v10, %s3781_s26  ;;  %1443 = vrot.lane.b32.xlu1 %v1414_v49, %s3781_s26 }
 0x2c2   : > { %1500 = vrot.lane.b32.xlu0 %v1487_v11, %s3779_s18  ;;  %1502 = vrot.lane.b32.xlu1 %v1491_v37, %s3779_s18 }
 0x2c6   : > { %1504 = vrot.lane.b32.xlu0 %v1495_v34, %s3779_s18  ;;  %1506 = vrot.lane.b32.xlu1 %v1499_v39, %s3779_s18 }
 0x313   : > { %v4330_v20 = vpop.permute.xlu1 %1415 }
 0x314   : > { %6811 = vst [vmem:[#allocation66_spill] sm:$0xff] %v4330_v20 }
 0x318   : > { %v4332_v21 = vpop.permute.xlu1 %1419  ;;  %v4334_v8 = vpop.permute.xlu0 %1417 }
 0x319   : > { %6812 = vst [vmem:[#allocation67_spill] sm:$0xff] %v4332_v21 }
 0x31c   : > { %v4336_v12 = vpop.permute.xlu1 %1423  ;;  %v4338_v18 = vpop.permute.xlu0 %1421 }
 0x31d   : > { %6813 = vst [vmem:[#allocation68_spill] sm:$0xff] %v4336_v12  ;;  %6814 = vst [vmem:[#allocation69_spill] sm:$0xff] %v4338_v18 }
 0x320   : > { %v4340_v55 = vpop.permute.xlu1 %1427  ;;  %v4342_v16 = vpop.permute.xlu0 %1425 }
 0x321   : > { %6815 = vst [vmem:[#allocation70_spill] sm:$0xff] %v4340_v55  ;;  %6816 = vst [vmem:[#allocation71_spill] sm:$0xff] %v4342_v16 }
 0x324   : > { %v4344_v54 = vpop.permute.xlu1 %1431  ;;  %v4346_v32 = vpop.permute.xlu0 %1429 }
 0x325   : > { %6817 = vst [vmem:[#allocation72_spill] sm:$0xff] %v4344_v54  ;;  %6818 = vst [vmem:[#allocation73_spill] sm:$0xff] %v4346_v32 }
 0x328   : > { %v4348_v5 = vpop.permute.xlu1 %1435  ;;  %v4350_v2 = vpop.permute.xlu0 %1433 }
 0x329   : > { %6819 = vst [vmem:[#allocation74_spill] sm:$0xff] %v4348_v5  ;;  %6820 = vst [vmem:[#allocation75_spill] sm:$0xff] %v4350_v2 }
 0x32c   : > { %v4352_v51 = vpop.permute.xlu1 %1439  ;;  %v4354_v25 = vpop.permute.xlu0 %1437 }
 0x32d   : > { %6821 = vst [vmem:[#allocation76_spill] sm:$0xff] %v4352_v51  ;;  %6822 = vst [vmem:[#allocation77_spill] sm:$0xff] %v4354_v25 }
 0x330   : > { %v4356_v61 = vpop.permute.xlu1 %1443  ;;  %v4358_v1 = vpop.permute.xlu0 %1441 }
 0x331   : > { %6823 = vst [vmem:[#allocation78_spill] sm:$0xff] %v4356_v61  ;;  %6824 = vst [vmem:[#allocation79_spill] sm:$0xff] %v4358_v1 }
 0x334   : > { %v1503_v62 = vpop.permute.xlu1 %1502  ;;  %v1501_v31 = vpop.permute.xlu0 %1500 }
 0x335   : > { %v1508_v9 = vsel %vm254_vm3, %v1501_v31, %v1503_v62  ;;  %v1516_v10 = vmul.f32 %v1501_v31, %v3987_v26  ;;  %v1521_v32 = vmul.f32 %v1501_v31, %v3934_v47 }
 0x336   : > { %v1517_v49 = vmul.f32 %v1508_v9, %v4101_v15 }
 0x337   : > { %v1547_v11 = vrot.slane %v1516_v10, 6  ;;  %v1552_v21 = vrot.slane %v1521_v32, 6 }
 0x338   : > { %v1507_v37 = vpop.permute.xlu1 %1506  ;;  %v1505_v34 = vpop.permute.xlu0 %1504  ;;  %v1548_v39 = vrot.slane %v1517_v49, 6  ;;  %v1522_v49 = vmul.f32 %v1508_v9, %v3890_v53  ;;  %v1526_v53 = vmul.f32 %v1501_v31, %v4202_v50 }
 0x339   : > { %v1509_v2 = vsel %vm254_vm3, %v1503_v62, %v1505_v34  ;;  %v1510_v54 = vsel %vm254_vm3, %v1505_v34, %v1507_v37  ;;  %1572 = vrot.lane.b32.xlu0 %v1547_v11, %s3781_s26  ;;  %v1520_v10 = vmul.f32 %v1507_v37, %v4107_v14 }
 0x33a   : > { %v1518_v16 = vmul.f32 %v1509_v2, %v4099_v27  ;;  %v1519_v55 = vmul.f32 %v1510_v54, %v4111_v13  ;;  %1574 = vrot.lane.b32.xlu1 %v1548_v39, %s3781_s26  ;;  %v1523_v62 = vmul.f32 %v1509_v2, %v3895_v56  ;;  %v1554_v61 = vrot.slane %v1522_v49, 6 }
 0x33b   : > { %v1551_v34 = vrot.slane %v1520_v10, 6  ;;  %v1524_v1 = vmul.f32 %v1510_v54, %v3898_v57  ;;  %v1527_v56 = vmul.f32 %v1508_v9, %v4204_v19  ;;  %v1528_v57 = vmul.f32 %v1509_v2, %v4212_v59 }
 0x33c   : > { %v1549_v12 = vrot.slane %v1518_v16, 6  ;;  %v1550_v18 = vrot.slane %v1519_v55, 6  ;;  %v1556_v51 = vrot.slane %v1523_v62, 6  ;;  %v1553_v16 = vsel %vm1546_vm11, %v1547_v11, %v1552_v21 }
 0x33d   : > { %v1525_v55 = vmul.f32 %v1507_v37, %v4121_v4  ;;  %v1558_v32 = vrot.slane %v1524_v1, 6  ;;  %v1555_v5 = vsel %vm1546_vm11, %v1548_v39, %v1554_v61  ;;  %v1562_v11 = vrot.slane %v1526_v53, 6 }
 0x33e   : > { %1578 = vrot.lane.b32.xlu1 %v1550_v18, %s3781_s26  ;;  %1576 = vrot.lane.b32.xlu0 %v1549_v12, %s3781_s26  ;;  %v1557_v10 = vsel %vm1546_vm11, %v1549_v12, %v1556_v51  ;;  %v1529_v62 = vmul.f32 %v1510_v54, %v4214_v3  ;;  %v1564_v9 = vrot.slane %v1527_v56, 6  ;;  %v1566_v12 = vrot.slane %v1528_v57, 6 }
 0x33f   : > { %v1560_v49 = vrot.slane %v1525_v55, 6  ;;  %v1530_v2 = vmul.f32 %v1507_v37, %v4222_v30 }
 0x340   : > { %v1568_v1 = vrot.slane %v1529_v62, 6  ;;  %v1565_v39 = vsel %vm1546_vm11, %v1554_v61, %v1564_v9  ;;  %v1567_v54 = vsel %vm1546_vm11, %v1556_v51, %v1566_v12 }
 0x341   : > { %v1561_v31 = vsel %vm1546_vm11, %v1551_v34, %v1560_v49  ;;  %v1570_v55 = vrot.slane %v1530_v2, 6 }
 0x342   : > { %1582 = vrot.lane.b32.xlu1 %v1553_v16, %s3781_s26  ;;  %1580 = vrot.lane.b32.xlu0 %v1551_v34, %s3781_s26  ;;  %v1559_v16 = vsel %vm1546_vm11, %v1550_v18, %v1558_v32  ;;  %v3698_v18 = vld [vmem:[%s6570_s1 + $0x23] ss:$8 sm:$0xf]  ;;  %v1569_v34 = vsel %vm1546_vm11, %v1558_v32, %v1568_v1 }
 0x343   : > { %v1571_v61 = vsel %vm1546_vm11, %v1560_v49, %v1570_v55  ;;  %v1648_v37 = vrot.slane %v3698_v18, %v3832_v23  ;;  %v1652_v53 = vrot.slane %v3698_v18, %v3848_v29  ;;  %v1656_v51 = vrot.slane %v3698_v18, %v3846_v28 }
 0x346   : > { %1584 = vrot.lane.b32.xlu0 %v1555_v5, %s3781_s26  ;;  %1586 = vrot.lane.b32.xlu1 %v1557_v10, %s3781_s26  ;;  %v1563_v5 = vsel %vm1546_vm11, %v1552_v21, %v1562_v11  ;;  %v1644_v21 = vrot.slane %v3698_v18, %v3834_v24 }
 0x34a   : > { %1588 = vrot.lane.b32.xlu0 %v1559_v16, %s3781_s26  ;;  %1590 = vrot.lane.b32.xlu1 %v1561_v31, %s3781_s26 }
 0x34e   : > { %1592 = vrot.lane.b32.xlu0 %v1563_v5, %s3781_s26  ;;  %1594 = vrot.lane.b32.xlu1 %v1565_v39, %s3781_s26 }
 0x352   : > { %1596 = vrot.lane.b32.xlu0 %v1567_v54, %s3781_s26  ;;  %1598 = vrot.lane.b32.xlu1 %v1569_v34, %s3781_s26 }
 0x356   : > { %1600 = vrot.lane.b32.xlu0 %v1571_v61, %s3781_s26  ;;  %1657 = vrot.lane.b32.xlu1 %v1644_v21, %s3779_s18 }
 0x35a   : > { %1659 = vrot.lane.b32.xlu0 %v1648_v37, %s3779_s18  ;;  %1661 = vrot.lane.b32.xlu1 %v1652_v53, %s3779_s18 }
 0x35e   : > { %1663 = vrot.lane.b32.xlu0 %v1656_v51, %s3779_s18 }
 0x3ab   : > { %v4414_v56 = vpop.permute.xlu0 %1572 }
 0x3ac   : > { %6825 = vst [vmem:[#allocation80_spill] sm:$0xff] %v4414_v56  ;;  %v4416_v32 = vpop.permute.xlu1 %1574 }
 0x3ad   : > { %6826 = vst [vmem:[#allocation81_spill] sm:$0xff] %v4416_v32 }
 0x3b0   : > { %v4418_v10 = vpop.permute.xlu1 %1578  ;;  %v4420_v49 = vpop.permute.xlu0 %1576 }
 0x3b1   : > { %6827 = vst [vmem:[#allocation82_spill] sm:$0xff] %v4418_v10  ;;  %6828 = vst [vmem:[#allocation83_spill] sm:$0xff] %v4420_v49 }
 0x3b4   : > { %v4422_v57 = vpop.permute.xlu1 %1582  ;;  %v4424_v11 = vpop.permute.xlu0 %1580 }
 0x3b5   : > { %6829 = vst [vmem:[#allocation84_spill] sm:$0xff] %v4422_v57  ;;  %6830 = vst [vmem:[#allocation85_spill] sm:$0xff] %v4424_v11 }
 0x3b8   : > { %v4426_v62 = vpop.permute.xlu1 %1586  ;;  %v4428_v16 = vpop.permute.xlu0 %1584 }
 0x3b9   : > { %6831 = vst [vmem:[#allocation86_spill] sm:$0xff] %v4426_v62  ;;  %6832 = vst [vmem:[#allocation87_spill] sm:$0xff] %v4428_v16  ;;  %v4451_v16 = vld [vmem:[#allocation2 + $0x48] sm:$0xff] }
 0x3bc   : > { %v4430_v31 = vpop.permute.xlu1 %1590  ;;  %v4432_v9 = vpop.permute.xlu0 %1588 }
 0x3bd   : > { %6833 = vst [vmem:[#allocation88_spill] sm:$0xff] %v4430_v31  ;;  %6834 = vst [vmem:[#allocation89_spill] sm:$0xff] %v4432_v9 }
 0x3c0   : > { %v4434_v12 = vpop.permute.xlu1 %1594  ;;  %v4436_v1 = vpop.permute.xlu0 %1592 }
 0x3c1   : > { %6835 = vst [vmem:[#allocation90_spill] sm:$0xff] %v4434_v12  ;;  %6836 = vst [vmem:[#allocation91_spill] sm:$0xff] %v4436_v1 }
 0x3c4   : > { %v4438_v5 = vpop.permute.xlu1 %1598  ;;  %v4440_v39 = vpop.permute.xlu0 %1596 }
 0x3c5   : > { %6837 = vst [vmem:[#allocation92_spill] sm:$0xff] %v4438_v5  ;;  %6838 = vst [vmem:[#allocation93_spill] sm:$0xff] %v4440_v39  ;;  %v4462_v39 = vld [vmem:[#allocation2 + $0x58] sm:$0xff] }
 0x3c8   : > { %v1658_v2 = vpop.permute.xlu1 %1657  ;;  %v4442_v18 = vpop.permute.xlu0 %1600 }
 0x3c9   : > { %6839 = vst [vmem:[#allocation94_spill] sm:$0xff] %v4442_v18  ;;  %v1673_v54 = vmul.f32 %v1658_v2, %v3987_v26  ;;  %v1678_v57 = vmul.f32 %v1658_v2, %v3934_v47  ;;  %v4459_v18 = vld [vmem:[#allocation2 + $0x50] sm:$0xff] }
 0x3cb   : > { %v1703_v34 = vrot.slane %v1673_v54, 7 }
 0x3cc   : > { %v1662_v55 = vpop.permute.xlu1 %1661  ;;  %v1660_v21 = vpop.permute.xlu0 %1659 }
 0x3cd   : > { %v1665_v61 = vsel %vm254_vm3, %v1658_v2, %v1660_v21  ;;  %v1666_v37 = vsel %vm254_vm3, %v1660_v21, %v1662_v55  ;;  %1728 = vrot.lane.b32.xlu1 %v1703_v34, %s3781_s26 }
 0x3ce   : > { %v1674_v53 = vmul.f32 %v1665_v61, %v4101_v15  ;;  %v1675_v51 = vmul.f32 %v1666_v37, %v4099_v27  ;;  %v1679_v54 = vmul.f32 %v4451_v16, %v1665_v61  ;;  %v1680_v47 = vmul.f32 %v4459_v18, %v1666_v37 }
 0x3cf   : > { %v1685_v32 = vmul.f32 %v1666_v37, %v4212_v59 }
 0x3d0   : > { %v1704_v31 = vrot.slane %v1674_v53, 7  ;;  %v1705_v9 = vrot.slane %v1675_v51, 7  ;;  %v1664_v62 = vpop.permute.xlu0 %1663  ;;  %v1708_v51 = vrot.slane %v1678_v57, 7  ;;  %v1710_v5 = vrot.slane %v1679_v54, 7 }
 0x3d1   : > { %v1667_v11 = vsel %vm254_vm3, %v1662_v55, %v1664_v62  ;;  %v1677_v10 = vmul.f32 %v1664_v62, %v4107_v14  ;;  %v1682_v25 = vmul.f32 %v1664_v62, %v4121_v4  ;;  %v1684_v54 = vmul.f32 %v1665_v61, %v4204_v19 }
 0x3d2   : > { %1732 = vrot.lane.b32.xlu1 %v1705_v9, %s3781_s26  ;;  %1730 = vrot.lane.b32.xlu0 %v1704_v31, %s3781_s26  ;;  %v1676_v21 = vmul.f32 %v1667_v11, %v4111_v13  ;;  %v1681_v55 = vmul.f32 %v4462_v39, %v1667_v11  ;;  %v1709_v1 = vsel %vm831_vm12, %v1703_v34, %v1708_v51 }
 0x3d3   : > { %v1707_v49 = vrot.slane %v1677_v10, 7  ;;  %v1683_v10 = vmul.f32 %v1658_v2, %v4202_v50  ;;  %v1711_v57 = vsel %vm831_vm12, %v1704_v31, %v1710_v5  ;;  %v1716_v2 = vrot.slane %v1682_v25, 7 }
 0x3d4   : > { %v1706_v53 = vrot.slane %v1676_v21, 7  ;;  %v1712_v21 = vrot.slane %v1680_v47, 7  ;;  %v1714_v12 = vrot.slane %v1681_v55, 7  ;;  %v1720_v31 = vrot.slane %v1684_v54, 7 }
 0x3d5   : > { %v1718_v56 = vrot.slane %v1683_v10, 7  ;;  %v1722_v55 = vrot.slane %v1685_v32, 7  ;;  %v1686_v61 = vmul.f32 %v1667_v11, %v4214_v3  ;;  %v1687_v10 = vmul.f32 %v1664_v62, %v4222_v30 }
 0x3d6   : > { %1736 = vrot.lane.b32.xlu1 %v1707_v49, %s3781_s26  ;;  %1734 = vrot.lane.b32.xlu0 %v1706_v53, %s3781_s26  ;;  %v1713_v20 = vsel %vm831_vm12, %v1705_v9, %v1712_v21  ;;  %v1715_v34 = vsel %vm831_vm12, %v1706_v53, %v1714_v12  ;;  %v1721_v25 = vsel %vm831_vm12, %v1710_v5, %v1720_v31 }
 0x3d7   : > { %v1719_v47 = vsel %vm831_vm12, %v1708_v51, %v1718_v56  ;;  %v1724_v9 = vrot.slane %v1686_v61, 7  ;;  %v1726_v37 = vrot.slane %v1687_v10, 7  ;;  %v3699_v56 = vld [vmem:[%s6570_s1 + $0x24] ss:$8 sm:$0xf] }
 0x3d8   : > { %v1800_v11 = vrot.slane %v3699_v56, %v3834_v24  ;;  %v1804_v62 = vrot.slane %v3699_v56, %v3832_v23  ;;  %v1808_v5 = vrot.slane %v3699_v56, %v3848_v29  ;;  %v1812_v53 = vrot.slane %v3699_v56, %v3846_v28 }
 0x3d9   : > { %v1725_v32 = vsel %vm831_vm12, %v1714_v12, %v1724_v9 }
 0x3da   : > { %1740 = vrot.lane.b32.xlu1 %v1711_v57, %s3781_s26  ;;  %1738 = vrot.lane.b32.xlu0 %v1709_v1, %s3781_s26  ;;  %v1717_v1 = vsel %vm831_vm12, %v1707_v49, %v1716_v2  ;;  %v1727_v49 = vsel %vm831_vm12, %v1716_v2, %v1726_v37 }
 0x3de   : > { %1742 = vrot.lane.b32.xlu0 %v1713_v20, %s3781_s26  ;;  %1744 = vrot.lane.b32.xlu1 %v1715_v34, %s3781_s26  ;;  %v1723_v20 = vsel %vm831_vm12, %v1712_v21, %v1722_v55 }
 0x3e2   : > { %1746 = vrot.lane.b32.xlu0 %v1717_v1, %s3781_s26  ;;  %1748 = vrot.lane.b32.xlu1 %v1719_v47, %s3781_s26 }
 0x3e6   : > { %1750 = vrot.lane.b32.xlu0 %v1721_v25, %s3781_s26  ;;  %1752 = vrot.lane.b32.xlu1 %v1723_v20, %s3781_s26 }
 0x3ea   : > { %1754 = vrot.lane.b32.xlu0 %v1725_v32, %s3781_s26  ;;  %1756 = vrot.lane.b32.xlu1 %v1727_v49, %s3781_s26 }
 0x3ee   : > { %1813 = vrot.lane.b32.xlu0 %v1800_v11, %s3779_s18  ;;  %1815 = vrot.lane.b32.xlu1 %v1804_v62, %s3779_s18 }
 0x3f2   : > { %1817 = vrot.lane.b32.xlu0 %v1808_v5, %s3779_s18  ;;  %1819 = vrot.lane.b32.xlu1 %v1812_v53, %s3779_s18 }
 0x43f   : > { %v4504_v12 = vpop.permute.xlu1 %1728 }
 0x444   : > { %v4506_v51 = vpop.permute.xlu1 %1732  ;;  %v4508_v21 = vpop.permute.xlu0 %1730 }
 0x445   : > { %6840 = vst [vmem:[#allocation95_spill] sm:$0xff] %v4506_v51 }
 0x448   : > { %v4510_v57 = vpop.permute.xlu1 %1736  ;;  %v4512_v54 = vpop.permute.xlu0 %1734 }
 0x449   : > { %6841 = vst [vmem:[#allocation96_spill] sm:$0xff] %v4510_v57  ;;  %6842 = vst [vmem:[#allocation97_spill] sm:$0xff] %v4512_v54 }
 0x44c   : > { %v4514_v34 = vpop.permute.xlu1 %1740  ;;  %v4516_v2 = vpop.permute.xlu0 %1738 }
 0x44d   : > { %6843 = vst [vmem:[#allocation98_spill] sm:$0xff] %v4514_v34  ;;  %6844 = vst [vmem:[#allocation99_spill] sm:$0xff] %v4516_v2 }
 0x450   : > { %v4518_v31 = vpop.permute.xlu1 %1744  ;;  %v4520_v47 = vpop.permute.xlu0 %1742 }
 0x451   : > { %6845 = vst [vmem:[#allocation100_spill] sm:$0xff] %v4518_v31  ;;  %6846 = vst [vmem:[#allocation101_spill] sm:$0xff] %v4520_v47 }
 0x454   : > { %v4522_v55 = vpop.permute.xlu1 %1748  ;;  %v4524_v1 = vpop.permute.xlu0 %1746 }
 0x455   : > { %6847 = vst [vmem:[#allocation102_spill] sm:$0xff] %v4522_v55  ;;  %6848 = vst [vmem:[#allocation103_spill] sm:$0xff] %v4524_v1 }
 0x458   : > { %v4526_v61 = vpop.permute.xlu1 %1752  ;;  %v4528_v10 = vpop.permute.xlu0 %1750 }
 0x459   : > { %6849 = vst [vmem:[#allocation104_spill] sm:$0xff] %v4526_v61  ;;  %6850 = vst [vmem:[#allocation105_spill] sm:$0xff] %v4528_v10 }
 0x45c   : > { %v4530_v25 = vpop.permute.xlu1 %1756  ;;  %v4532_v20 = vpop.permute.xlu0 %1754 }
 0x45d   : > { %6851 = vst [vmem:[#allocation106_spill] sm:$0xff] %v4530_v25  ;;  %6852 = vst [vmem:[#allocation107_spill] sm:$0xff] %v4532_v20 }
 0x460   : > { %v1816_v9 = vpop.permute.xlu1 %1815  ;;  %v1814_v37 = vpop.permute.xlu0 %1813 }
 0x461   : > { %v1821_v56 = vsel %vm254_vm3, %v1814_v37, %v1816_v9  ;;  %v1829_v32 = vmul.f32 %v1814_v37, %v3987_v26  ;;  %v4545_v26 = vld [vmem:[#allocation2 + $0x40] sm:$0xff] }
 0x462   : > { %v1830_v49 = vmul.f32 %v1821_v56, %v4101_v15 }
 0x463   : > { %1859 = vrot.lane.b32.xlu0 %v1829_v32, %s3781_s26  ;;  %v1834_v32 = vmul.f32 %v4545_v26, %v1814_v37 }
 0x464   : > { %v1820_v11 = vpop.permute.xlu1 %1819  ;;  %1861 = vrot.lane.b32.xlu1 %v1830_v49, %s3781_s26  ;;  %v1818_v62 = vpop.permute.xlu0 %1817  ;;  %v1835_v49 = vmul.f32 %v4451_v16, %v1821_v56 }
 0x465   : > { %v1822_v5 = vsel %vm254_vm3, %v1816_v9, %v1818_v62  ;;  %v1823_v53 = vsel %vm254_vm3, %v1818_v62, %v1820_v11  ;;  %v1833_v47 = vmul.f32 %v1820_v11, %v4107_v14  ;;  %v1840_v62 = vmul.f32 %v1821_v56, %v4204_v19 }
 0x466   : > { %v1831_v1 = vmul.f32 %v1822_v5, %v4099_v27  ;;  %v1832_v31 = vmul.f32 %v1823_v53, %v4111_v13  ;;  %v1836_v9 = vmul.f32 %v4459_v18, %v1822_v5 }
 0x468   : > { %1865 = vrot.lane.b32.xlu1 %v1832_v31, %s3781_s26  ;;  %1863 = vrot.lane.b32.xlu0 %v1831_v1, %s3781_s26  ;;  %v1837_v31 = vmul.f32 %v4462_v39, %v1823_v53  ;;  %v1838_v1 = vmul.f32 %v1820_v11, %v4121_v4 }
 0x46c   : > { %1869 = vrot.lane.b32.xlu1 %v1834_v32, %s3781_s26  ;;  %1867 = vrot.lane.b32.xlu0 %v1833_v47, %s3781_s26  ;;  %v1839_v47 = vmul.f32 %v1814_v37, %v4202_v50  ;;  %v3700_v32 = vld [vmem:[%s6570_s1 + $0x25] ss:$8 sm:$0xf]  ;;  %v1843_v37 = vmul.f32 %v1820_v11, %v4222_v30 }
 0x46d   : > { %v1931_v56 = vrot.slane %v3700_v32, %v3834_v24 }
 0x470   : > { %1873 = vrot.lane.b32.xlu1 %v1836_v9, %s3781_s26  ;;  %1871 = vrot.lane.b32.xlu0 %v1835_v49, %s3781_s26  ;;  %v1841_v9 = vmul.f32 %v1822_v5, %v4212_v59  ;;  %v1842_v49 = vmul.f32 %v1823_v53, %v4214_v3  ;;  %v1943_v5 = vrot.slane %v3700_v32, %v3846_v28 }
 0x474   : > { %1877 = vrot.lane.b32.xlu1 %v1838_v1, %s3781_s26  ;;  %1875 = vrot.lane.b32.xlu0 %v1837_v31, %s3781_s26  ;;  %v1939_v31 = vrot.slane %v3700_v32, %v3848_v29  ;;  %v1935_v1 = vrot.slane %v3700_v32, %v3832_v23 }
 0x478   : > { %1881 = vrot.lane.b32.xlu1 %v1840_v62, %s3781_s26  ;;  %1879 = vrot.lane.b32.xlu0 %v1839_v47, %s3781_s26 }
 0x47c   : > { %1885 = vrot.lane.b32.xlu1 %v1842_v49, %s3781_s26  ;;  %1883 = vrot.lane.b32.xlu0 %v1841_v9, %s3781_s26 }
 0x480   : > { %1944 = vrot.lane.b32.xlu1 %v1931_v56, %s3779_s18  ;;  %1887 = vrot.lane.b32.xlu0 %v1843_v37, %s3781_s26 }
 0x484   : > { %1948 = vrot.lane.b32.xlu1 %v1939_v31, %s3779_s18  ;;  %1946 = vrot.lane.b32.xlu0 %v1935_v1, %s3779_s18 }
 0x488   : > { %1950 = vrot.lane.b32.xlu0 %v1943_v5, %s3779_s18 }
 0x4d5   : > { %v4580_v53 = vpop.permute.xlu0 %1859 }
 0x4d6   : > { %6853 = vst [vmem:[#allocation108_spill] sm:$0xff] %v4580_v53  ;;  %v4582_v62 = vpop.permute.xlu1 %1861 }
 0x4d7   : > { %6854 = vst [vmem:[#allocation109_spill] sm:$0xff] %v4582_v62 }
 0x4da   : > { %v4584_v11 = vpop.permute.xlu1 %1865  ;;  %v4586_v47 = vpop.permute.xlu0 %1863 }
 0x4db   : > { %6855 = vst [vmem:[#allocation110_spill] sm:$0xff] %v4584_v11  ;;  %6856 = vst [vmem:[#allocation111_spill] sm:$0xff] %v4586_v47 }
 0x4de   : > { %v4588_v9 = vpop.permute.xlu1 %1869  ;;  %v4590_v49 = vpop.permute.xlu0 %1867 }
 0x4df   : > { %6857 = vst [vmem:[#allocation112_spill] sm:$0xff] %v4588_v9  ;;  %6858 = vst [vmem:[#allocation113_spill] sm:$0xff] %v4590_v49  ;;  %v4610_v49 = vld [vmem:[#allocation2 + $0x8] sm:$0xff] }
 0x4e2   : > { %v4592_v56 = vpop.permute.xlu1 %1873  ;;  %v4594_v37 = vpop.permute.xlu0 %1871 }
 0x4e3   : > { %6859 = vst [vmem:[#allocation114_spill] sm:$0xff] %v4592_v56  ;;  %6860 = vst [vmem:[#allocation115_spill] sm:$0xff] %v4594_v37 }
 0x4e6   : > { %v4596_v31 = vpop.permute.xlu1 %1877  ;;  %v4598_v32 = vpop.permute.xlu0 %1875 }
 0x4e7   : > { %6861 = vst [vmem:[#allocation116_spill] sm:$0xff] %v4596_v31  ;;  %6862 = vst [vmem:[#allocation117_spill] sm:$0xff] %v4598_v32 }
 0x4ea   : > { %v4600_v1 = vpop.permute.xlu1 %1881  ;;  %v4602_v5 = vpop.permute.xlu0 %1879 }
 0x4eb   : > { %6863 = vst [vmem:[#allocation118_spill] sm:$0xff] %v4600_v1  ;;  %6864 = vst [vmem:[#allocation119_spill] sm:$0xff] %v4602_v5 }
 0x4ee   : > { %v4604_v2 = vpop.permute.xlu1 %1885  ;;  %v4606_v34 = vpop.permute.xlu0 %1883 }
 0x4ef   : > { %6865 = vst [vmem:[#allocation120_spill] sm:$0xff] %v4604_v2  ;;  %6866 = vst [vmem:[#allocation121_spill] sm:$0xff] %v4606_v34 }
 0x4f2   : > { %v1945_v57 = vpop.permute.xlu1 %1944  ;;  %v4608_v9 = vpop.permute.xlu0 %1887 }
 0x4f3   : > { %6867 = vst [vmem:[#allocation122_spill] sm:$0xff] %v4608_v9  ;;  %v1960_v56 = vmul.f32 %v4610_v49, %v1945_v57  ;;  %v1965_v37 = vmul.f32 %v4545_v26, %v1945_v57 }
 0x4f5   : > { %v1990_v31 = vrot.slane %v1960_v56, 1  ;;  %v1991_v11 = vrot.slane %v1965_v37, 1 }
 0x4f6   : > { %v1949_v32 = vpop.permute.xlu1 %1948  ;;  %v1947_v47 = vpop.permute.xlu0 %1946 }
 0x4f7   : > { %v1952_v54 = vsel %vm254_vm3, %v1945_v57, %v1947_v47  ;;  %v1953_v51 = vsel %vm254_vm3, %v1947_v47, %v1949_v32  ;;  %v1992_v2 = vsel %vm970_vm13, %v1990_v31, %v1991_v11 }
 0x4f8   : > { %v1961_v34 = vmul.f32 %v1952_v54, %v4101_v15  ;;  %v1962_v9 = vmul.f32 %v1953_v51, %v4099_v27  ;;  %v1966_v25 = vmul.f32 %v4451_v16, %v1952_v54  ;;  %v1967_v5 = vmul.f32 %v4459_v18, %v1953_v51  ;;  %2015 = vrot.lane.b32.xlu1 %v1992_v2, %s3781_s26 }
 0x4f9   : > { %v1971_v55 = vmul.f32 %v1952_v54, %v4204_v19  ;;  %v1970_v54 = vmul.f32 %v1945_v57, %v4202_v50 }
 0x4fa   : > { %v1993_v56 = vrot.slane %v1961_v34, 1  ;;  %v1994_v37 = vrot.slane %v1966_v25, 1  ;;  %v1996_v1 = vrot.slane %v1962_v9, 1  ;;  %v1997_v20 = vrot.slane %v1967_v5, 1  ;;  %v1951_v61 = vpop.permute.xlu0 %1950 }
 0x4fb   : > { %v1954_v47 = vsel %vm254_vm3, %v1949_v32, %v1951_v61  ;;  %v1964_v31 = vmul.f32 %v1951_v61, %v4107_v14  ;;  %v1969_v10 = vmul.f32 %v1951_v61, %v4121_v4  ;;  %v2007_v32 = vrot.slane %v1971_v55, 1 }
 0x4fc   : > { %v1998_v15 = vsel %vm970_vm13, %v1996_v1, %v1997_v20  ;;  %v1995_v27 = vsel %vm970_vm13, %v1993_v56, %v1994_v37  ;;  %v1963_v53 = vmul.f32 %v1954_v47, %v4111_v13  ;;  %v1968_v2 = vmul.f32 %v4462_v39, %v1954_v47 }
 0x4fd   : > { %2019 = vrot.lane.b32.xlu1 %v1998_v15, %s3781_s26  ;;  %2017 = vrot.lane.b32.xlu0 %v1995_v27, %s3781_s26  ;;  %v2002_v34 = vrot.slane %v1964_v31, 1  ;;  %v2003_v25 = vrot.slane %v1969_v10, 1  ;;  %v1973_v5 = vmul.f32 %v1954_v47, %v4214_v3  ;;  %v1972_v4 = vmul.f32 %v1953_v51, %v4212_v59 }
 0x4fe   : > { %v1999_v9 = vrot.slane %v1963_v53, 1  ;;  %v2000_v14 = vrot.slane %v1968_v2, 1  ;;  %v2005_v56 = vrot.slane %v1970_v54, 1  ;;  %v2008_v31 = vsel %vm970_vm13, %v1994_v37, %v2007_v32 }
 0x4ff   : > { %v2004_v1 = vsel %vm970_vm13, %v2002_v34, %v2003_v25  ;;  %v2011_v57 = vrot.slane %v1973_v5, 1  ;;  %v2009_v10 = vrot.slane %v1972_v4, 1  ;;  %v1974_v53 = vmul.f32 %v1951_v61, %v4222_v30  ;;  %v3701_v61 = vld [vmem:[%s6570_s1 + $0x26] ss:$8 sm:$0xf] }
 0x500   : > { %v2001_v13 = vsel %vm970_vm13, %v1999_v9, %v2000_v14  ;;  %v2006_v55 = vsel %vm970_vm13, %v1991_v11, %v2005_v56  ;;  %v2087_v11 = vrot.slane %v3701_v61, %v3834_v24  ;;  %v2099_v27 = vrot.slane %v3701_v61, %v3846_v28 }
 0x501   : > { %2023 = vrot.lane.b32.xlu1 %v2004_v1, %s3781_s26  ;;  %2021 = vrot.lane.b32.xlu0 %v2001_v13, %s3781_s26  ;;  %v2012_v51 = vsel %vm970_vm13, %v2000_v14, %v2011_v57  ;;  %v2010_v47 = vsel %vm970_vm13, %v1997_v20, %v2009_v10  ;;  %v2013_v15 = vrot.slane %v1974_v53, 1  ;;  %v2091_v20 = vrot.slane %v3701_v61, %v3832_v23 }
 0x502   : > { %v2095_v34 = vrot.slane %v3701_v61, %v3848_v29  ;;  %v3733_v61 = vld [vmem:[#allocation2 + $0x10] sm:$0xff] }
 0x503   : > { %v2014_v37 = vsel %vm970_vm13, %v2003_v25, %v2013_v15 }
 0x505   : > { %2027 = vrot.lane.b32.xlu1 %v2008_v31, %s3781_s26  ;;  %2025 = vrot.lane.b32.xlu0 %v2006_v55, %s3781_s26 }
 0x509   : > { %2031 = vrot.lane.b32.xlu1 %v2012_v51, %s3781_s26  ;;  %2029 = vrot.lane.b32.xlu0 %v2010_v47, %s3781_s26 }
 0x50d   : > { %2035 = vrot.lane.b32.xlu1 %v2005_v56, %s3781_s26  ;;  %2033 = vrot.lane.b32.xlu0 %v2014_v37, %s3781_s26 }
 0x511   : > { %2039 = vrot.lane.b32.xlu1 %v2009_v10, %s3781_s26  ;;  %2037 = vrot.lane.b32.xlu0 %v2007_v32, %s3781_s26 }
 0x515   : > { %2043 = vrot.lane.b32.xlu1 %v2013_v15, %s3781_s26  ;;  %2041 = vrot.lane.b32.xlu0 %v2011_v57, %s3781_s26 }
 0x519   : > { %2102 = vrot.lane.b32.xlu1 %v2091_v20, %s3779_s18  ;;  %2100 = vrot.lane.b32.xlu0 %v2087_v11, %s3779_s18 }
 0x51d   : > { %2106 = vrot.lane.b32.xlu1 %v2099_v27, %s3779_s18  ;;  %2104 = vrot.lane.b32.xlu0 %v2095_v34, %s3779_s18 }
 0x56a   : > { %v4666_v2 = vpop.permute.xlu1 %2015 }
 0x56b   : > { %6868 = vst [vmem:[#allocation123_spill] sm:$0xff] %v4666_v2 }
 0x56f   : > { %v4668_v54 = vpop.permute.xlu1 %2019  ;;  %v4670_v25 = vpop.permute.xlu0 %2017 }
 0x570   : > { %6869 = vst [vmem:[#allocation124_spill] sm:$0xff] %v4668_v54  ;;  %6870 = vst [vmem:[#allocation125_spill] sm:$0xff] %v4670_v25 }
 0x573   : > { %v4672_v9 = vpop.permute.xlu1 %2023  ;;  %v4674_v14 = vpop.permute.xlu0 %2021 }
 0x574   : > { %6871 = vst [vmem:[#allocation126_spill] sm:$0xff] %v4672_v9  ;;  %6872 = vst [vmem:[#allocation127_spill] sm:$0xff] %v4674_v14 }
 0x577   : > { %v4676_v32 = vpop.permute.xlu1 %2027  ;;  %v4678_v1 = vpop.permute.xlu0 %2025 }
 0x578   : > { %6873 = vst [vmem:[#allocation128_spill] sm:$0xff] %v4676_v32  ;;  %6874 = vst [vmem:[#allocation129_spill] sm:$0xff] %v4678_v1  ;;  %v3734_v32 = vld [vmem:[#allocation2 + $0x28] sm:$0xff] }
 0x57b   : > { %v4680_v5 = vpop.permute.xlu1 %2031  ;;  %v4682_v4 = vpop.permute.xlu0 %2029 }
 0x57c   : > { %6875 = vst [vmem:[#allocation130_spill] sm:$0xff] %v4680_v5  ;;  %6876 = vst [vmem:[#allocation131_spill] sm:$0xff] %v4682_v4 }
 0x57f   : > { %v4684_v13 = vpop.permute.xlu1 %2035  ;;  %v4686_v56 = vpop.permute.xlu0 %2033 }
 0x580   : > { %6877 = vst [vmem:[#allocation132_spill] sm:$0xff] %v4684_v13  ;;  %6878 = vst [vmem:[#allocation133_spill] sm:$0xff] %v4686_v56  ;;  %v3737_v13 = vld [vmem:[#allocation2 + $0x20] sm:$0xff] }
 0x583   : > { %v4688_v31 = vpop.permute.xlu1 %2039  ;;  %v4690_v57 = vpop.permute.xlu0 %2037 }
 0x584   : > { %6879 = vst [vmem:[#allocation134_spill] sm:$0xff] %v4688_v31  ;;  %6880 = vst [vmem:[#allocation135_spill] sm:$0xff] %v4690_v57 }
 0x587   : > { %v4692_v10 = vpop.permute.xlu1 %2043  ;;  %v4694_v55 = vpop.permute.xlu0 %2041 }
 0x588   : > { %6881 = vst [vmem:[#allocation136_spill] sm:$0xff] %v4692_v10  ;;  %6882 = vst [vmem:[#allocation137_spill] sm:$0xff] %v4694_v55  ;;  %v4703_v10 = vld [vmem:[#allocation2 + $0x60] sm:$0xff]  ;;  %v3736_v55 = vld [vmem:[#allocation2 + $0x18] sm:$0xff] }
 0x58b   : > { %v2103_v53 = vpop.permute.xlu1 %2102  ;;  %v2101_v51 = vpop.permute.xlu0 %2100 }
 0x58c   : > { %v2108_v47 = vsel %vm254_vm3, %v2101_v51, %v2103_v53  ;;  %v2116_v15 = vmul.f32 %v4610_v49, %v2101_v51  ;;  %v2121_v37 = vmul.f32 %v4545_v26, %v2101_v51 }
 0x58d   : > { %v2117_v20 = vmul.f32 %v3733_v61, %v2108_v47  ;;  %v2122_v11 = vmul.f32 %v4451_v16, %v2108_v47 }
 0x58e   : > { %v2147_v34 = vrot.slane %v2116_v15, 2  ;;  %v2148_v56 = vrot.slane %v2121_v37, 2 }
 0x58f   : > { %v2107_v27 = vpop.permute.xlu1 %2106  ;;  %v2105_v5 = vpop.permute.xlu0 %2104  ;;  %v2150_v4 = vrot.slane %v2117_v20, 2  ;;  %v2151_v1 = vrot.slane %v2122_v11, 2 }
 0x590   : > { %v2120_v9 = vmul.f32 %v3734_v32, %v2107_v27  ;;  %v2109_v14 = vsel %vm254_vm3, %v2103_v53, %v2105_v5  ;;  %v2110_v54 = vsel %vm254_vm3, %v2105_v5, %v2107_v27  ;;  %v2149_v49 = vsel %vm2146_vm14, %v2147_v34, %v2148_v56 }
 0x591   : > { %v2125_v61 = vmul.f32 %v4703_v10, %v2107_v27  ;;  %v2118_v31 = vmul.f32 %v3736_v55, %v2109_v14  ;;  %v2119_v15 = vmul.f32 %v3737_v13, %v2110_v54  ;;  %v2123_v37 = vmul.f32 %v4459_v18, %v2109_v14  ;;  %2172 = vrot.lane.b32.xlu0 %v2149_v49, %s3781_s26 }
 0x592   : > { %v2124_v20 = vmul.f32 %v4462_v39, %v2110_v54  ;;  %v2152_v32 = vsel %vm2146_vm14, %v2150_v4, %v2151_v1  ;;  %v2126_v5 = vmul.f32 %v2101_v51, %v4202_v50  ;;  %v2127_v55 = vmul.f32 %v2108_v47, %v4204_v19 }
 0x593   : > { %v2153_v53 = vrot.slane %v2118_v31, 2  ;;  %v2154_v11 = vrot.slane %v2123_v37, 2  ;;  %v2156_v34 = vrot.slane %v2119_v15, 2  ;;  %2174 = vrot.lane.b32.xlu1 %v2152_v32, %s3781_s26  ;;  %v2159_v25 = vrot.slane %v2120_v9, 2 }
 0x594   : > { %v2157_v57 = vrot.slane %v2124_v20, 2  ;;  %v2160_v62 = vrot.slane %v2125_v61, 2  ;;  %v2128_v49 = vmul.f32 %v2109_v14, %v4212_v59  ;;  %v2162_v4 = vrot.slane %v2126_v5, 2 }
 0x595   : > { %v2155_v2 = vsel %vm2146_vm14, %v2153_v53, %v2154_v11  ;;  %v2129_v50 = vmul.f32 %v2110_v54, %v4214_v3  ;;  %v2164_v51 = vrot.slane %v2127_v55, 2  ;;  %v2130_v9 = vmul.f32 %v2107_v27, %v4222_v30  ;;  %v3702_v30 = vld [vmem:[%s6570_s1 + $0x27] ss:$8 sm:$0xf] }
 0x596   : > { %v2158_v13 = vsel %vm2146_vm14, %v2156_v34, %v2157_v57  ;;  %2176 = vrot.lane.b32.xlu0 %v2155_v2, %s3781_s26  ;;  %v2161_v31 = vsel %vm2146_vm14, %v2159_v25, %v2160_v62  ;;  %v2166_v15 = vrot.slane %v2128_v49, 2  ;;  %v2163_v19 = vsel %vm2146_vm14, %v2148_v56, %v2162_v4 }
 0x597   : > { %2178 = vrot.lane.b32.xlu1 %v2158_v13, %s3781_s26  ;;  %v2168_v59 = vrot.slane %v2129_v50, 2  ;;  %v2165_v2 = vsel %vm2146_vm14, %v2151_v1, %v2164_v51  ;;  %v2170_v3 = vrot.slane %v2130_v9, 2  ;;  %v2244_v1 = vrot.slane %v3702_v30, %v3834_v24 }
 0x598   : > { %v2167_v14 = vsel %vm2146_vm14, %v2154_v11, %v2166_v15  ;;  %v2252_v56 = vrot.slane %v3702_v30, %v3848_v29 }
 0x599   : > { %v2169_v54 = vsel %vm2146_vm14, %v2157_v57, %v2168_v59  ;;  %v2171_v25 = vsel %vm2146_vm14, %v2160_v62, %v2170_v3  ;;  %v2248_v62 = vrot.slane %v3702_v30, %v3832_v23  ;;  %v2256_v57 = vrot.slane %v3702_v30, %v3846_v28  ;;  %v4784_v30 = vld [vmem:[#allocation2 + $0x78] sm:$0xff] }
 0x59a   : > { %2180 = vrot.lane.b32.xlu0 %v2161_v31, %s3781_s26 }
 0x59b   : > { %2182 = vrot.lane.b32.xlu1 %v2163_v19, %s3781_s26 }
 0x59e   : > { %2184 = vrot.lane.b32.xlu0 %v2165_v2, %s3781_s26 }
 0x59f   : > { %2186 = vrot.lane.b32.xlu1 %v2167_v14, %s3781_s26 }
 0x5a2   : > { %2188 = vrot.lane.b32.xlu0 %v2169_v54, %s3781_s26 }
 0x5a3   : > { %2190 = vrot.lane.b32.xlu1 %v2171_v25, %s3781_s26 }
 0x5a6   : > { %2192 = vrot.lane.b32.xlu0 %v2162_v4, %s3781_s26 }
 0x5a7   : > { %2194 = vrot.lane.b32.xlu1 %v2164_v51, %s3781_s26 }
 0x5aa   : > { %2196 = vrot.lane.b32.xlu0 %v2166_v15, %s3781_s26 }
 0x5ab   : > { %2198 = vrot.lane.b32.xlu1 %v2168_v59, %s3781_s26 }
 0x5ae   : > { %2200 = vrot.lane.b32.xlu0 %v2170_v3, %s3781_s26 }
 0x5af   : > { %2257 = vrot.lane.b32.xlu1 %v2244_v1, %s3779_s18 }
 0x5b2   : > { %2259 = vrot.lane.b32.xlu0 %v2248_v62, %s3779_s18 }
 0x5b3   : > { %2261 = vrot.lane.b32.xlu1 %v2252_v56, %s3779_s18 }
 0x5b6   : > { %2263 = vrot.lane.b32.xlu0 %v2256_v57, %s3779_s18 }
 0x603   : > { %v4748_v47 = vpop.permute.xlu0 %2172 }
 0x604   : > { %6883 = vst [vmem:[#allocation138_spill] sm:$0xff] %v4748_v47  ;;  %v4893_v47 = vld [vmem:[#allocation2 + $0xc8] sm:$0x3] }
 0x605   : > { %v4750_v27 = vpop.permute.xlu1 %2174 }
 0x606   : > { %6884 = vst [vmem:[#allocation139_spill] sm:$0xff] %v4750_v27 }
 0x608   : > { %v4752_v61 = vpop.permute.xlu0 %2176 }
 0x609   : > { %6885 = vst [vmem:[#allocation140_spill] sm:$0xff] %v4752_v61  ;;  %v4754_v37 = vpop.permute.xlu1 %2178 }
 0x60a   : > { %6886 = vst [vmem:[#allocation141_spill] sm:$0xff] %v4754_v37 }
 0x60c   : > { %v4756_v20 = vpop.permute.xlu0 %2180 }
 0x60d   : > { %6887 = vst [vmem:[#allocation142_spill] sm:$0xff] %v4756_v20  ;;  %v4758_v32 = vpop.permute.xlu1 %2182  ;;  %v4803_v20 = vld [vmem:[#allocation2 + $0x98] sm:$0xff] }
 0x60e   : > { %6888 = vst [vmem:[#allocation143_spill] sm:$0xff] %v4758_v32  ;;  %v4795_v32 = vld [vmem:[#allocation2 + $0x88] sm:$0xff] }
 0x610   : > { %v4760_v5 = vpop.permute.xlu0 %2184 }
 0x611   : > { %6889 = vst [vmem:[#allocation144_spill] sm:$0xff] %v4760_v5  ;;  %v4762_v53 = vpop.permute.xlu1 %2186 }
 0x612   : > { %6890 = vst [vmem:[#allocation145_spill] sm:$0xff] %v4762_v53 }
 0x614   : > { %v4764_v11 = vpop.permute.xlu0 %2188 }
 0x615   : > { %6891 = vst [vmem:[#allocation146_spill] sm:$0xff] %v4764_v11  ;;  %v4766_v34 = vpop.permute.xlu1 %2190 }
 0x616   : > { %6892 = vst [vmem:[#allocation147_spill] sm:$0xff] %v4766_v34 }
 0x618   : > { %v4768_v55 = vpop.permute.xlu0 %2192 }
 0x619   : > { %6893 = vst [vmem:[#allocation148_spill] sm:$0xff] %v4768_v55  ;;  %v4770_v13 = vpop.permute.xlu1 %2194 }
 0x61a   : > { %6894 = vst [vmem:[#allocation149_spill] sm:$0xff] %v4770_v13  ;;  %v4884_v13 = vld [vmem:[#allocation2 + $0xb8] sm:$0x3] }
 0x61c   : > { %v4772_v49 = vpop.permute.xlu0 %2196 }
 0x61d   : > { %6895 = vst [vmem:[#allocation150_spill] sm:$0xff] %v4772_v49  ;;  %v4774_v4 = vpop.permute.xlu1 %2198 }
 0x61e   : > { %6896 = vst [vmem:[#allocation151_spill] sm:$0xff] %v4774_v4 }
 0x620   : > { %v4776_v50 = vpop.permute.xlu0 %2200 }
 0x621   : > { %6897 = vst [vmem:[#allocation152_spill] sm:$0xff] %v4776_v50  ;;  %v2258_v31 = vpop.permute.xlu1 %2257 }
 0x622   : > { %v2273_v51 = vmul.f32 %v4545_v26, %v2258_v31  ;;  %v2278_v1 = vmul.f32 %v4784_v30, %v2258_v31 }
 0x624   : > { %v2293_v15 = vrot.slane %v2273_v51, 3  ;;  %v2260_v19 = vpop.permute.xlu0 %2259  ;;  %v4789_v51 = vld [vmem:[#allocation2 + $0x80] sm:$0xff]  ;;  %v2298_v53 = vrot.slane %v2278_v1, 3 }
 0x625   : > { %v2262_v9 = vpop.permute.xlu1 %2261  ;;  %v2265_v59 = vsel %vm254_vm3, %v2258_v31, %v2260_v19 }
 0x626   : > { %v2266_v2 = vsel %vm254_vm3, %v2260_v19, %v2262_v9  ;;  %v2274_v14 = vmul.f32 %v4451_v16, %v2265_v59  ;;  %2308 = vrot.lane.b32.xlu1 %v2293_v15, %s3781_s26  ;;  %v2279_v19 = vmul.f32 %v4789_v51, %v2265_v59 }
 0x627   : > { %v2275_v3 = vmul.f32 %v4459_v18, %v2266_v2  ;;  %v2280_v31 = vmul.f32 %v4795_v32, %v2266_v2 }
 0x628   : > { %v2294_v54 = vrot.slane %v2274_v14, 3  ;;  %v2264_v25 = vpop.permute.xlu0 %2263 }
 0x629   : > { %v2295_v62 = vrot.slane %v2275_v3, 3  ;;  %v2267_v56 = vsel %vm254_vm3, %v2262_v9, %v2264_v25  ;;  %v2277_v57 = vmul.f32 %v4703_v10, %v2264_v25  ;;  %v2300_v9 = vrot.slane %v2279_v19, 3  ;;  %v4798_v3 = vld [vmem:[#allocation2 + $0x90] sm:$0xff] }
 0x62a   : > { %v2276_v34 = vmul.f32 %v4462_v39, %v2267_v56  ;;  %2310 = vrot.lane.b32.xlu0 %v2294_v54, %s3781_s26  ;;  %v2281_v5 = vmul.f32 %v4798_v3, %v2267_v56  ;;  %v2302_v59 = vrot.slane %v2280_v31, 3 }
 0x62b   : > { %v2297_v11 = vrot.slane %v2277_v57, 3  ;;  %2312 = vrot.lane.b32.xlu1 %v2295_v62, %s3781_s26  ;;  %v2282_v57 = vmul.f32 %v4803_v20, %v2264_v25  ;;  %v2301_v37 = vsel %vm217_vm0, %v2294_v54, %v2300_v9 }
 0x62c   : > { %v2296_v14 = vrot.slane %v2276_v34, 3  ;;  %v2299_v34 = vsel %vm217_vm0, %v2293_v15, %v2298_v53  ;;  %v2304_v1 = vrot.slane %v2281_v5, 3  ;;  %v2303_v56 = vsel %vm217_vm0, %v2295_v62, %v2302_v59 }
 0x62d   : > { %v2306_v2 = vrot.slane %v2282_v57, 3 }
 0x62e   : > { %2314 = vrot.lane.b32.xlu0 %v2296_v14, %s3781_s26  ;;  %v2305_v19 = vsel %vm217_vm0, %v2296_v14, %v2304_v1 }
 0x62f   : > { %2316 = vrot.lane.b32.xlu1 %v2297_v11, %s3781_s26  ;;  %v2307_v25 = vsel %vm217_vm0, %v2297_v11, %v2306_v2 }
 0x632   : > { %2318 = vrot.lane.b32.xlu0 %v2299_v34, %s3781_s26 }
 0x633   : > { %2320 = vrot.lane.b32.xlu1 %v2301_v37, %s3781_s26  ;;  %v3703_v37 = vld [vmem:[%s6570_s1 + $0x40] ss:$8 sm:$0xf] }
 0x634   : > { %v2380_v5 = vrot.slane %v3703_v37, %v3834_v24  ;;  %v2384_v11 = vrot.slane %v3703_v37, %v3832_v23  ;;  %v2392_v15 = vrot.slane %v3703_v37, %v3846_v28 }
 0x636   : > { %2322 = vrot.lane.b32.xlu0 %v2303_v56, %s3781_s26 }
 0x637   : > { %2324 = vrot.lane.b32.xlu1 %v2305_v19, %s3781_s26 }
 0x63a   : > { %2326 = vrot.lane.b32.xlu0 %v2307_v25, %s3781_s26 }
 0x63b   : > { %2328 = vrot.lane.b32.xlu1 %v2298_v53, %s3781_s26  ;;  %v2388_v53 = vrot.slane %v3703_v37, %v3848_v29 }
 0x63e   : > { %2330 = vrot.lane.b32.xlu0 %v2300_v9, %s3781_s26 }
 0x63f   : > { %2332 = vrot.lane.b32.xlu1 %v2302_v59, %s3781_s26 }
 0x642   : > { %2334 = vrot.lane.b32.xlu0 %v2304_v1, %s3781_s26 }
 0x643   : > { %2336 = vrot.lane.b32.xlu1 %v2306_v2, %s3781_s26 }
 0x646   : > { %2393 = vrot.lane.b32.xlu0 %v2380_v5, %s3779_s18 }
 0x647   : > { %2395 = vrot.lane.b32.xlu1 %v2384_v11, %s3779_s18 }
 0x64a   : > { %2397 = vrot.lane.b32.xlu0 %v2388_v53, %s3779_s18 }
 0x64b   : > { %2399 = vrot.lane.b32.xlu1 %v2392_v15, %s3779_s18 }
 0x698   : > { %v4832_v54 = vpop.permute.xlu1 %2308 }
 0x699   : > { %6898 = vst [vmem:[#allocation153_spill] sm:$0xff] %v4832_v54 }
 0x69c   : > { %v4834_v62 = vpop.permute.xlu0 %2310 }
 0x69d   : > { %6899 = vst [vmem:[#allocation154_spill] sm:$0xff] %v4834_v62  ;;  %v4836_v14 = vpop.permute.xlu1 %2312  ;;  %v4888_v62 = vld [vmem:[#allocation2 + $0xc0] sm:$0x3] }
 0x69e   : > { %6900 = vst [vmem:[#allocation155_spill] sm:$0xff] %v4836_v14 }
 0x6a0   : > { %v4838_v31 = vpop.permute.xlu0 %2314 }
 0x6a1   : > { %6901 = vst [vmem:[#allocation156_spill] sm:$0xff] %v4838_v31  ;;  %v4840_v9 = vpop.permute.xlu1 %2316 }
 0x6a2   : > { %6902 = vst [vmem:[#allocation157_spill] sm:$0xff] %v4840_v9 }
 0x6a4   : > { %v4842_v59 = vpop.permute.xlu0 %2318 }
 0x6a5   : > { %6903 = vst [vmem:[#allocation158_spill] sm:$0xff] %v4842_v59  ;;  %v4844_v57 = vpop.permute.xlu1 %2320 }
 0x6a6   : > { %6904 = vst [vmem:[#allocation159_spill] sm:$0xff] %v4844_v57 }
 0x6a8   : > { %v4846_v34 = vpop.permute.xlu0 %2322 }
 0x6a9   : > { %6905 = vst [vmem:[#allocation160_spill] sm:$0xff] %v4846_v34  ;;  %v4848_v1 = vpop.permute.xlu1 %2324 }
 0x6aa   : > { %6906 = vst [vmem:[#allocation161_spill] sm:$0xff] %v4848_v1 }
 0x6ac   : > { %v4850_v2 = vpop.permute.xlu0 %2326 }
 0x6ad   : > { %6907 = vst [vmem:[#allocation162_spill] sm:$0xff] %v4850_v2  ;;  %v4852_v56 = vpop.permute.xlu1 %2328 }
 0x6ae   : > { %6908 = vst [vmem:[#allocation163_spill] sm:$0xff] %v4852_v56 }
 0x6b0   : > { %v4854_v19 = vpop.permute.xlu0 %2330 }
 0x6b1   : > { %6909 = vst [vmem:[#allocation164_spill] sm:$0xff] %v4854_v19  ;;  %v4856_v25 = vpop.permute.xlu1 %2332 }
 0x6b2   : > { %6910 = vst [vmem:[#allocation165_spill] sm:$0xff] %v4856_v25 }
 0x6b4   : > { %v4858_v37 = vpop.permute.xlu0 %2334 }
 0x6b5   : > { %6911 = vst [vmem:[#allocation166_spill] sm:$0xff] %v4858_v37  ;;  %v4860_v5 = vpop.permute.xlu1 %2336 }
 0x6b6   : > { %6912 = vst [vmem:[#allocation167_spill] sm:$0xff] %v4860_v5 }
 0x6b8   : > { %v2394_v11 = vpop.permute.xlu0 %2393 }
 0x6b9   : > { %v2396_v53 = vpop.permute.xlu1 %2395  ;;  %v2409_v15 = vmul.f32 %v4545_v26, %v2394_v11  ;;  %v2414_v5 = vmul.f32 %v4784_v30, %v2394_v11 }
 0x6ba   : > { %v2401_v34 = vsel %vm254_vm3, %v2394_v11, %v2396_v53 }
 0x6bb   : > { %v2439_v59 = vrot.slane %v2409_v15, 4  ;;  %v2410_v1 = vmul.f32 %v4451_v16, %v2401_v34  ;;  %v2415_v4 = vmul.f32 %v4789_v51, %v2401_v34 }
 0x6bc   : > { %v2398_v2 = vpop.permute.xlu0 %2397 }
 0x6bd   : > { %v2400_v57 = vpop.permute.xlu1 %2399  ;;  %v2402_v9 = vsel %vm254_vm3, %v2396_v53, %v2398_v2  ;;  %2464 = vrot.lane.b32.xlu0 %v2439_v59, %s3781_s26  ;;  %v2440_v31 = vrot.slane %v2410_v1, 4  ;;  %v2444_v1 = vrot.slane %v2414_v5, 4  ;;  %v2446_v19 = vrot.slane %v2415_v4, 4 }
 0x6be   : > { %v2403_v14 = vsel %vm254_vm3, %v2398_v2, %v2400_v57  ;;  %v2411_v61 = vmul.f32 %v4459_v18, %v2402_v9  ;;  %v2413_v50 = vmul.f32 %v4703_v10, %v2400_v57  ;;  %v2416_v53 = vmul.f32 %v4795_v32, %v2402_v9 }
 0x6bf   : > { %v2412_v37 = vmul.f32 %v4462_v39, %v2403_v14  ;;  %2466 = vrot.lane.b32.xlu1 %v2440_v31, %s3781_s26  ;;  %v2417_v56 = vmul.f32 %v4798_v3, %v2403_v14  ;;  %v2445_v55 = vsel %vm1232_vm9, %v2439_v59, %v2444_v1  ;;  %v2447_v54 = vsel %vm1232_vm9, %v2440_v31, %v2446_v19 }
 0x6c0   : > { %v2441_v15 = vrot.slane %v2411_v61, 4  ;;  %v2443_v2 = vrot.slane %v2413_v50, 4  ;;  %v2448_v49 = vrot.slane %v2416_v53, 4  ;;  %v2418_v61 = vmul.f32 %v4803_v20, %v2400_v57 }
 0x6c1   : > { %v2442_v25 = vrot.slane %v2412_v37, 4  ;;  %v4881_v37 = vld [vmem:[#allocation2 + $0xb0] sm:$0x3]  ;;  %v2450_v5 = vrot.slane %v2417_v56, 4  ;;  %v2420_v53 = vmul.f32 %v2401_v34, %v4884_v13 }
 0x6c2   : > { %2468 = vrot.lane.b32.xlu0 %v2441_v15, %s3781_s26  ;;  %v2419_v50 = vmul.f32 %v2394_v11, %v4881_v37  ;;  %v2449_v4 = vsel %vm1232_vm9, %v2441_v15, %v2448_v49  ;;  %v2452_v59 = vrot.slane %v2418_v61, 4  ;;  %v2422_v11 = vmul.f32 %v2403_v14, %v4893_v47  ;;  %v4901_v15 = vld [vmem:[#allocation2 + $0xd0] sm:$0x3] }
 0x6c3   : > { %2470 = vrot.lane.b32.xlu1 %v2442_v25, %s3781_s26  ;;  %v2451_v56 = vsel %vm1232_vm9, %v2442_v25, %v2450_v5  ;;  %v2456_v27 = vrot.slane %v2420_v53, 4  ;;  %v3704_v14 = vld [vmem:[%s6570_s1 + $0x41] ss:$8 sm:$0xf] }
 0x6c4   : > { %v2454_v31 = vrot.slane %v2419_v50, 4 }
 0x6c5   : > { %v2457_v25 = vsel %vm1232_vm9, %v2446_v19, %v2456_v27  ;;  %v2540_v27 = vrot.slane %v3704_v14, %v3832_v23  ;;  %v2544_v19 = vrot.slane %v3704_v14, %v3848_v29 }
 0x6c6   : > { %2472 = vrot.lane.b32.xlu0 %v2443_v2, %s3781_s26  ;;  %v2455_v61 = vsel %vm1232_vm9, %v2444_v1, %v2454_v31 }
 0x6c7   : > { %2474 = vrot.lane.b32.xlu1 %v2445_v55, %s3781_s26  ;;  %v2421_v55 = vmul.f32 %v2402_v9, %v4888_v62  ;;  %v2460_v9 = vrot.slane %v2422_v11, 4 }
 0x6c9   : > { %v2458_v34 = vrot.slane %v2421_v55, 4  ;;  %v2461_v1 = vsel %vm1232_vm9, %v2450_v5, %v2460_v9 }
 0x6ca   : > { %2476 = vrot.lane.b32.xlu0 %v2447_v54, %s3781_s26  ;;  %v2453_v54 = vsel %vm1232_vm9, %v2443_v2, %v2452_v59 }
 0x6cb   : > { %2478 = vrot.lane.b32.xlu1 %v2449_v4, %s3781_s26  ;;  %v2423_v4 = vmul.f32 %v2400_v57, %v4901_v15  ;;  %v2459_v2 = vsel %vm1232_vm9, %v2448_v49, %v2458_v34  ;;  %v2536_v57 = vrot.slane %v3704_v14, %v3834_v24  ;;  %v2548_v49 = vrot.slane %v3704_v14, %v3846_v28 }
 0x6cd   : > { %v2462_v50 = vrot.slane %v2423_v4, 4 }
 0x6ce   : > { %2480 = vrot.lane.b32.xlu0 %v2451_v56, %s3781_s26 }
 0x6cf   : > { %2482 = vrot.lane.b32.xlu1 %v2453_v54, %s3781_s26  ;;  %v2463_v53 = vsel %vm1232_vm9, %v2452_v59, %v2462_v50 }
 0x6d2   : > { %2484 = vrot.lane.b32.xlu0 %v2455_v61, %s3781_s26 }
 0x6d3   : > { %2486 = vrot.lane.b32.xlu1 %v2457_v25, %s3781_s26 }
 0x6d6   : > { %2488 = vrot.lane.b32.xlu0 %v2459_v2, %s3781_s26 }
 0x6d7   : > { %2490 = vrot.lane.b32.xlu1 %v2461_v1, %s3781_s26 }
 0x6da   : > { %2492 = vrot.lane.b32.xlu0 %v2463_v53, %s3781_s26 }
 0x6db   : > { %2549 = vrot.lane.b32.xlu1 %v2536_v57, %s3779_s18 }
 0x6de   : > { %2551 = vrot.lane.b32.xlu0 %v2540_v27, %s3779_s18 }
 0x6df   : > { %2553 = vrot.lane.b32.xlu1 %v2544_v19, %s3779_s18 }
 0x6e2   : > { %2555 = vrot.lane.b32.xlu0 %v2548_v49, %s3779_s18 }
 0x72f   : > { %v4926_v5 = vpop.permute.xlu0 %2464 }
 0x730   : > { %6913 = vst [vmem:[#allocation168_spill] sm:$0xff] %v4926_v5 }
 0x731   : > { %v4928_v55 = vpop.permute.xlu1 %2466 }
 0x734   : > { %v4930_v59 = vpop.permute.xlu0 %2468 }
 0x735   : > { %6914 = vst [vmem:[#allocation169_spill] sm:$0xff] %v4930_v59  ;;  %v4932_v56 = vpop.permute.xlu1 %2470 }
 0x736   : > { %6915 = vst [vmem:[#allocation170_spill] sm:$0xff] %v4932_v56 }
 0x738   : > { %v4934_v31 = vpop.permute.xlu0 %2472 }
 0x739   : > { %6916 = vst [vmem:[#allocation171_spill] sm:$0xff] %v4934_v31  ;;  %v4936_v11 = vpop.permute.xlu1 %2474 }
 0x73a   : > { %6917 = vst [vmem:[#allocation172_spill] sm:$0xff] %v4936_v11 }
 0x73c   : > { %v4938_v54 = vpop.permute.xlu0 %2476 }
 0x73d   : > { %6918 = vst [vmem:[#allocation173_spill] sm:$0xff] %v4938_v54  ;;  %v4940_v34 = vpop.permute.xlu1 %2478 }
 0x73e   : > { %6919 = vst [vmem:[#allocation174_spill] sm:$0xff] %v4940_v34 }
 0x740   : > { %v4942_v61 = vpop.permute.xlu0 %2480 }
 0x741   : > { %6920 = vst [vmem:[#allocation175_spill] sm:$0xff] %v4942_v61  ;;  %v4944_v4 = vpop.permute.xlu1 %2482 }
 0x742   : > { %6921 = vst [vmem:[#allocation176_spill] sm:$0xff] %v4944_v4 }
 0x744   : > { %v4946_v9 = vpop.permute.xlu0 %2484 }
 0x745   : > { %6922 = vst [vmem:[#allocation177_spill] sm:$0xff] %v4946_v9  ;;  %v4948_v25 = vpop.permute.xlu1 %2486 }
 0x746   : > { %6923 = vst [vmem:[#allocation178_spill] sm:$0xff] %v4948_v25 }
 0x748   : > { %v4950_v14 = vpop.permute.xlu0 %2488 }
 0x749   : > { %6924 = vst [vmem:[#allocation179_spill] sm:$0xff] %v4950_v14  ;;  %v4952_v2 = vpop.permute.xlu1 %2490 }
 0x74a   : > { %6925 = vst [vmem:[#allocation180_spill] sm:$0xff] %v4952_v2 }
 0x74c   : > { %v4954_v50 = vpop.permute.xlu0 %2492 }
 0x74d   : > { %6926 = vst [vmem:[#allocation181_spill] sm:$0xff] %v4954_v50  ;;  %v2550_v1 = vpop.permute.xlu1 %2549 }
 0x74e   : > { %v2565_v57 = vmul.f32 %v4545_v26, %v2550_v1  ;;  %v2570_v59 = vmul.f32 %v4784_v30, %v2550_v1 }
 0x750   : > { %v2552_v53 = vpop.permute.xlu0 %2551  ;;  %v2595_v27 = vrot.slane %v2565_v57, 5 }
 0x751   : > { %v2554_v19 = vpop.permute.xlu1 %2553  ;;  %v2557_v49 = vsel %vm254_vm3, %v2550_v1, %v2552_v53 }
 0x752   : > { %v2558_v4 = vsel %vm254_vm3, %v2552_v53, %v2554_v19  ;;  %v2566_v61 = vmul.f32 %v4451_v16, %v2557_v49  ;;  %2620 = vrot.lane.b32.xlu1 %v2595_v27, %s3781_s26  ;;  %v2571_v57 = vmul.f32 %v4789_v51, %v2557_v49 }
 0x753   : > { %v2567_v34 = vmul.f32 %v4459_v18, %v2558_v4  ;;  %v2572_v18 = vmul.f32 %v4795_v32, %v2558_v4  ;;  %v2575_v32 = vmul.f32 %v2550_v1, %v4881_v37 }
 0x754   : > { %v2596_v11 = vrot.slane %v2566_v61, 5  ;;  %v2556_v54 = vpop.permute.xlu0 %2555  ;;  %v2600_v61 = vrot.slane %v2570_v59, 5  ;;  %v2576_v59 = vmul.f32 %v2557_v49, %v4884_v13 }
 0x755   : > { %v2597_v31 = vrot.slane %v2567_v34, 5  ;;  %v2559_v56 = vsel %vm254_vm3, %v2554_v19, %v2556_v54  ;;  %v2569_v50 = vmul.f32 %v4703_v10, %v2556_v54  ;;  %v2602_v34 = vrot.slane %v2571_v57, 5 }
 0x756   : > { %2622 = vrot.lane.b32.xlu0 %v2596_v11, %s3781_s26  ;;  %v2568_v53 = vmul.f32 %v4462_v39, %v2559_v56  ;;  %v2573_v30 = vmul.f32 %v4798_v3, %v2559_v56  ;;  %v2604_v51 = vrot.slane %v2572_v18, 5  ;;  %v2601_v19 = vsel %vm1389_vm10, %v2595_v27, %v2600_v61 }
 0x757   : > { %2624 = vrot.lane.b32.xlu1 %v2597_v31, %s3781_s26  ;;  %v2599_v16 = vrot.slane %v2569_v50, 5  ;;  %v2574_v14 = vmul.f32 %v4803_v20, %v2556_v54  ;;  %v2603_v39 = vsel %vm1389_vm10, %v2596_v11, %v2602_v34  ;;  %v2610_v27 = vrot.slane %v2575_v32, 5 }
 0x758   : > { %v2598_v2 = vrot.slane %v2568_v53, 5  ;;  %v2606_v50 = vrot.slane %v2573_v30, 5  ;;  %v2605_v3 = vsel %vm1389_vm10, %v2597_v31, %v2604_v51  ;;  %v2577_v53 = vmul.f32 %v2558_v4, %v4888_v62 }
 0x759   : > { %v2608_v57 = vrot.slane %v2574_v14, 5  ;;  %v2612_v11 = vrot.slane %v2576_v59, 5  ;;  %v2578_v37 = vmul.f32 %v2559_v56, %v4893_v47  ;;  %v2611_v13 = vsel %vm1389_vm10, %v2600_v61, %v2610_v27  ;;  %v3705_v47 = vld [vmem:[%s6570_s1 + $0x42] ss:$8 sm:$0xf] }
 0x75a   : > { %2626 = vrot.lane.b32.xlu0 %v2598_v2, %s3781_s26  ;;  %v2607_v20 = vsel %vm1389_vm10, %v2598_v2, %v2606_v50  ;;  %v2614_v1 = vrot.slane %v2577_v53, 5  ;;  %v2579_v31 = vmul.f32 %v2556_v54, %v4901_v15  ;;  %v2694_v54 = vrot.slane %v3705_v47, %v3834_v24 }
 0x75b   : > { %2628 = vrot.lane.b32.xlu1 %v2599_v16, %s3781_s26  ;;  %v2609_v18 = vsel %vm1389_vm10, %v2599_v16, %v2608_v57  ;;  %v2613_v62 = vsel %vm1389_vm10, %v2602_v34, %v2612_v11  ;;  %v2616_v4 = vrot.slane %v2578_v37, 5  ;;  %v2698_v49 = vrot.slane %v3705_v47, %v3832_v23  ;;  %v5040_v37 = vld [vmem:[#allocation2 + $0x8] sm:$0xf0] }
 0x75c   : > { %v2615_v14 = vsel %vm1389_vm10, %v2604_v51, %v2614_v1  ;;  %v2618_v2 = vrot.slane %v2579_v31, 5  ;;  %v2702_v16 = vrot.slane %v3705_v47, %v3848_v29  ;;  %v2706_v61 = vrot.slane %v3705_v47, %v3846_v28 }
 0x75d   : > { %v2617_v56 = vsel %vm1389_vm10, %v2606_v50, %v2616_v4 }
 0x75e   : > { %2630 = vrot.lane.b32.xlu0 %v2601_v19, %s3781_s26  ;;  %v2619_v15 = vsel %vm1389_vm10, %v2608_v57, %v2618_v2 }
 0x75f   : > { %2632 = vrot.lane.b32.xlu1 %v2603_v39, %s3781_s26 }
 0x762   : > { %2634 = vrot.lane.b32.xlu0 %v2605_v3, %s3781_s26 }
 0x763   : > { %2636 = vrot.lane.b32.xlu1 %v2607_v20, %s3781_s26 }
 0x766   : > { %2638 = vrot.lane.b32.xlu0 %v2609_v18, %s3781_s26 }
 0x767   : > { %2640 = vrot.lane.b32.xlu1 %v2611_v13, %s3781_s26 }
 0x76a   : > { %2642 = vrot.lane.b32.xlu0 %v2613_v62, %s3781_s26  ;;  %v5043_v62 = vld [vmem:[#allocation2 + $0x10] sm:$0xf0] }
 0x76b   : > { %2644 = vrot.lane.b32.xlu1 %v2615_v14, %s3781_s26  ;;  %6942 = vst [vmem:[#allocation197_spill] sm:$0xff] %v5043_v62 }
 0x76e   : > { %2646 = vrot.lane.b32.xlu0 %v2617_v56, %s3781_s26  ;;  %v5047_v56 = vld [vmem:[#allocation2 + $0x18] sm:$0xf0] }
 0x76f   : > { %2648 = vrot.lane.b32.xlu1 %v2619_v15, %s3781_s26  ;;  %6943 = vst [vmem:[#allocation198_spill] sm:$0xff] %v5047_v56 }
 0x772   : > { %2707 = vrot.lane.b32.xlu0 %v2694_v54, %s3780_s23 }
 0x773   : > { %2709 = vrot.lane.b32.xlu1 %v2698_v49, %s3780_s23 }
 0x776   : > { %2711 = vrot.lane.b32.xlu0 %v2702_v16, %s3780_s23  ;;  %v5051_v16 = vld [vmem:[#allocation2 + $0x20] sm:$0xf0] }
 0x777   : > { %2713 = vrot.lane.b32.xlu1 %v2706_v61, %s3780_s23  ;;  %6944 = vst [vmem:[#allocation199_spill] sm:$0xff] %v5051_v16 }
 0x7c4   : > { %v5010_v34 = vpop.permute.xlu1 %2620 }
 0x7c5   : > { %6927 = vst [vmem:[#allocation182_spill] sm:$0xff] %v5010_v34  ;;  %v5086_v34 = vld [vmem:[#allocation2 + $0x88] sm:$0x3f] }
 0x7c8   : > { %v5012_v30 = vpop.permute.xlu0 %2622 }
 0x7c9   : > { %6928 = vst [vmem:[#allocation183_spill] sm:$0xff] %v5012_v30  ;;  %v5014_v51 = vpop.permute.xlu1 %2624 }
 0x7ca   : > { %6929 = vst [vmem:[#allocation184_spill] sm:$0xff] %v5014_v51 }
 0x7cc   : > { %v5016_v19 = vpop.permute.xlu0 %2626 }
 0x7cd   : > { %6930 = vst [vmem:[#allocation185_spill] sm:$0xff] %v5016_v19  ;;  %v5018_v39 = vpop.permute.xlu1 %2628  ;;  %v5064_v19 = vld [vmem:[#allocation2 + $0x50] sm:$0xff] }
 0x7ce   : > { %6931 = vst [vmem:[#allocation186_spill] sm:$0xff] %v5018_v39  ;;  %v5061_v39 = vld [vmem:[#allocation2 + $0x48] sm:$0xff] }
 0x7cf   : > { %6946 = vst [vmem:[#allocation201_spill] sm:$0xff] %v5061_v39 }
 0x7d0   : > { %v5020_v50 = vpop.permute.xlu0 %2630 }
 0x7d1   : > { %6932 = vst [vmem:[#allocation187_spill] sm:$0xff] %v5020_v50  ;;  %v5022_v32 = vpop.permute.xlu1 %2632 }
 0x7d2   : > { %6933 = vst [vmem:[#allocation188_spill] sm:$0xff] %v5022_v32 }
 0x7d4   : > { %v5024_v59 = vpop.permute.xlu0 %2634 }
 0x7d5   : > { %6934 = vst [vmem:[#allocation189_spill] sm:$0xff] %v5024_v59  ;;  %v5026_v3 = vpop.permute.xlu1 %2636  ;;  %v5058_v59 = vld [vmem:[#allocation2 + $0x28] sm:$0xf0] }
 0x7d6   : > { %6935 = vst [vmem:[#allocation190_spill] sm:$0xff] %v5026_v3  ;;  %6945 = vst [vmem:[#allocation200_spill] sm:$0xff] %v5058_v59 }
 0x7d8   : > { %v5028_v57 = vpop.permute.xlu0 %2638 }
 0x7d9   : > { %6936 = vst [vmem:[#allocation191_spill] sm:$0xff] %v5028_v57  ;;  %v5030_v53 = vpop.permute.xlu1 %2640 }
 0x7da   : > { %6937 = vst [vmem:[#allocation192_spill] sm:$0xff] %v5030_v53 }
 0x7dc   : > { %v5032_v20 = vpop.permute.xlu0 %2642 }
 0x7dd   : > { %6938 = vst [vmem:[#allocation193_spill] sm:$0xff] %v5032_v20  ;;  %v5034_v27 = vpop.permute.xlu1 %2644  ;;  %v5076_v20 = vld [vmem:[#allocation2 + $0x78] sm:$0x3f] }
 0x7de   : > { %6939 = vst [vmem:[#allocation194_spill] sm:$0xff] %v5034_v27 }
 0x7e0   : > { %v5036_v11 = vpop.permute.xlu0 %2646 }
 0x7e1   : > { %6940 = vst [vmem:[#allocation195_spill] sm:$0xff] %v5036_v11  ;;  %v5038_v18 = vpop.permute.xlu1 %2648 }
 0x7e2   : > { %6941 = vst [vmem:[#allocation196_spill] sm:$0xff] %v5038_v18  ;;  %v5069_v18 = vld [vmem:[#allocation2 + $0x58] sm:$0xff] }
 0x7e4   : > { %v2708_v1 = vpop.permute.xlu0 %2707 }
 0x7e5   : > { %v2710_v13 = vpop.permute.xlu1 %2709  ;;  %v2723_v31 = vmul.f32 %v2708_v1, %v5040_v37  ;;  %v2728_v3 = vmul.f32 %v4545_v26, %v2708_v1  ;;  %v2733_v25 = vmul.f32 %v2708_v1, %v5076_v20 }
 0x7e6   : > { %v2715_v4 = vsel %vm177_vm1, %v2708_v1, %v2710_v13 }
 0x7e7   : > { %v2753_v14 = vrot.slane %v2723_v31, 7  ;;  %v2724_v2 = vmul.f32 %v2715_v4, %v5043_v62  ;;  %v2758_v26 = vrot.slane %v2728_v3, 7  ;;  %v5078_v3 = vld [vmem:[#allocation2 + $0x80] sm:$0x3f] }
 0x7e8   : > { %v2712_v47 = vpop.permute.xlu0 %2711 }
 0x7e9   : > { %v2714_v15 = vpop.permute.xlu1 %2713  ;;  %v2716_v54 = vsel %vm177_vm1, %v2710_v13, %v2712_v47  ;;  %2778 = vrot.lane.b32.xlu0 %v2753_v14, %s3780_s23  ;;  %v2754_v49 = vrot.slane %v2724_v2, 7  ;;  %v2729_v2 = vmul.f32 %v5061_v39, %v2715_v4  ;;  %v2759_v27 = vsel %vm831_vm12, %v2753_v14, %v2758_v26 }
 0x7ea   : > { %v2717_v61 = vsel %vm177_vm1, %v2712_v47, %v2714_v15  ;;  %v2725_v57 = vmul.f32 %v2716_v54, %v5047_v56  ;;  %v2727_v13 = vmul.f32 %v2714_v15, %v5058_v59  ;;  %v2730_v47 = vmul.f32 %v5064_v19, %v2716_v54 }
 0x7eb   : > { %v2726_v31 = vmul.f32 %v2717_v61, %v5051_v16  ;;  %2780 = vrot.lane.b32.xlu1 %v2754_v49, %s3780_s23  ;;  %v2760_v11 = vrot.slane %v2729_v2, 7  ;;  %v2732_v53 = vmul.f32 %v4703_v10, %v2714_v15  ;;  %v2735_v30 = vmul.f32 %v2716_v54, %v5086_v34 }
 0x7ec   : > { %v2755_v50 = vrot.slane %v2725_v57, 7  ;;  %v2757_v51 = vrot.slane %v2727_v13, 7  ;;  %v2731_v57 = vmul.f32 %v5069_v18, %v2717_v61 }
 0x7ed   : > { %v2756_v32 = vrot.slane %v2726_v31, 7  ;;  %v2762_v31 = vrot.slane %v2730_v47, 7  ;;  %v2761_v13 = vsel %vm831_vm12, %v2754_v49, %v2760_v11  ;;  %v2766_v14 = vrot.slane %v2732_v53, 7 }
 0x7ee   : > { %2782 = vrot.lane.b32.xlu0 %v2755_v50, %s3780_s23  ;;  %v2764_v9 = vrot.slane %v2731_v57, 7  ;;  %v2734_v47 = vmul.f32 %v2715_v4, %v5078_v3  ;;  %v2768_v49 = vrot.slane %v2733_v25, 7  ;;  %v5096_v4 = vld [vmem:[#allocation2 + $0x98] sm:$0x3f] }
 0x7ef   : > { %2784 = vrot.lane.b32.xlu1 %v2756_v32, %s3780_s23  ;;  %v2763_v2 = vsel %vm831_vm12, %v2755_v50, %v2762_v31  ;;  %v2767_v50 = vsel %vm831_vm12, %v2757_v51, %v2766_v14  ;;  %6947 = vst [vmem:[#allocation202_spill] sm:$0xff] %v5096_v4  ;;  %v2737_v5 = vmul.f32 %v2714_v15, %v5096_v4 }
 0x7f0   : > { %v2765_v57 = vsel %vm831_vm12, %v2756_v32, %v2764_v9  ;;  %v2770_v53 = vrot.slane %v2734_v47, 7 }
 0x7f2   : > { %2786 = vrot.lane.b32.xlu0 %v2757_v51, %s3780_s23  ;;  %v2771_v25 = vsel %vm831_vm12, %v2760_v11, %v2770_v53  ;;  %v3706_v51 = vld [vmem:[%s6570_s1 + $0x43] ss:$8 sm:$0xf] }
 0x7f3   : > { %2788 = vrot.lane.b32.xlu1 %v2759_v27, %s3780_s23  ;;  %v5088_v27 = vld [vmem:[#allocation2 + $0x90] sm:$0x3f]  ;;  %v2850_v15 = vrot.slane %v3706_v51, %v3834_v24  ;;  %v2854_v11 = vrot.slane %v3706_v51, %v3832_v23  ;;  %v2858_v47 = vrot.slane %v3706_v51, %v3848_v29 }
 0x7f4   : > { %v2736_v1 = vmul.f32 %v2717_v61, %v5088_v27  ;;  %v2776_v61 = vrot.slane %v2737_v5, 7  ;;  %v2862_v5 = vrot.slane %v3706_v51, %v3846_v28 }
 0x7f6   : > { %2790 = vrot.lane.b32.xlu0 %v2761_v13, %s3780_s23  ;;  %v2772_v13 = vrot.slane %v2735_v30, 7  ;;  %v2774_v54 = vrot.slane %v2736_v1, 7 }
 0x7f7   : > { %2792 = vrot.lane.b32.xlu1 %v2763_v2, %s3780_s23  ;;  %v2769_v2 = vsel %vm831_vm12, %v2758_v26, %v2768_v49  ;;  %v2777_v26 = vsel %vm831_vm12, %v2766_v14, %v2776_v61 }
 0x7f8   : > { %v2773_v32 = vsel %vm831_vm12, %v2762_v31, %v2772_v13  ;;  %v2775_v30 = vsel %vm831_vm12, %v2764_v9, %v2774_v54 }
 0x7fa   : > { %2794 = vrot.lane.b32.xlu0 %v2765_v57, %s3780_s23 }
 0x7fb   : > { %2796 = vrot.lane.b32.xlu1 %v2767_v50, %s3780_s23 }
 0x7fe   : > { %2798 = vrot.lane.b32.xlu0 %v2769_v2, %s3780_s23 }
 0x7ff   : > { %2800 = vrot.lane.b32.xlu1 %v2771_v25, %s3780_s23 }
 0x802   : > { %2802 = vrot.lane.b32.xlu0 %v2773_v32, %s3780_s23 }
 0x803   : > { %2804 = vrot.lane.b32.xlu1 %v2775_v30, %s3780_s23 }
 0x806   : > { %2806 = vrot.lane.b32.xlu0 %v2777_v26, %s3780_s23 }
 0x807   : > { %2863 = vrot.lane.b32.xlu1 %v2850_v15, %s3780_s23 }
 0x80a   : > { %2865 = vrot.lane.b32.xlu0 %v2854_v11, %s3780_s23 }
 0x80b   : > { %2867 = vrot.lane.b32.xlu1 %v2858_v47, %s3780_s23 }
 0x80e   : > { %2869 = vrot.lane.b32.xlu0 %v2862_v5, %s3780_s23 }
 0x85b   : > { %v5120_v9 = vpop.permute.xlu0 %2778 }
 0x85c   : > { %6948 = vst [vmem:[#allocation203_spill] sm:$0xff] %v5120_v9  ;;  %v3750_v9 = vld [vmem:[#allocation2 + $0x80] sm:$0x1f] }
 0x85d   : > { %v5122_v31 = vpop.permute.xlu1 %2780 }
 0x860   : > { %v5124_v14 = vpop.permute.xlu0 %2782 }
 0x861   : > { %6949 = vst [vmem:[#allocation204_spill] sm:$0xff] %v5124_v14  ;;  %v5126_v57 = vpop.permute.xlu1 %2784 }
 0x862   : > { %6950 = vst [vmem:[#allocation205_spill] sm:$0xff] %v5126_v57 }
 0x864   : > { %v5128_v49 = vpop.permute.xlu0 %2786 }
 0x865   : > { %6951 = vst [vmem:[#allocation206_spill] sm:$0xff] %v5128_v49  ;;  %v5130_v1 = vpop.permute.xlu1 %2788 }
 0x866   : > { %6952 = vst [vmem:[#allocation207_spill] sm:$0xff] %v5130_v1 }
 0x868   : > { %v5132_v50 = vpop.permute.xlu0 %2790 }
 0x869   : > { %6953 = vst [vmem:[#allocation208_spill] sm:$0xff] %v5132_v50  ;;  %v5134_v53 = vpop.permute.xlu1 %2792 }
 0x86a   : > { %6954 = vst [vmem:[#allocation209_spill] sm:$0xff] %v5134_v53 }
 0x86c   : > { %v5136_v13 = vpop.permute.xlu0 %2794 }
 0x86d   : > { %6955 = vst [vmem:[#allocation210_spill] sm:$0xff] %v5136_v13  ;;  %v5138_v2 = vpop.permute.xlu1 %2796 }
 0x86e   : > { %6956 = vst [vmem:[#allocation211_spill] sm:$0xff] %v5138_v2 }
 0x870   : > { %v5140_v54 = vpop.permute.xlu0 %2798 }
 0x871   : > { %6957 = vst [vmem:[#allocation212_spill] sm:$0xff] %v5140_v54  ;;  %v5142_v25 = vpop.permute.xlu1 %2800  ;;  %v3749_v54 = vld [vmem:[#allocation2 + $0x78] sm:$0x1f] }
 0x872   : > { %6958 = vst [vmem:[#allocation213_spill] sm:$0xff] %v5142_v25 }
 0x874   : > { %v5144_v51 = vpop.permute.xlu0 %2802 }
 0x875   : > { %6959 = vst [vmem:[#allocation214_spill] sm:$0xff] %v5144_v51  ;;  %v2805_v32 = vpop.permute.xlu1 %2804 }
 0x876   : > { %v5148_v61 = vsel %vm177_vm1, %v5144_v51, %v2805_v32 }
 0x877   : > { %6960 = vst [vmem:[#allocation215_spill] sm:$0xff] %v5148_v61 }
 0x878   : > { %v2807_v30 = vpop.permute.xlu0 %2806 }
 0x879   : > { %v2864_v15 = vpop.permute.xlu1 %2863  ;;  %v5151_v26 = vsel %vm177_vm1, %v2805_v32, %v2807_v30 }
 0x87a   : > { %6961 = vst [vmem:[#allocation216_spill] sm:$0xff] %v5151_v26  ;;  %v2879_v11 = vmul.f32 %v2864_v15, %v5040_v37 }
 0x87c   : > { %2909 = vrot.lane.b32.xlu1 %v2879_v11, %s3780_s23  ;;  %v2866_v47 = vpop.permute.xlu0 %2865 }
 0x87d   : > { %v2868_v5 = vpop.permute.xlu1 %2867  ;;  %v2871_v2 = vsel %vm177_vm1, %v2864_v15, %v2866_v47 }
 0x87e   : > { %v2872_v13 = vsel %vm177_vm1, %v2866_v47, %v2868_v5  ;;  %v2880_v53 = vmul.f32 %v2871_v2, %v5043_v62  ;;  %v5166_v47 = vld [vmem:[#allocation2 + $0x40] sm:$0xff]  ;;  %v2885_v57 = vmul.f32 %v5061_v39, %v2871_v2 }
 0x87f   : > { %v2881_v1 = vmul.f32 %v2872_v13, %v5047_v56  ;;  %v2884_v49 = vmul.f32 %v5166_v47, %v2864_v15 }
 0x880   : > { %2911 = vrot.lane.b32.xlu0 %v2880_v53, %s3780_s23  ;;  %v2870_v50 = vpop.permute.xlu0 %2869 }
 0x881   : > { %2913 = vrot.lane.b32.xlu1 %v2881_v1, %s3780_s23  ;;  %v2873_v32 = vsel %vm177_vm1, %v2868_v5, %v2870_v50  ;;  %v2883_v30 = vmul.f32 %v2870_v50, %v5058_v59  ;;  %v2886_v1 = vmul.f32 %v5064_v19, %v2872_v13  ;;  %v2888_v5 = vmul.f32 %v4703_v10, %v2870_v50 }
 0x882   : > { %v2882_v11 = vmul.f32 %v2873_v32, %v5051_v16  ;;  %v2887_v53 = vmul.f32 %v5069_v18, %v2873_v32  ;;  %v2892_v10 = vmul.f32 %v2873_v32, %v5088_v27 }
 0x884   : > { %2915 = vrot.lane.b32.xlu0 %v2882_v11, %s3780_s23  ;;  %v3707_v11 = vld [vmem:[%s6570_s1 + $0x44] ss:$8 sm:$0xf] }
 0x885   : > { %2917 = vrot.lane.b32.xlu1 %v2883_v30, %s3780_s23  ;;  %v2889_v30 = vmul.f32 %v2864_v15, %v5076_v20  ;;  %v2893_v15 = vmul.f32 %v2870_v50, %v5096_v4  ;;  %v333_v50 = vld [vmem:[%s6570_s1] ss:$8 sm:$0xf] }
 0x886   : > { %v5203_v32 = vrot.slane %v333_v50, %v3834_v24  ;;  %v5261_v4 = vrot.slane %v333_v50, %v3846_v28 }
 0x888   : > { %2919 = vrot.lane.b32.xlu0 %v2884_v49, %s3780_s23  ;;  %v2890_v49 = vmul.f32 %v2871_v2, %v5078_v3  ;;  %v2989_v2 = vrot.slane %v3707_v11, %v3848_v29  ;;  %6962 = vst [vmem:[#allocation217_spill] sm:$0xff] %v5203_v32  ;;  %6968 = vst [vmem:[#allocation223_spill] sm:$0xff] %v5261_v4 }
 0x889   : > { %2921 = vrot.lane.b32.xlu1 %v2885_v57, %s3780_s23  ;;  %v2891_v57 = vmul.f32 %v2872_v13, %v5086_v34  ;;  %v2985_v13 = vrot.slane %v3707_v11, %v3832_v23 }
 0x88c   : > { %2923 = vrot.lane.b32.xlu0 %v2886_v1, %s3780_s23  ;;  %v2981_v1 = vrot.slane %v3707_v11, %v3834_v24 }
 0x88d   : > { %2925 = vrot.lane.b32.xlu1 %v2887_v53, %s3780_s23  ;;  %v2993_v53 = vrot.slane %v3707_v11, %v3846_v28  ;;  %v3691_v11 = vld [vmem:[%s6570_s1 + $0x4] ss:$8 sm:$0xf] }
 0x88e   : > { %v5264_v59 = vrot.slane %v3691_v11, %v3848_v29 }
 0x890   : > { %2927 = vrot.lane.b32.xlu0 %v2888_v5, %s3780_s23  ;;  %v299_v5 = vld [vmem:[%s6571_s2] sm:$0xf] }
 0x891   : > { %2929 = vrot.lane.b32.xlu1 %v2889_v30, %s3780_s23  ;;  %v5209_v30 = vrot.slane %v299_v5, %v3834_v24 }
 0x893   : > { %6963 = vst [vmem:[#allocation218_spill] sm:$0xff] %v5209_v30 }
 0x894   : > { %2931 = vrot.lane.b32.xlu0 %v2890_v49, %s3780_s23  ;;  %v3747_v49 = vld [vmem:[#allocation2] sm:$0xe0] }
 0x895   : > { %2933 = vrot.lane.b32.xlu1 %v2891_v57, %s3780_s23  ;;  %v355_v57 = vmul.f32 %v3747_v49, %v5203_v32  ;;  %v740_v49 = vsel %vm254_vm3, %v4020_v40, %v4030_v45  ;;  %v3692_v40 = vld [vmem:[%s6570_s1 + $0x5] ss:$8 sm:$0xf]  ;;  %v5258_v45 = vrot.slane %v299_v5, %v3846_v28 }
 0x896   : > { %v5272_v62 = vrot.slane %v3692_v40, %v3834_v24  ;;  %v5293_v61 = vrot.slane %v3692_v40, %v3848_v29 }
 0x898   : > { %2935 = vrot.lane.b32.xlu0 %v2892_v10, %s3780_s23  ;;  %v367_v10 = vadd.f32 %v355_v57, %v5209_v30 }
 0x899   : > { %2937 = vrot.lane.b32.xlu1 %v2893_v15, %s3780_s23  ;;  %v478_v15 = vsel %vm477_vm8, %v4006_v33, %v4022_v41  ;;  %v5236_v41 = vrot.slane %v299_v5, %v3832_v23 }
 0x89c   : > { %2994 = vrot.lane.b32.xlu0 %v2981_v1, %s3780_s23  ;;  %v790_v1 = vrot.slane %v3691_v11, %v3834_v24 }
 0x89d   : > { %2996 = vrot.lane.b32.xlu1 %v2985_v13, %s3780_s23  ;;  %v609_v13 = vsel %vm177_vm1, %v4012_v36, %v4028_v44  ;;  %v5239_v36 = vrot.slane %v333_v50, %v3832_v23  ;;  %v5242_v44 = vrot.slane %v3691_v11, %v3832_v23 }
 0x89e   : > { %v5230_v14 = vmul.f32 %v790_v1, %v5040_v37 }
 0x89f   : > { %6965 = vst [vmem:[#allocation220_spill] sm:$0xff] %v5239_v36  ;;  %6966 = vst [vmem:[#allocation221_spill] sm:$0xff] %v5242_v44  ;;  %v5281_v26 = vmul.f32 %v5061_v39, %v5242_v44  ;;  %v5299_v39 = vmul.f32 %v790_v1, %v5076_v20  ;;  %v364_v25 = vmul.f32 %v3749_v54, %v5239_v36  ;;  %v3751_v54 = vld [vmem:[#allocation2 + $0x88] sm:$0x1f] }
 0x8a0   : > { %2998 = vrot.lane.b32.xlu0 %v2989_v2, %s3780_s23  ;;  %v3693_v2 = vld [vmem:[%s6570_s1 + $0x6] ss:$8 sm:$0xf]  ;;  %6964 = vst [vmem:[#allocation219_spill] sm:$0xff] %v5230_v14  ;;  %v6711_v56 = vrot.slane %v5230_v14, 7  ;;  %v366_v36 = vmul.f32 %v3751_v54, %v5261_v4  ;;  %v617_v54 = vsel %vm177_vm1, %v4016_v38, %v4032_v46 }
 0x8a1   : > { %3000 = vrot.lane.b32.xlu1 %v2993_v53, %s3780_s23  ;;  %v502_v53 = vadd.f32 %v478_v15, %v367_v10  ;;  %v5233_v33 = vrot.slane %v3693_v2, %v3834_v24  ;;  %v5248_v15 = vrot.slane %v299_v5, %v3848_v29  ;;  %v5296_v51 = vrot.slane %v3693_v2, %v3848_v29 }
 0x8a2   : > { %v5304_v14 = vrot.slane %v3693_v2, %v3846_v28  ;;  %v844_v4 = vrot.slane %v5299_v39, 7  ;;  %v378_v38 = vadd.f32 %v366_v36, %v5258_v45 }
 0x8a3   : > { %v633_v57 = vadd.f32 %v609_v13, %v502_v53  ;;  %v5251_v13 = vrot.slane %v333_v50, %v3848_v29  ;;  %v5255_v53 = vmul.f32 %v5166_v47, %v5233_v33  ;;  %v946_v5 = vmul.f32 %v5233_v33, %v5040_v37 }
 0x8a4   : > { %v5277_v50 = vrot.slane %v3692_v40, %v3846_v28  ;;  %v486_v29 = vsel %vm477_vm8, %v4010_v35, %v4026_v43 }
 0x8a5   : > { %v764_v10 = vadd.f32 %v740_v49, %v633_v57  ;;  %6967 = vst [vmem:[#allocation222_spill] sm:$0xff] %v5251_v13  ;;  %v5267_v49 = vrot.slane %v3691_v11, %v3846_v28  ;;  %v3748_v57 = vld [vmem:[#allocation2 + $0x70] sm:$0x1f]  ;;  %v5284_v11 = vrot.slane %v3692_v40, %v3832_v23  ;;  %v816_v40 = vmul.f32 %v5242_v44, %v5078_v3 }
 0x8a6   : > { %v363_v16 = vmul.f32 %v3748_v57, %v5203_v32  ;;  %v5287_v57 = vrot.slane %v3693_v2, %v3832_v23  ;;  %v365_v23 = vmul.f32 %v3750_v9, %v5251_v13  ;;  %v971_v24 = vrot.slane %v946_v5, 1 }
 0x8a7   : > { %v864_v32 = vadd.f32 %v6711_v56, %v764_v10  ;;  %v899_v56 = vmul.f32 %v5272_v62, %v5040_v37  ;;  %v5317_v9 = vmul.f32 %v5064_v19, %v5264_v59  ;;  %v5321_v2 = vmul.f32 %v5166_v47, %v790_v1 }
 0x8a8   : > { %v375_v10 = vadd.f32 %v363_v16, %v5209_v30  ;;  %v5325_v44 = vmul.f32 %v5069_v18, %v5267_v49  ;;  %v6969_v30 = vrot.slane %v5255_v53, 1  ;;  %v376_v16 = vadd.f32 %v364_v25, %v5236_v41 }
 0x8a9   : > { %v911_v5 = vadd.f32 %v899_v56, %v864_v32  ;;  %v377_v1 = vadd.f32 %v365_v23, %v5248_v15  ;;  %v487_v28 = vsel %vm477_vm8, %v4026_v43, %v4048_v58  ;;  %v817_v56 = vmul.f32 %v5264_v59, %v5086_v34 }
 0x8aa   : > { %v973_v35 = vsel %vm970_vm13, %v971_v24, %v6969_v30  ;;  %v510_v13 = vadd.f32 %v486_v29, %v375_v10  ;;  %v846_v32 = vrot.slane %v816_v40, 7  ;;  %v488_v24 = vsel %vm477_vm8, %v4048_v58, %v4042_v52 }
 0x8ab   : > { %v818_v39 = vmul.f32 %v5267_v49, %v5088_v27  ;;  %v1131_v23 = vsel %vm477_vm8, %v4152_v17, %v4156_v22  ;;  %v489_v43 = vsel %vm477_vm8, %v4042_v52, %v4052_v60  ;;  %v618_v25 = vsel %vm177_vm1, %v4032_v46, %v4058_v63  ;;  %v6970_v52 = vld [vmem:[#allocation21_spill] sm:$0xff]  ;;  %v6971_v46 = vld [vmem:[#allocation28_spill] sm:$0xff] }
 0x8ac   : > { %v641_v29 = vadd.f32 %v617_v54, %v510_v13  ;;  %v1003_v30 = vadd.f32 %v973_v35, %v911_v5  ;;  %v748_v58 = vsel %vm254_vm3, %v4024_v42, %v4034_v48  ;;  %v511_v36 = vadd.f32 %v487_v28, %v376_v16  ;;  %v6972_v16 = vld [vmem:[#allocation25_spill] sm:$0xff]  ;;  %v6973_v35 = vld [vmem:[#allocation66_spill] sm:$0xff] }
 0x8ad   : > { %v619_v10 = vsel %vm177_vm1, %v4058_v63, %v4060_v0  ;;  %v1288_v17 = vsel %vm477_vm8, %v4246_v6, %v4248_v7  ;;  %v512_v13 = vadd.f32 %v488_v24, %v377_v1  ;;  %v620_v60 = vsel %vm177_vm1, %v4060_v0, %v6970_v52  ;;  %v6974_v24 = vld [vmem:[#allocation30_spill] sm:$0xff] }
 0x8ae   : > { %v749_v40 = vsel %vm254_vm3, %v4034_v48, %v6971_v46  ;;  %v1155_v5 = vadd.f32 %v1131_v23, %v1003_v30  ;;  %v513_v42 = vadd.f32 %v489_v43, %v378_v38  ;;  %v642_v28 = vadd.f32 %v618_v25, %v511_v36  ;;  %v6975_v38 = vld [vmem:[#allocation81_spill] sm:$0xff]  ;;  %v6976_v43 = vld [vmem:[#allocation80_spill] sm:$0xff] }
 0x8af   : > { %v750_v63 = vsel %vm254_vm3, %v6971_v46, %v6972_v16  ;;  %v1445_v6 = vsel %vm477_vm8, %v6973_v35, %v4334_v8  ;;  %v643_v54 = vadd.f32 %v619_v10, %v512_v13  ;;  %v848_v1 = vrot.slane %v817_v56, 7 }
 0x8b0   : > { %v751_v0 = vsel %vm254_vm3, %v6972_v16, %v6974_v24  ;;  %v1312_v52 = vadd.f32 %v1288_v17, %v1155_v5  ;;  %v772_v7 = vadd.f32 %v748_v58, %v641_v29  ;;  %v644_v48 = vadd.f32 %v620_v60, %v513_v42  ;;  %v6979_v16 = vld [vmem:[#allocation108_spill] sm:$0xff] }
 0x8b1   : > { %v773_v23 = vadd.f32 %v749_v40, %v642_v28  ;;  %v1602_v25 = vsel %vm477_vm8, %v6976_v43, %v6975_v38  ;;  %v6732_v30 = vrot.slane %v5321_v2, 7  ;;  %v774_v36 = vadd.f32 %v750_v63, %v643_v54  ;;  %v6981_v54 = vld [vmem:[#allocation125_spill] sm:$0xff] }
 0x8b2   : > { %v850_v46 = vrot.slane %v818_v39, 7  ;;  %v1469_v22 = vadd.f32 %v1445_v6, %v1312_v52  ;;  %v6729_v10 = vrot.slane %v5317_v9, 7  ;;  %v6728_v56 = vrot.slane %v5325_v44, 7 }
 0x8b3   : > { %v775_v13 = vadd.f32 %v751_v0, %v644_v48  ;;  %v1758_v29 = vsel %vm477_vm8, %v4504_v12, %v4508_v21  ;;  %v845_v58 = vsel %vm831_vm12, %v6732_v30, %v844_v4  ;;  %v6977_v17 = vrot.slane %v5281_v26, 7  ;;  %v6978_v12 = vld [vmem:[#allocation109_spill] sm:$0xff] }
 0x8b4   : > { %v5397_v39 = vmul.f32 %v5233_v33, %v5076_v20  ;;  %v1626_v40 = vadd.f32 %v1602_v25, %v1469_v22  ;;  %v872_v5 = vadd.f32 %v845_v58, %v772_v7  ;;  %v849_v42 = vsel %vm831_vm12, %v6729_v10, %v848_v1  ;;  %v6982_v1 = vld [vmem:[#allocation123_spill] sm:$0xff]  ;;  %v6998_v10 = vld [vmem:[#allocation62_spill] sm:$0xff] }
 0x8b5   : > { %v847_v60 = vsel %vm831_vm12, %v6977_v17, %v846_v32  ;;  %v1889_v63 = vsel %vm477_vm8, %v6979_v16, %v6978_v12  ;;  %v874_v4 = vadd.f32 %v849_v42, %v774_v36  ;;  %v851_v32 = vsel %vm831_vm12, %v6728_v56, %v850_v46  ;;  %v6985_v46 = vld [vmem:[#allocation139_spill] sm:$0xff]  ;;  %v6987_v16 = vld [vmem:[#allocation154_spill] sm:$0xff]  ;;  %v6997_v56 = vld [vmem:[#allocation61_spill] sm:$0xff] }
 0x8b6   : > { %v873_v28 = vadd.f32 %v847_v60, %v773_v23  ;;  %v5410_v33 = vmul.f32 %v5287_v57, %v5078_v3  ;;  %v1782_v22 = vadd.f32 %v1758_v29, %v1626_v40  ;;  %v875_v7 = vadd.f32 %v851_v32, %v775_v13  ;;  %v6986_v13 = vld [vmem:[#allocation138_spill] sm:$0xff]  ;;  %v6988_v32 = vld [vmem:[#allocation153_spill] sm:$0xff] }
 0x8b7   : > { %v907_v35 = vmul.f32 %v5272_v62, %v5076_v20  ;;  %v908_v6 = vmul.f32 %v5284_v11, %v5078_v3  ;;  %v2045_v24 = vsel %vm477_vm8, %v6982_v1, %v6981_v54  ;;  %v910_v0 = vmul.f32 %v5277_v50, %v5088_v27  ;;  %v6989_v1 = vld [vmem:[#allocation49_spill] sm:$0xff] }
 0x8b8   : > { %6980 = vst [vmem:[#allocation21_spill] sm:$0xff] %v5410_v33  ;;  %v5423_v52 = vmul.f32 %v5296_v51, %v5086_v34  ;;  %v909_v48 = vmul.f32 %v5293_v61, %v5086_v34  ;;  %v1913_v23 = vadd.f32 %v1889_v63, %v1782_v22  ;;  %v5429_v43 = vmul.f32 %v5304_v14, %v5088_v27 }
 0x8b9   : > { %v919_v25 = vadd.f32 %v907_v35, %v872_v5  ;;  %v920_v36 = vadd.f32 %v908_v6, %v873_v28  ;;  %v2202_v29 = vsel %vm477_vm8, %v6986_v13, %v6985_v46  ;;  %v922_v60 = vadd.f32 %v910_v0, %v875_v7  ;;  %v6990_v5 = vld [vmem:[#allocation46_spill] sm:$0xff] }
 0x8ba   : > { %6983 = vst [vmem:[#allocation28_spill] sm:$0xff] %v5423_v52  ;;  %6984 = vst [vmem:[#allocation25_spill] sm:$0xff] %v5429_v43  ;;  %v921_v58 = vadd.f32 %v909_v48, %v874_v4  ;;  %v2069_v17 = vadd.f32 %v2045_v24, %v1913_v23  ;;  %v6727_v40 = vrot.slane %v5397_v39, 1  ;;  %v6726_v42 = vrot.slane %v5410_v33, 1  ;;  %v6991_v24 = vld [vmem:[#allocation168_spill] sm:$0xff] }
 0x8bb   : > { %v2338_v63 = vsel %vm477_vm8, %v6988_v32, %v6987_v16  ;;  %v6730_v22 = vrot.slane %v5423_v52, 1  ;;  %v1139_v28 = vsel %vm477_vm8, %v6990_v5, %v6989_v1  ;;  %v6731_v6 = vrot.slane %v5429_v43, 1  ;;  %v6992_v48 = vld [vmem:[#allocation48_spill] sm:$0xff]  ;;  %v6994_v5 = vld [vmem:[#allocation50_spill] sm:$0xff]  ;;  %v7003_v43 = vld [vmem:[#allocation77_spill] sm:$0xff] }
 0x8bc   : > { %v2226_v35 = vadd.f32 %v2202_v29, %v2069_v17  ;;  %v1011_v4 = vadd.f32 %v6727_v40, %v919_v25  ;;  %v1012_v7 = vadd.f32 %v6726_v42, %v920_v36  ;;  %v2494_v0 = vsel %vm477_vm8, %v6991_v24, %v4928_v55  ;;  %v6993_v29 = vld [vmem:[#allocation51_spill] sm:$0xff]  ;;  %v6996_v40 = vld [vmem:[#allocation182_spill] sm:$0xff] }
 0x8bd   : > { %v1140_v23 = vsel %vm477_vm8, %v6989_v1, %v6992_v48  ;;  %v1013_v13 = vadd.f32 %v6730_v22, %v921_v58  ;;  %v1141_v17 = vsel %vm477_vm8, %v6992_v48, %v6993_v29  ;;  %v1014_v36 = vadd.f32 %v6731_v6, %v922_v60  ;;  %v6995_v42 = vld [vmem:[#allocation183_spill] sm:$0xff]  ;;  %v6999_v22 = vld [vmem:[#allocation64_spill] sm:$0xff]  ;;  %v7004_v52 = vld [vmem:[#allocation74_spill] sm:$0xff] }
 0x8be   : > { %v2362_v32 = vadd.f32 %v2338_v63, %v2226_v35  ;;  %v1163_v25 = vadd.f32 %v1139_v28, %v1011_v4  ;;  %v1142_v24 = vsel %vm477_vm8, %v6993_v29, %v6994_v5  ;;  %v2650_v1 = vsel %vm477_vm8, %v6996_v40, %v6995_v42  ;;  %v7000_v28 = vld [vmem:[#allocation63_spill] sm:$0xff]  ;;  %v7001_v5 = vld [vmem:[#allocation65_spill] sm:$0xff] }
 0x8bf   : > { %v1296_v58 = vsel %vm477_vm8, %v6998_v10, %v6997_v56  ;;  %v1297_v63 = vsel %vm477_vm8, %v6997_v56, %v6999_v22  ;;  %v1298_v60 = vsel %vm477_vm8, %v6999_v22, %v7000_v28  ;;  %v1164_v48 = vadd.f32 %v1140_v23, %v1012_v7  ;;  %v7002_v6 = vld [vmem:[#allocation203_spill] sm:$0xff] }
 0x8c0   : > { %v2518_v35 = vadd.f32 %v2494_v0, %v2362_v32  ;;  %v1165_v29 = vadd.f32 %v1141_v17, %v1013_v13  ;;  %v1299_v40 = vsel %vm477_vm8, %v7000_v28, %v7001_v5  ;;  %v2808_v10 = vsel %vm177_vm1, %v7002_v6, %v5122_v31  ;;  %v7005_v32 = vld [vmem:[#allocation76_spill] sm:$0xff]  ;;  %v7006_v13 = vld [vmem:[#allocation79_spill] sm:$0xff]  ;;  %v7007_v28 = vld [vmem:[#allocation78_spill] sm:$0xff] }
 0x8c1   : > { %v1166_v30 = vadd.f32 %v1142_v24, %v1014_v36  ;;  %v1453_v56 = vsel %vm477_vm8, %v7004_v52, %v7003_v43  ;;  %v1320_v42 = vadd.f32 %v1296_v58, %v1163_v25  ;;  %v1321_v22 = vadd.f32 %v1297_v63, %v1164_v48  ;;  %v7009_v25 = vld [vmem:[#allocation91_spill] sm:$0xff]  ;;  %v7010_v63 = vld [vmem:[#allocation93_spill] sm:$0xff]  ;;  %v7011_v48 = vld [vmem:[#allocation92_spill] sm:$0xff] }
 0x8c2   : > { %v2674_v33 = vadd.f32 %v2650_v1, %v2518_v35  ;;  %v1322_v0 = vadd.f32 %v1298_v60, %v1165_v29  ;;  %v1454_v7 = vsel %vm477_vm8, %v7003_v43, %v7005_v32  ;;  %v1455_v17 = vsel %vm477_vm8, %v7005_v32, %v7006_v13  ;;  %v7008_v1 = vld [vmem:[#allocation90_spill] sm:$0xff] }
 0x8c3   : > { %v1323_v23 = vadd.f32 %v1299_v40, %v1166_v30  ;;  %v1456_v6 = vsel %vm477_vm8, %v7006_v13, %v7007_v28  ;;  %v1477_v52 = vadd.f32 %v1453_v56, %v1320_v42  ;;  %v1610_v58 = vsel %vm477_vm8, %v7009_v25, %v7008_v1  ;;  %v7015_v56 = vld [vmem:[#allocation102_spill] sm:$0xff] }
 0x8c4   : > { %v2832_v36 = vadd.f32 %v2808_v10, %v2674_v33  ;;  %v1611_v43 = vsel %vm477_vm8, %v7008_v1, %v7010_v63  ;;  %v1478_v35 = vadd.f32 %v1454_v7, %v1321_v22  ;;  %v1612_v29 = vsel %vm477_vm8, %v7010_v63, %v7011_v48  ;;  %v7014_v10 = vld [vmem:[#allocation105_spill] sm:$0xff]  ;;  %v7016_v1 = vld [vmem:[#allocation94_spill] sm:$0xff]  ;;  %v7017_v22 = vld [vmem:[#allocation104_spill] sm:$0xff] }
 0x8c5   : > { %v1479_v5 = vadd.f32 %v1455_v17, %v1322_v0  ;;  %v1480_v40 = vadd.f32 %v1456_v6, %v1323_v23  ;;  %v1766_v32 = vsel %vm477_vm8, %v7015_v56, %v7014_v10  ;;  %v1634_v13 = vadd.f32 %v1610_v58, %v1477_v52  ;;  %v7019_v23 = vld [vmem:[#allocation118_spill] sm:$0xff]  ;;  %v7020_v17 = vld [vmem:[#allocation119_spill] sm:$0xff]  ;;  %v7025_v56 = vld [vmem:[#allocation120_spill] sm:$0xff] }
 0x8c6   : > { %v1635_v28 = vadd.f32 %v1611_v43, %v1478_v35  ;;  %v1767_v7 = vsel %vm477_vm8, %v7014_v10, %v7017_v22  ;;  %v1897_v6 = vsel %vm477_vm8, %v7020_v17, %v7019_v23  ;;  %v7022_v43 = vld [vmem:[#allocation106_spill] sm:$0xff]  ;;  %v7023_v35 = vld [vmem:[#allocation121_spill] sm:$0xff] }
 0x8c7   : > { %v1636_v25 = vadd.f32 %v1612_v29, %v1479_v5  ;;  %v1790_v63 = vadd.f32 %v1766_v32, %v1634_v13 }
 0x8c8   : > { %v1791_v10 = vadd.f32 %v1767_v7, %v1635_v28  ;;  %v7030_v7 = vld [vmem:[#allocation137_spill] sm:$0xff] }
 0x8c9   : > { %v1921_v17 = vadd.f32 %v1897_v6, %v1790_v63 }
 0x8ee   : > { %v2910_v4 = vpop.permute.xlu1 %2909 }
 0x8f2   : > { %v2912_v24 = vpop.permute.xlu0 %2911 }
 0x8f3   : > { %v2914_v30 = vpop.permute.xlu1 %2913  ;;  %v2939_v60 = vsel %vm177_vm1, %v2910_v4, %v2912_v24  ;;  %v1613_v4 = vsel %vm477_vm8, %v7011_v48, %v7016_v1  ;;  %v1898_v48 = vsel %vm477_vm8, %v7019_v23, %v7023_v35  ;;  %v1899_v1 = vsel %vm477_vm8, %v7023_v35, %v7025_v56  ;;  %v7029_v23 = vld [vmem:[#allocation134_spill] sm:$0xff]  ;;  %v7031_v35 = vld [vmem:[#allocation149_spill] sm:$0xff] }
 0x8f4   : > { %v5505_v33 = vsel %vm177_vm1, %v2912_v24, %v2914_v30  ;;  %v5507_v42 = vadd.f32 %v2939_v60, %v2832_v36  ;;  %v7018_v36 = vld [vmem:[#allocation107_spill] sm:$0xff]  ;;  %v1637_v5 = vadd.f32 %v1613_v4, %v1480_v40  ;;  %v1922_v4 = vadd.f32 %v1898_v48, %v1791_v10 }
 0x8f5   : > { %7012 = vst [vmem:[#allocation66_spill] sm:$0xff] %v5505_v33  ;;  %v1768_v0 = vsel %vm477_vm8, %v7017_v22, %v7018_v36  ;;  %v1769_v60 = vsel %vm477_vm8, %v7018_v36, %v7022_v43  ;;  %v7027_v22 = vld [vmem:[#allocation132_spill] sm:$0xff]  ;;  %v7028_v36 = vld [vmem:[#allocation122_spill] sm:$0xff] }
 0x8f6   : > { %7013 = vst [vmem:[#allocation30_spill] sm:$0xff] %v5507_v42  ;;  %v2916_v24 = vpop.permute.xlu0 %2915  ;;  %v1792_v13 = vadd.f32 %v1768_v0, %v1636_v25  ;;  %v1900_v43 = vsel %vm477_vm8, %v7025_v56, %v7028_v36  ;;  %v1793_v28 = vadd.f32 %v1769_v60, %v1637_v5  ;;  %v7035_v5 = vld [vmem:[#allocation136_spill] sm:$0xff] }
 0x8f7   : > { %v2918_v52 = vpop.permute.xlu1 %2917  ;;  %v5525_v58 = vsel %vm177_vm1, %v2914_v30, %v2916_v24  ;;  %v7026_v30 = vld [vmem:[#allocation135_spill] sm:$0xff]  ;;  %v2056_v10 = vsel %vm477_vm8, %v7030_v7, %v7035_v5  ;;  %v7036_v36 = vld [vmem:[#allocation164_spill] sm:$0xff] }
 0x8f8   : > { %7021 = vst [vmem:[#allocation81_spill] sm:$0xff] %v5525_v58  ;;  %v5534_v29 = vsel %vm177_vm1, %v2916_v24, %v2918_v52  ;;  %v2053_v32 = vsel %vm477_vm8, %v7027_v22, %v7026_v30  ;;  %v2054_v24 = vsel %vm477_vm8, %v7026_v30, %v7029_v23  ;;  %v2055_v52 = vsel %vm477_vm8, %v7029_v23, %v7030_v7  ;;  %v7033_v22 = vld [vmem:[#allocation150_spill] sm:$0xff]  ;;  %v7037_v23 = vld [vmem:[#allocation163_spill] sm:$0xff]  ;;  %v7058_v42 = vld [vmem:[#allocation196_spill] sm:$0xff] }
 0x8f9   : > { %7024 = vst [vmem:[#allocation80_spill] sm:$0xff] %v5534_v29  ;;  %v7032_v29 = vld [vmem:[#allocation148_spill] sm:$0xff]  ;;  %v1923_v6 = vadd.f32 %v1899_v1, %v1792_v13  ;;  %v2077_v63 = vadd.f32 %v2053_v32, %v1921_v17  ;;  %v2211_v56 = vsel %vm477_vm8, %v7031_v35, %v7033_v22  ;;  %v1924_v60 = vadd.f32 %v1900_v43, %v1793_v28  ;;  %v7038_v32 = vld [vmem:[#allocation151_spill] sm:$0xff]  ;;  %v7039_v17 = vld [vmem:[#allocation165_spill] sm:$0xff] }
 0x8fa   : > { %v2920_v40 = vpop.permute.xlu0 %2919  ;;  %v2210_v25 = vsel %vm477_vm8, %v7032_v29, %v7031_v35  ;;  %v2078_v48 = vadd.f32 %v2054_v24, %v1922_v4  ;;  %v2346_v29 = vsel %vm477_vm8, %v7037_v23, %v7036_v36  ;;  %v2212_v13 = vsel %vm477_vm8, %v7033_v22, %v7038_v32  ;;  %v7040_v28 = vld [vmem:[#allocation152_spill] sm:$0xff]  ;;  %v7041_v7 = vld [vmem:[#allocation178_spill] sm:$0xff]  ;;  %v7042_v35 = vld [vmem:[#allocation177_spill] sm:$0xff] }
 0x8fb   : > { %v2922_v0 = vpop.permute.xlu1 %2921  ;;  %v2079_v58 = vadd.f32 %v2055_v52, %v1923_v6  ;;  %v2234_v1 = vadd.f32 %v2210_v25, %v2077_v63  ;;  %v2213_v4 = vsel %vm477_vm8, %v7038_v32, %v7040_v28  ;;  %v2502_v5 = vsel %vm477_vm8, %v7042_v35, %v7041_v7  ;;  %v7044_v22 = vld [vmem:[#allocation179_spill] sm:$0xff]  ;;  %v7046_v32 = vld [vmem:[#allocation166_spill] sm:$0xff]  ;;  %v7047_v35 = vld [vmem:[#allocation193_spill] sm:$0xff] }
 0x8fc   : > { %v5558_v30 = vsel %vm177_vm1, %v2920_v40, %v2922_v0  ;;  %v2347_v40 = vsel %vm477_vm8, %v7036_v36, %v7039_v17  ;;  %v2235_v24 = vadd.f32 %v2211_v56, %v2078_v48  ;;  %v2080_v6 = vadd.f32 %v2056_v10, %v1924_v60  ;;  %v7049_v60 = vld [vmem:[#allocation167_spill] sm:$0xff] }
 0x8fd   : > { %7034 = vst [vmem:[#allocation109_spill] sm:$0xff] %v5558_v30  ;;  %v2370_v63 = vadd.f32 %v2346_v29, %v2234_v1  ;;  %v2503_v36 = vsel %vm477_vm8, %v7041_v7, %v7044_v22  ;;  %v2236_v48 = vadd.f32 %v2212_v13, %v2079_v58  ;;  %v2348_v28 = vsel %vm477_vm8, %v7039_v17, %v7046_v32  ;;  %v7048_v30 = vld [vmem:[#allocation192_spill] sm:$0xff]  ;;  %v7050_v1 = vld [vmem:[#allocation194_spill] sm:$0xff] }
 0x8fe   : > { %v2924_v43 = vpop.permute.xlu0 %2923  ;;  %v2371_v23 = vadd.f32 %v2347_v40, %v2235_v24  ;;  %v2349_v10 = vsel %vm477_vm8, %v7046_v32, %v7049_v60  ;;  %v7051_v13 = vld [vmem:[#allocation180_spill] sm:$0xff]  ;;  %v7052_v24 = vld [vmem:[#allocation213_spill] sm:$0xff]  ;;  %v7056_v60 = vld [vmem:[#allocation214_spill] sm:$0xff] }
 0x8ff   : > { %v2926_v52 = vpop.permute.xlu1 %2925  ;;  %v5579_v25 = vsel %vm177_vm1, %v2922_v0, %v2924_v43  ;;  %v2658_v0 = vsel %vm477_vm8, %v7048_v30, %v7047_v35  ;;  %v2526_v29 = vadd.f32 %v2502_v5, %v2370_v63  ;;  %v2504_v40 = vsel %vm477_vm8, %v7044_v22, %v7051_v13  ;;  %v7053_v7 = vld [vmem:[#allocation212_spill] sm:$0xff]  ;;  %v7055_v5 = vld [vmem:[#allocation181_spill] sm:$0xff] }
 0x900   : > { %7043 = vst [vmem:[#allocation108_spill] sm:$0xff] %v5579_v25  ;;  %v5585_v56 = vsel %vm177_vm1, %v2924_v43, %v2926_v52  ;;  %v2237_v25 = vadd.f32 %v2213_v4, %v2080_v6  ;;  %v2659_v43 = vsel %vm477_vm8, %v7047_v35, %v7050_v1  ;;  %v2527_v17 = vadd.f32 %v2503_v36, %v2371_v23  ;;  %v7057_v23 = vld [vmem:[#allocation195_spill] sm:$0xff] }
 0x901   : > { %7045 = vst [vmem:[#allocation125_spill] sm:$0xff] %v5585_v56  ;;  %v2816_v30 = vsel %vm177_vm1, %v7053_v7, %v7052_v24  ;;  %v2372_v32 = vadd.f32 %v2348_v28, %v2236_v48  ;;  %v2505_v63 = vsel %vm477_vm8, %v7051_v13, %v7055_v5  ;;  %v2682_v35 = vadd.f32 %v2658_v0, %v2526_v29 }
 0x902   : > { %v2928_v58 = vpop.permute.xlu0 %2927  ;;  %v2817_v56 = vsel %vm177_vm1, %v7052_v24, %v7056_v60  ;;  %v2373_v22 = vadd.f32 %v2349_v10, %v2237_v25  ;;  %v2683_v36 = vadd.f32 %v2659_v43, %v2527_v17  ;;  %v2660_v7 = vsel %vm477_vm8, %v7050_v1, %v7057_v23  ;;  %v7061_v1 = vld [vmem:[#allocation215_spill] sm:$0xff] }
 0x903   : > { %v2930_v4 = vpop.permute.xlu1 %2929  ;;  %v5606_v6 = vsel %vm177_vm1, %v2926_v52, %v2928_v58  ;;  %v2528_v33 = vadd.f32 %v2504_v40, %v2372_v32  ;;  %v2661_v52 = vsel %vm477_vm8, %v7057_v23, %v7058_v42  ;;  %v2840_v48 = vadd.f32 %v2816_v30, %v2682_v35  ;;  %v7062_v32 = vld [vmem:[#allocation216_spill] sm:$0xff] }
 0x904   : > { %7054 = vst [vmem:[#allocation123_spill] sm:$0xff] %v5606_v6  ;;  %v2529_v58 = vadd.f32 %v2505_v63, %v2373_v22  ;;  %v2841_v13 = vadd.f32 %v2817_v56, %v2683_v36  ;;  %v7099_v6 = vld [vmem:[#allocation23_spill] sm:$0xff] }
 0x905   : > { %v2684_v5 = vadd.f32 %v2660_v7, %v2528_v33  ;;  %v7065_v7 = vld [vmem:[#allocation197_spill] sm:$0xff] }
 0x906   : > { %v2932_v28 = vpop.permute.xlu0 %2931  ;;  %v2685_v43 = vadd.f32 %v2661_v52, %v2529_v58 }
 0x907   : > { %v2934_v0 = vpop.permute.xlu1 %2933  ;;  %v2947_v29 = vsel %vm177_vm1, %v2930_v4, %v2932_v28  ;;  %v2842_v40 = vadd.f32 %v7061_v1, %v2684_v5 }
 0x908   : > { %v2948_v25 = vsel %vm177_vm1, %v2932_v28, %v2934_v0  ;;  %v5622_v10 = vadd.f32 %v2947_v29, %v2840_v48  ;;  %v2843_v42 = vadd.f32 %v7062_v32, %v2685_v43  ;;  %v7066_v48 = vld [vmem:[#allocation201_spill] sm:$0xff] }
 0x909   : > { %v5624_v17 = vadd.f32 %v2948_v25, %v2841_v13 }
 0x90a   : > { %7059 = vst [vmem:[#allocation139_spill] sm:$0xff] %v5622_v10  ;;  %v2936_v24 = vpop.permute.xlu0 %2935 }
 0x90b   : > { %7060 = vst [vmem:[#allocation138_spill] sm:$0xff] %v5624_v17  ;;  %v2938_v30 = vpop.permute.xlu1 %2937  ;;  %v2949_v63 = vsel %vm177_vm1, %v2934_v0, %v2936_v24 }
 0x90c   : > { %v2950_v56 = vsel %vm177_vm1, %v2936_v24, %v2938_v30  ;;  %v5630_v35 = vadd.f32 %v2949_v63, %v2842_v40  ;;  %v7067_v40 = vld [vmem:[#allocation198_spill] sm:$0xff]  ;;  %v7068_v24 = vld [vmem:[#allocation199_spill] sm:$0xff] }
 0x90d   : > { %v5632_v33 = vadd.f32 %v2950_v56, %v2843_v42  ;;  %v7069_v56 = vld [vmem:[#allocation200_spill] sm:$0xff] }
 0x90e   : > { %7063 = vst [vmem:[#allocation154_spill] sm:$0xff] %v5630_v35  ;;  %v2995_v4 = vpop.permute.xlu0 %2994  ;;  %v7096_v35 = vld [vmem:[#allocation18_spill] sm:$0xff] }
 0x90f   : > { %7064 = vst [vmem:[#allocation153_spill] sm:$0xff] %v5632_v33  ;;  %v2997_v60 = vpop.permute.xlu1 %2996  ;;  %v3010_v22 = vmul.f32 %v2995_v4, %v5040_v37  ;;  %v3015_v23 = vmul.f32 %v5166_v47, %v2995_v4  ;;  %v5650_v63 = vmul.f32 %v2995_v4, %v5076_v20 }
 0x910   : > { %v3002_v36 = vsel %vm177_vm1, %v2995_v4, %v2997_v60 }
 0x911   : > { %v3011_v52 = vmul.f32 %v3002_v36, %v7065_v7  ;;  %v3016_v28 = vmul.f32 %v7066_v48, %v3002_v36  ;;  %v3040_v13 = vrot.slane %v3010_v22, 1  ;;  %v3041_v5 = vrot.slane %v3015_v23, 1 }
 0x912   : > { %v2999_v58 = vpop.permute.xlu0 %2998 }
 0x913   : > { %v3001_v0 = vpop.permute.xlu1 %3000  ;;  %v3003_v29 = vsel %vm177_vm1, %v2997_v60, %v2999_v58  ;;  %v3043_v43 = vrot.slane %v3011_v52, 1  ;;  %v3044_v1 = vrot.slane %v3016_v28, 1  ;;  %v5654_v28 = vld [vmem:[#allocation2 + $0x60] sm:$0xff] }
 0x914   : > { %v3004_v25 = vsel %vm177_vm1, %v2999_v58, %v3001_v0  ;;  %v3012_v37 = vmul.f32 %v3003_v29, %v7067_v40  ;;  %v5644_v42 = vmul.f32 %v5064_v19, %v3003_v29  ;;  %v3014_v60 = vmul.f32 %v3001_v0, %v7069_v56  ;;  %7070 = vst [vmem:[#allocation49_spill] sm:$0xff] %v5654_v28 }
 0x915   : > { %v3013_v32 = vmul.f32 %v3004_v25, %v7068_v24  ;;  %v5647_v30 = vmul.f32 %v5069_v18, %v3004_v25  ;;  %v3019_v58 = vmul.f32 %v5654_v28, %v3001_v0  ;;  %v3042_v19 = vsel %vm970_vm13, %v3040_v13, %v3041_v5  ;;  %v3708_v13 = vld [vmem:[%s6570_s1 + $0x45] ss:$8 sm:$0xf] }
 0x916   : > { %v3046_v22 = vrot.slane %v3012_v37, 1  ;;  %v3047_v23 = vrot.slane %v5644_v42, 1  ;;  %v3045_v18 = vsel %vm970_vm13, %v3043_v43, %v3044_v1  ;;  %3065 = vrot.lane.b32.xlu0 %v3042_v19, %s3780_s23  ;;  %v3021_v37 = vmul.f32 %v3002_v36, %v5078_v3  ;;  %v7071_v3 = vld [vmem:[#allocation4_spill] sm:$0xff] }
 0x917   : > { %v3049_v52 = vrot.slane %v3013_v32, 1  ;;  %v3050_v33 = vrot.slane %v5647_v30, 1  ;;  %3067 = vrot.lane.b32.xlu1 %v3045_v18, %s3780_s23  ;;  %v3055_v32 = vrot.slane %v5650_v63, 1  ;;  %v3052_v42 = vrot.slane %v3014_v60, 1  ;;  %v7072_v60 = vld [vmem:[#allocation6_spill] sm:$0xff]  ;;  %v7100_v28 = vld [vmem:[#allocation24_spill] sm:$0xff] }
 0x918   : > { %v3048_v4 = vsel %vm970_vm13, %v3046_v22, %v3047_v23  ;;  %v3053_v56 = vrot.slane %v3019_v58, 1  ;;  %v3139_v36 = vrot.slane %v3708_v13, %v7071_v3  ;;  %v3147_v22 = vrot.slane %v3708_v13, %v7072_v60  ;;  %v7073_v58 = vld [vmem:[#allocation3_spill] sm:$0xff] }
 0x919   : > { %v3051_v20 = vsel %vm970_vm13, %v3049_v52, %v3050_v33  ;;  %v3056_v43 = vsel %vm970_vm13, %v3041_v5, %v3055_v32  ;;  %v3057_v52 = vrot.slane %v3021_v37, 1  ;;  %v3143_v19 = vrot.slane %v3708_v13, %v7073_v58  ;;  %v3710_v5 = vld [vmem:[%s6570_s1 + $0x47] ss:$8 sm:$0xf] }
 0x91a   : > { %3069 = vrot.lane.b32.xlu0 %v3048_v4, %s3780_s23  ;;  %v3054_v30 = vsel %vm970_vm13, %v3052_v42, %v3053_v56  ;;  %v3320_v18 = vrot.slane %v3710_v5, %v7071_v3  ;;  %v3328_v4 = vrot.slane %v3710_v5, %v7072_v60  ;;  %v3324_v37 = vrot.slane %v3710_v5, %v7073_v58  ;;  %v3711_v42 = vld [vmem:[%s6570_s1 + $0x60] ss:$8 sm:$0xf] }
 0x91b   : > { %3071 = vrot.lane.b32.xlu1 %v3051_v20, %s3780_s23  ;;  %v3058_v63 = vsel %vm970_vm13, %v3044_v1, %v3057_v52  ;;  %v7074_v20 = vld [vmem:[#allocation5_spill] sm:$0xff] }
 0x91c   : > { %v3151_v1 = vrot.slane %v3708_v13, %v7074_v20  ;;  %v3332_v13 = vrot.slane %v3710_v5, %v7074_v20  ;;  %v3463_v5 = vrot.slane %v3711_v42, %v7074_v20  ;;  %v7089_v20 = vld [vmem:[#allocation16_spill] sm:$0xff] }
 0x91e   : > { %3073 = vrot.lane.b32.xlu0 %v3054_v30, %s3780_s23  ;;  %v3022_v30 = vmul.f32 %v3003_v29, %v5086_v34 }
 0x91f   : > { %3075 = vrot.lane.b32.xlu1 %v3056_v43, %s3780_s23  ;;  %v3451_v43 = vrot.slane %v3711_v42, %v7071_v3  ;;  %v7094_v3 = vld [vmem:[#allocation8_spill] sm:$0xff] }
 0x922   : > { %3077 = vrot.lane.b32.xlu0 %v3058_v63, %s3780_s23  ;;  %v3455_v63 = vrot.slane %v3711_v42, %v7073_v58  ;;  %v7093_v58 = vld [vmem:[#allocation19_spill] sm:$0xff] }
 0x923   : > { %3152 = vrot.lane.b32.xlu1 %v3139_v36, %s3781_s26  ;;  %v3459_v36 = vrot.slane %v3711_v42, %v7072_v60  ;;  %v5729_v42 = vmul.f32 %v7066_v48, %v5287_v57 }
 0x926   : > { %3154 = vrot.lane.b32.xlu0 %v3143_v19, %s3781_s26 }
 0x927   : > { %3156 = vrot.lane.b32.xlu1 %v3147_v22, %s3781_s26  ;;  %v7075_v22 = vld [vmem:[#allocation202_spill] sm:$0xff] }
 0x928   : > { %v3024_v19 = vmul.f32 %v3001_v0, %v7075_v22  ;;  %v7082_v22 = vld [vmem:[#allocation223_spill] sm:$0xff] }
 0x92a   : > { %3158 = vrot.lane.b32.xlu0 %v3151_v1, %s3781_s26  ;;  %v3059_v1 = vrot.slane %v3022_v30, 1  ;;  %v3063_v34 = vrot.slane %v3024_v19, 1  ;;  %v5733_v30 = vld [vmem:[#allocation2 + $0x10] sm:$0xe0] }
 0x92b   : > { %3333 = vrot.lane.b32.xlu1 %v3320_v18, %s3779_s18  ;;  %v3023_v18 = vmul.f32 %v3004_v25, %v5088_v27  ;;  %v5721_v27 = vld [vmem:[#allocation2 + $0x8] sm:$0xe0]  ;;  %7080 = vst [vmem:[#allocation168_spill] sm:$0xff] %v5733_v30 }
 0x92c   : > { %7076 = vst [vmem:[#allocation46_spill] sm:$0xff] %v5721_v27  ;;  %v7077_v25 = vld [vmem:[#allocation220_spill] sm:$0xff] }
 0x92d   : > { %v3061_v29 = vrot.slane %v3023_v18, 1  ;;  %v7083_v18 = vld [vmem:[#allocation13_spill] sm:$0xff] }
 0x92e   : > { %3335 = vrot.lane.b32.xlu0 %v3324_v37, %s3779_s18  ;;  %v3064_v37 = vsel %vm970_vm13, %v3053_v56, %v3063_v34 }
 0x92f   : > { %3337 = vrot.lane.b32.xlu1 %v3328_v4, %s3779_s18  ;;  %v3060_v4 = vsel %vm970_vm13, %v3047_v23, %v3059_v1  ;;  %v3062_v0 = vsel %vm970_vm13, %v3050_v33, %v3061_v29  ;;  %v356_v23 = vmul.f32 %v5721_v27, %v7077_v25  ;;  %v7078_v33 = vld [vmem:[#allocation222_spill] sm:$0xff] }
 0x930   : > { %v361_v56 = vmul.f32 %v7066_v48, %v7078_v33 }
 0x932   : > { %3339 = vrot.lane.b32.xlu0 %v3332_v13, %s3779_s18  ;;  %v368_v13 = vadd.f32 %v356_v23, %v5236_v41  ;;  %v7086_v23 = vld [vmem:[#allocation221_spill] sm:$0xff] }
 0x933   : > { %3464 = vrot.lane.b32.xlu1 %v3451_v43, %s3780_s23 }
 0x936   : > { %3466 = vrot.lane.b32.xlu0 %v3455_v63, %s3780_s23  ;;  %v5737_v63 = vld [vmem:[#allocation2 + $0x18] sm:$0xe0] }
 0x937   : > { %3468 = vrot.lane.b32.xlu1 %v3459_v36, %s3780_s23  ;;  %v357_v36 = vmul.f32 %v5733_v30, %v7078_v33  ;;  %7081 = vst [vmem:[#allocation48_spill] sm:$0xff] %v5737_v63  ;;  %v358_v19 = vmul.f32 %v5737_v63, %v7082_v22  ;;  %v808_v33 = vmul.f32 %v7086_v23, %v7065_v7  ;;  %v7091_v7 = vld [vmem:[#allocation17_spill] sm:$0xff]  ;;  %v7092_v23 = vld [vmem:[#allocation11_spill] sm:$0xff]  ;;  %v7101_v63 = vld [vmem:[#allocation26_spill] sm:$0xff] }
 0x938   : > { %v7102_v30 = vld [vmem:[#allocation9_spill] sm:$0xff] }
 0x939   : > { %v370_v60 = vadd.f32 %v358_v19, %v5258_v45  ;;  %v833_v10 = vrot.slane %v808_v33, 7  ;;  %v3757_v33 = vld [vmem:[#allocation2 + $0x10] sm:$0xf0] }
 0x93a   : > { %3470 = vrot.lane.b32.xlu0 %v3463_v5, %s3780_s23 }
 0x93b   : > { %3079 = vrot.lane.b32.xlu1 %v3060_v4, %s3780_s23  ;;  %v5750_v4 = vmul.f32 %v7066_v48, %v5284_v11 }
 0x93e   : > { %3081 = vrot.lane.b32.xlu0 %v3062_v0, %s3780_s23 }
 0x93f   : > { %3083 = vrot.lane.b32.xlu1 %v3064_v37, %s3780_s23  ;;  %v7085_v37 = vld [vmem:[#allocation218_spill] sm:$0xff] }
 0x942   : > { %3085 = vrot.lane.b32.xlu0 %v3055_v32, %s3780_s23  ;;  %v7079_v32 = vld [vmem:[#allocation217_spill] sm:$0xff] }
 0x943   : > { %3087 = vrot.lane.b32.xlu1 %v3057_v52, %s3780_s23  ;;  %v3754_v52 = vld [vmem:[#allocation2] sm:$0xff] }
 0x944   : > { %v359_v43 = vmul.f32 %v3754_v52, %v7079_v32  ;;  %v809_v52 = vmul.f32 %v5264_v59, %v7067_v40  ;;  %v5759_v32 = vmul.f32 %v5267_v49, %v7068_v24  ;;  %v610_v59 = vsel %vm177_vm1, %v7092_v23, %v7091_v7 }
 0x945   : > { %v369_v49 = vadd.f32 %v357_v36, %v5248_v15 }
 0x946   : > { %3089 = vrot.lane.b32.xlu0 %v3059_v1, %s3780_s23  ;;  %v7084_v1 = vld [vmem:[#allocation10_spill] sm:$0xff]  ;;  %v371_v0 = vadd.f32 %v359_v43, %v7085_v37  ;;  %v7090_v43 = vld [vmem:[#allocation7_spill] sm:$0xff] }
 0x947   : > { %3091 = vrot.lane.b32.xlu1 %v3061_v29, %s3780_s23  ;;  %v479_v5 = vsel %vm477_vm8, %v7084_v1, %v7083_v18  ;;  %v7088_v29 = vld [vmem:[#allocation15_spill] sm:$0xff]  ;;  %v482_v37 = vsel %vm477_vm8, %v7090_v43, %v7089_v20 }
 0x948   : > { %v503_v40 = vadd.f32 %v479_v5, %v368_v13  ;;  %v7097_v13 = vld [vmem:[#allocation22_spill] sm:$0xff]  ;;  %v7098_v5 = vld [vmem:[#allocation12_spill] sm:$0xff]  ;;  %v506_v17 = vadd.f32 %v482_v37, %v371_v0  ;;  %v360_v0 = vmul.f32 %v5166_v47, %v7077_v25 }
 0x949   : > { %v3758_v37 = vld [vmem:[#allocation2 + $0x18] sm:$0xf0] }
 0x94a   : > { %3093 = vrot.lane.b32.xlu0 %v3063_v34, %s3780_s23  ;;  %v5745_v34 = vadd.f32 %v361_v56, %v5248_v15  ;;  %v7087_v56 = vld [vmem:[#allocation14_spill] sm:$0xff]  ;;  %v741_v15 = vsel %vm254_vm3, %v7098_v5, %v7097_v13 }
 0x94b   : > { %v480_v1 = vsel %vm477_vm8, %v7083_v18, %v7087_v56  ;;  %v481_v48 = vsel %vm477_vm8, %v7087_v56, %v7088_v29  ;;  %v902_v18 = vmul.f32 %v5277_v50, %v7068_v24  ;;  %v613_v29 = vsel %vm177_vm1, %v7094_v3, %v7093_v58  ;;  %v7095_v56 = vld [vmem:[#allocation20_spill] sm:$0xff] }
 0x94c   : > { %v611_v43 = vsel %vm177_vm1, %v7091_v7, %v7095_v56  ;;  %v612_v23 = vsel %vm177_vm1, %v7095_v56, %v7096_v35  ;;  %v504_v36 = vadd.f32 %v480_v1, %v369_v49  ;;  %v505_v19 = vadd.f32 %v481_v48, %v370_v60 }
 0x94d   : > { %v634_v24 = vadd.f32 %v610_v59, %v503_v40  ;;  %v742_v3 = vsel %vm254_vm3, %v7097_v13, %v7099_v6  ;;  %v743_v7 = vsel %vm254_vm3, %v7099_v6, %v7100_v28  ;;  %v744_v35 = vsel %vm254_vm3, %v7102_v30, %v7101_v63  ;;  %v5803_v30 = vld [vmem:[#allocation2 + $0x50] sm:$0xff] }
 0x94e   : > { %v637_v56 = vadd.f32 %v613_v29, %v506_v17  ;;  %v635_v27 = vadd.f32 %v611_v43, %v504_v36  ;;  %v636_v5 = vadd.f32 %v612_v23, %v505_v19  ;;  %v834_v60 = vrot.slane %v809_v52, 7  ;;  %v3760_v52 = vld [vmem:[#allocation2 + $0x20] sm:$0xf0] }
 0x94f   : > { %v765_v1 = vadd.f32 %v741_v15, %v634_v24  ;;  %v947_v48 = vmul.f32 %v3757_v33, %v5287_v57  ;;  %v948_v59 = vmul.f32 %v3758_v37, %v5296_v51  ;;  %v835_v6 = vrot.slane %v5759_v32, 7  ;;  %v5812_v57 = vld [vmem:[#allocation2 + $0x58] sm:$0xff]  ;;  %v7103_v43 = vld [vmem:[#allocation27_spill] sm:$0xff] }
 0x950   : > { %v766_v40 = vadd.f32 %v742_v3, %v635_v27  ;;  %v767_v28 = vadd.f32 %v743_v7, %v636_v5  ;;  %v768_v49 = vadd.f32 %v744_v35, %v637_v56  ;;  %v362_v17 = vmul.f32 %v5803_v30, %v7082_v22  ;;  %v7106_v36 = vld [vmem:[#allocation219_spill] sm:$0xff] }
 0x951   : > { %v949_v29 = vmul.f32 %v3760_v52, %v5304_v14  ;;  %v5810_v25 = vmul.f32 %v5803_v30, %v5296_v51  ;;  %v5816_v27 = vmul.f32 %v5812_v57, %v5304_v14  ;;  %v865_v32 = vadd.f32 %v833_v10, %v765_v1 }
 0x952   : > { %v483_v23 = vsel %vm477_vm8, %v7089_v20, %v7103_v43  ;;  %v7104_v22 = vrot.slane %v5281_v26, 7  ;;  %v900_v15 = vmul.f32 %v3757_v33, %v5284_v11  ;;  %v7105_v51 = vrot.slane %v5321_v2, 7  ;;  %v7108_v20 = vld [vmem:[#allocation34_spill] sm:$0xff] }
 0x953   : > { %v7107_v19 = vrot.slane %v7106_v36, 7  ;;  %v372_v14 = vadd.f32 %v360_v0, %v5236_v41  ;;  %v974_v3 = vrot.slane %v947_v48, 1  ;;  %v977_v7 = vrot.slane %v948_v59, 1  ;;  %v7117_v36 = vld [vmem:[#allocation31_spill] sm:$0xff] }
 0x954   : > { %v839_v13 = vsel %vm831_vm12, %v833_v10, %v7104_v22  ;;  %v866_v35 = vadd.f32 %v834_v60, %v766_v40  ;;  %v867_v56 = vadd.f32 %v835_v6, %v767_v28  ;;  %v614_v26 = vsel %vm177_vm1, %v7093_v58, %v7108_v20 }
 0x955   : > { %v837_v24 = vsel %vm831_vm12, %v7107_v19, %v7105_v51  ;;  %v507_v10 = vadd.f32 %v483_v23, %v372_v14  ;;  %v978_v11 = vrot.slane %v5810_v25, 1  ;;  %v980_v1 = vrot.slane %v949_v29, 1  ;;  %v7119_v14 = vld [vmem:[#allocation39_spill] sm:$0xff] }
 0x956   : > { %v868_v5 = vadd.f32 %v837_v24, %v768_v49  ;;  %v981_v2 = vrot.slane %v5816_v27, 1  ;;  %v7109_v33 = vrot.slane %v5317_v9, 7  ;;  %v912_v41 = vadd.f32 %v900_v15, %v865_v32  ;;  %v7118_v24 = vld [vmem:[#allocation38_spill] sm:$0xff]  ;;  %v7199_v27 = vld [vmem:[#allocation60_spill] sm:$0xff] }
 0x957   : > { %v901_v0 = vmul.f32 %v3758_v37, %v5293_v61  ;;  %v903_v48 = vmul.f32 %v5166_v47, %v5272_v62  ;;  %v374_v59 = vadd.f32 %v362_v17, %v5258_v45  ;;  %v638_v58 = vadd.f32 %v614_v26, %v507_v10  ;;  %v7112_v62 = vld [vmem:[#allocation32_spill] sm:$0xff]  ;;  %v7114_v17 = vld [vmem:[#allocation33_spill] sm:$0xff]  ;;  %v7121_v26 = vld [vmem:[#allocation35_spill] sm:$0xff] }
 0x958   : > { %v5839_v52 = vsel %vm831_vm12, %v834_v60, %v7109_v33  ;;  %v7110_v40 = vrot.slane %v5325_v44, 7  ;;  %v7111_v49 = vrot.slane %v5729_v42, 1  ;;  %v914_v60 = vadd.f32 %v902_v18, %v867_v56 }
 0x959   : > { %v913_v29 = vadd.f32 %v901_v0, %v866_v35  ;;  %v915_v32 = vadd.f32 %v903_v48, %v868_v5  ;;  %v5855_v37 = vmul.f32 %v5803_v30, %v5293_v61  ;;  %v484_v45 = vsel %vm477_vm8, %v7103_v43, %v7112_v62 }
 0x95a   : > { %v5848_v28 = vsel %vm831_vm12, %v835_v6, %v7110_v40  ;;  %v976_v9 = vsel %vm970_vm13, %v974_v3, %v7111_v49  ;;  %v979_v44 = vsel %vm970_vm13, %v977_v7, %v978_v11  ;;  %v982_v47 = vsel %vm970_vm13, %v980_v1, %v981_v2  ;;  %v7113_v6 = vld [vmem:[#allocation29_spill] sm:$0xff]  ;;  %v7123_v1 = vld [vmem:[#allocation52_spill] sm:$0xff] }
 0x95b   : > { %v5868_v18 = vmul.f32 %v5812_v57, %v5277_v50  ;;  %v485_v61 = vsel %vm477_vm8, %v7112_v62, %v7113_v6  ;;  %v745_v43 = vsel %vm254_vm3, %v7101_v63, %v7114_v17  ;;  %v1004_v23 = vadd.f32 %v976_v9, %v912_v41  ;;  %v7120_v7 = vld [vmem:[#allocation41_spill] sm:$0xff]  ;;  %v7126_v9 = vld [vmem:[#allocation40_spill] sm:$0xff] }
 0x95c   : > { %v7115_v22 = vrot.slane %v5397_v39, 1  ;;  %v7116_v15 = vrot.slane %v5255_v53, 1  ;;  %v615_v50 = vsel %vm177_vm1, %v7108_v20, %v7117_v36  ;;  %v769_v19 = vadd.f32 %v745_v43, %v638_v58  ;;  %v7122_v20 = vld [vmem:[#allocation54_spill] sm:$0xff]  ;;  %v7124_v41 = vld [vmem:[#allocation53_spill] sm:$0xff]  ;;  %v7130_v43 = vld [vmem:[#allocation56_spill] sm:$0xff] }
 0x95d   : > { %v1132_v3 = vsel %vm477_vm8, %v7119_v14, %v7118_v24  ;;  %v1133_v63 = vsel %vm477_vm8, %v7118_v24, %v7120_v7  ;;  %v508_v35 = vadd.f32 %v484_v45, %v5745_v34  ;;  %v1005_v39 = vadd.f32 %v979_v44, %v913_v29  ;;  %v7125_v58 = vld [vmem:[#allocation37_spill] sm:$0xff]  ;;  %v7127_v29 = vld [vmem:[#allocation67_spill] sm:$0xff] }
 0x95e   : > { %v984_v51 = vsel %vm970_vm13, %v7116_v15, %v7115_v22  ;;  %v1006_v56 = vadd.f32 %v982_v47, %v914_v60  ;;  %v509_v5 = vadd.f32 %v485_v61, %v374_v59  ;;  %v616_v10 = vsel %vm177_vm1, %v7117_v36, %v7121_v26  ;;  %v7128_v62 = vld [vmem:[#allocation69_spill] sm:$0xff]  ;;  %v7129_v47 = vld [vmem:[#allocation36_spill] sm:$0xff]  ;;  %v7131_v22 = vld [vmem:[#allocation83_spill] sm:$0xff] }
 0x95f   : > { %v1007_v53 = vadd.f32 %v984_v51, %v915_v32  ;;  %v1289_v33 = vsel %vm477_vm8, %v7123_v1, %v7122_v20  ;;  %v1290_v0 = vsel %vm477_vm8, %v7122_v20, %v7124_v41  ;;  %v639_v48 = vadd.f32 %v615_v50, %v508_v35  ;;  %v7132_v15 = vld [vmem:[#allocation82_spill] sm:$0xff]  ;;  %v7139_v20 = vld [vmem:[#allocation55_spill] sm:$0xff] }
 0x960   : > { %v746_v34 = vsel %vm254_vm3, %v7114_v17, %v7125_v58  ;;  %v1156_v40 = vadd.f32 %v1132_v3, %v1004_v23  ;;  %v1157_v49 = vadd.f32 %v1133_v63, %v1005_v39  ;;  %v5903_v59 = vadd.f32 %v839_v13, %v769_v19  ;;  %v7133_v50 = vld [vmem:[#allocation42_spill] sm:$0xff]  ;;  %v7134_v19 = vld [vmem:[#allocation43_spill] sm:$0xff]  ;;  %v7135_v63 = vld [vmem:[#allocation68_spill] sm:$0xff] }
 0x961   : > { %v1134_v60 = vsel %vm477_vm8, %v7120_v7, %v7126_v9  ;;  %v1446_v32 = vsel %vm477_vm8, %v4334_v8, %v7127_v29  ;;  %v1447_v45 = vsel %vm477_vm8, %v7127_v29, %v7128_v62  ;;  %v640_v44 = vadd.f32 %v616_v10, %v509_v5  ;;  %v7136_v39 = vld [vmem:[#allocation95_spill] sm:$0xff]  ;;  %v7137_v5 = vld [vmem:[#allocation97_spill] sm:$0xff]  ;;  %v7138_v10 = vld [vmem:[#allocation58_spill] sm:$0xff] }
 0x962   : > { %v747_v6 = vsel %vm254_vm3, %v7125_v58, %v7129_v47  ;;  %v1313_v61 = vadd.f32 %v1289_v33, %v1156_v40  ;;  %v1314_v13 = vadd.f32 %v1290_v0, %v1157_v49  ;;  %v5917_v17 = vadd.f32 %v746_v34, %v639_v48  ;;  %v7140_v48 = vld [vmem:[#allocation85_spill] sm:$0xff]  ;;  %v7141_v34 = vld [vmem:[#allocation111_spill] sm:$0xff]  ;;  %v7142_v40 = vld [vmem:[#allocation110_spill] sm:$0xff] }
 0x963   : > { %v1291_v23 = vsel %vm477_vm8, %v7124_v41, %v7130_v43  ;;  %v1603_v8 = vsel %vm477_vm8, %v6975_v38, %v7131_v22  ;;  %v1604_v51 = vsel %vm477_vm8, %v7131_v22, %v7132_v15  ;;  %v1158_v36 = vadd.f32 %v1134_v60, %v1006_v56  ;;  %v7143_v60 = vld [vmem:[#allocation70_spill] sm:$0xff]  ;;  %v7144_v29 = vld [vmem:[#allocation71_spill] sm:$0xff]  ;;  %v7149_v22 = vld [vmem:[#allocation84_spill] sm:$0xff] }
 0x964   : > { %v1135_v24 = vsel %vm477_vm8, %v7134_v19, %v7133_v50  ;;  %v1470_v14 = vadd.f32 %v1446_v32, %v1313_v61  ;;  %v1471_v3 = vadd.f32 %v1447_v45, %v1314_v13  ;;  %v5931_v7 = vadd.f32 %v747_v6, %v640_v44  ;;  %v7145_v44 = vld [vmem:[#allocation96_spill] sm:$0xff]  ;;  %v7147_v61 = vld [vmem:[#allocation127_spill] sm:$0xff]  ;;  %v7150_v19 = vld [vmem:[#allocation113_spill] sm:$0xff] }
 0x965   : > { %v1448_v35 = vsel %vm477_vm8, %v7128_v62, %v7135_v63  ;;  %v1759_v38 = vsel %vm477_vm8, %v4508_v21, %v7136_v39  ;;  %v1760_v56 = vsel %vm477_vm8, %v7136_v39, %v7137_v5  ;;  %v1315_v26 = vadd.f32 %v1291_v23, %v1158_v36  ;;  %v7146_v6 = vld [vmem:[#allocation124_spill] sm:$0xff]  ;;  %v7148_v23 = vld [vmem:[#allocation87_spill] sm:$0xff]  ;;  %v7153_v39 = vld [vmem:[#allocation98_spill] sm:$0xff] }
 0x966   : > { %v1292_v1 = vsel %vm477_vm8, %v7139_v20, %v7138_v10  ;;  %v1627_v33 = vadd.f32 %v1603_v8, %v1470_v14  ;;  %v1628_v41 = vadd.f32 %v1604_v51, %v1471_v3  ;;  %v1159_v0 = vadd.f32 %v1135_v24, %v1007_v53  ;;  %v7151_v14 = vld [vmem:[#allocation140_spill] sm:$0xff]  ;;  %v7152_v3 = vld [vmem:[#allocation141_spill] sm:$0xff] }
 0x967   : > { %v1605_v58 = vsel %vm477_vm8, %v7132_v15, %v7140_v48  ;;  %v1890_v21 = vsel %vm477_vm8, %v6978_v12, %v7141_v34  ;;  %v1891_v49 = vsel %vm477_vm8, %v7141_v34, %v7142_v40  ;;  %v1472_v9 = vadd.f32 %v1448_v35, %v1315_v26  ;;  %v7158_v34 = vld [vmem:[#allocation115_spill] sm:$0xff] }
 0x968   : > { %v1449_v32 = vsel %vm477_vm8, %v7144_v29, %v7143_v60  ;;  %v1783_v62 = vadd.f32 %v1759_v38, %v1627_v33  ;;  %v1784_v45 = vadd.f32 %v1760_v56, %v1628_v41  ;;  %v1316_v53 = vadd.f32 %v1292_v1, %v1159_v0  ;;  %v7154_v38 = vld [vmem:[#allocation99_spill] sm:$0xff]  ;;  %v7155_v1 = vld [vmem:[#allocation126_spill] sm:$0xff]  ;;  %v7157_v0 = vld [vmem:[#allocation156_spill] sm:$0xff] }
 0x969   : > { %v1761_v47 = vsel %vm477_vm8, %v7137_v5, %v7145_v44  ;;  %v2046_v12 = vsel %vm477_vm8, %v6981_v54, %v7146_v6  ;;  %v2047_v13 = vsel %vm477_vm8, %v7146_v6, %v7147_v61  ;;  %v1629_v43 = vadd.f32 %v1605_v58, %v1472_v9  ;;  %v7156_v41 = vld [vmem:[#allocation155_spill] sm:$0xff]  ;;  %v7163_v6 = vld [vmem:[#allocation128_spill] sm:$0xff] }
 0x96a   : > { %v1606_v8 = vsel %vm477_vm8, %v7149_v22, %v7148_v23  ;;  %v1914_v15 = vadd.f32 %v1890_v21, %v1783_v62  ;;  %v1915_v51 = vadd.f32 %v1891_v49, %v1784_v45  ;;  %v1473_v36 = vadd.f32 %v1449_v32, %v1316_v53  ;;  %v7159_v21 = vld [vmem:[#allocation112_spill] sm:$0xff]  ;;  %v7160_v32 = vld [vmem:[#allocation142_spill] sm:$0xff]  ;;  %v7161_v45 = vld [vmem:[#allocation169_spill] sm:$0xff] }
 0x96b   : > { %v1892_v24 = vsel %vm477_vm8, %v7142_v40, %v7150_v19  ;;  %v2203_v54 = vsel %vm477_vm8, %v6985_v46, %v7151_v14  ;;  %v2204_v63 = vsel %vm477_vm8, %v7151_v14, %v7152_v3  ;;  %v1785_v35 = vadd.f32 %v1761_v47, %v1629_v43  ;;  %v7162_v53 = vld [vmem:[#allocation170_spill] sm:$0xff]  ;;  %v7168_v19 = vld [vmem:[#allocation185_spill] sm:$0xff] }
 0x96c   : > { %v1762_v5 = vsel %vm477_vm8, %v7154_v38, %v7153_v39  ;;  %v2070_v56 = vadd.f32 %v2046_v12, %v1914_v15  ;;  %v2071_v26 = vadd.f32 %v2047_v13, %v1915_v51  ;;  %v1630_v20 = vadd.f32 %v1606_v8, %v1473_v36  ;;  %v7164_v12 = vld [vmem:[#allocation129_spill] sm:$0xff]  ;;  %v7166_v51 = vld [vmem:[#allocation184_spill] sm:$0xff]  ;;  %v7167_v36 = vld [vmem:[#allocation183_spill] sm:$0xff] }
 0x96d   : > { %v2048_v33 = vsel %vm477_vm8, %v7147_v61, %v7155_v1  ;;  %v2339_v46 = vsel %vm477_vm8, %v6987_v16, %v7156_v41  ;;  %v2340_v48 = vsel %vm477_vm8, %v7156_v41, %v7157_v0  ;;  %v1916_v58 = vadd.f32 %v1892_v24, %v1785_v35  ;;  %v7165_v8 = vld [vmem:[#allocation157_spill] sm:$0xff] }
 0x96e   : > { %v1893_v40 = vsel %vm477_vm8, %v7159_v21, %v7158_v34  ;;  %v2227_v49 = vadd.f32 %v2203_v54, %v2070_v56  ;;  %v2228_v9 = vadd.f32 %v2204_v63, %v2071_v26  ;;  %v1786_v29 = vadd.f32 %v1762_v5, %v1630_v20  ;;  %v7169_v54 = vld [vmem:[#allocation144_spill] sm:$0xff]  ;;  %v7171_v56 = vld [vmem:[#allocation171_spill] sm:$0xff] }
 0x96f   : > { %v2205_v62 = vsel %vm477_vm8, %v7152_v3, %v7160_v32  ;;  %v2495_v16 = vsel %vm477_vm8, %v4928_v55, %v7161_v45  ;;  %v2496_v44 = vsel %vm477_vm8, %v7161_v45, %v7162_v53  ;;  %v2072_v47 = vadd.f32 %v2048_v33, %v1916_v58  ;;  %v7170_v3 = vld [vmem:[#allocation143_spill] sm:$0xff]  ;;  %v7172_v20 = vld [vmem:[#allocation204_spill] sm:$0xff]  ;;  %v7173_v33 = vld [vmem:[#allocation205_spill] sm:$0xff] }
 0x970   : > { %v2049_v61 = vsel %vm477_vm8, %v7164_v12, %v7163_v6  ;;  %v2363_v13 = vadd.f32 %v2339_v46, %v2227_v49  ;;  %v2364_v43 = vadd.f32 %v2340_v48, %v2228_v9  ;;  %v1917_v22 = vadd.f32 %v1893_v40, %v1786_v29  ;;  %v7174_v9 = vld [vmem:[#allocation159_spill] sm:$0xff]  ;;  %v7175_v29 = vld [vmem:[#allocation158_spill] sm:$0xff] }
 0x971   : > { %v2341_v15 = vsel %vm477_vm8, %v7157_v0, %v7165_v8  ;;  %v2651_v55 = vsel %vm477_vm8, %v7167_v36, %v7166_v51  ;;  %v2652_v24 = vsel %vm477_vm8, %v7166_v51, %v7168_v19  ;;  %v2229_v14 = vadd.f32 %v2205_v62, %v2072_v47  ;;  %v7176_v62 = vld [vmem:[#allocation186_spill] sm:$0xff] }
 0x972   : > { %v2206_v63 = vsel %vm477_vm8, %v7170_v3, %v7169_v54  ;;  %v2519_v35 = vadd.f32 %v2495_v16, %v2363_v13  ;;  %v2520_v38 = vadd.f32 %v2496_v44, %v2364_v43  ;;  %v2073_v5 = vadd.f32 %v2049_v61, %v1917_v22  ;;  %v7178_v61 = vld [vmem:[#allocation173_spill] sm:$0xff]  ;;  %v7179_v13 = vld [vmem:[#allocation172_spill] sm:$0xff]  ;;  %v7180_v22 = vld [vmem:[#allocation206_spill] sm:$0xff] }
 0x973   : > { %v2497_v26 = vsel %vm477_vm8, %v7162_v53, %v7171_v56  ;;  %v2809_v1 = vsel %vm177_vm1, %v5122_v31, %v7172_v20  ;;  %v2810_v41 = vsel %vm177_vm1, %v7172_v20, %v7173_v33  ;;  %v870_v46 = vadd.f32 %v5839_v52, %v5917_v17  ;;  %v7177_v52 = vld [vmem:[#allocation30_spill] sm:$0xff]  ;;  %v7185_v20 = vld [vmem:[#allocation21_spill] sm:$0xff] }
 0x974   : > { %v2365_v0 = vadd.f32 %v2341_v15, %v2229_v14  ;;  %v2675_v48 = vadd.f32 %v2651_v55, %v2519_v35  ;;  %v2676_v58 = vadd.f32 %v2652_v24, %v2520_v38  ;;  %v2230_v49 = vadd.f32 %v2206_v63, %v2073_v5  ;;  %v7181_v36 = vld [vmem:[#allocation66_spill] sm:$0xff] }
 0x975   : > { %v2342_v32 = vsel %vm477_vm8, %v7175_v29, %v7174_v9  ;;  %v2653_v31 = vsel %vm477_vm8, %v7168_v19, %v7176_v62  ;;  %v871_v47 = vadd.f32 %v5848_v28, %v5931_v7  ;;  %v916_v12 = vadd.f32 %v5750_v4, %v5903_v59  ;;  %v7182_v19 = vld [vmem:[#allocation81_spill] sm:$0xff]  ;;  %v7183_v7 = vld [vmem:[#allocation188_spill] sm:$0xff]  ;;  %v7184_v4 = vld [vmem:[#allocation187_spill] sm:$0xff] }
 0x976   : > { %v2521_v16 = vadd.f32 %v2497_v26, %v2365_v0  ;;  %v2833_v53 = vadd.f32 %v2809_v1, %v2675_v48  ;;  %v2834_v44 = vadd.f32 %v2810_v41, %v2676_v58  ;;  %v2498_v43 = vsel %vm477_vm8, %v7179_v13, %v7178_v61  ;;  %v7189_v0 = vld [vmem:[#allocation207_spill] sm:$0xff]  ;;  %v7190_v58 = vld [vmem:[#allocation28_spill] sm:$0xff] }
 0x977   : > { %v2811_v8 = vsel %vm177_vm1, %v7173_v33, %v7180_v22  ;;  %v2366_v15 = vadd.f32 %v2342_v32, %v2230_v49  ;;  %v917_v28 = vadd.f32 %v5855_v37, %v870_v46  ;;  %v2654_v59 = vsel %vm477_vm8, %v7184_v4, %v7183_v7  ;;  %v7188_v46 = vld [vmem:[#allocation208_spill] sm:$0xff]  ;;  %v7192_v49 = vld [vmem:[#allocation45_spill] sm:$0xff]  ;;  %v7202_v4 = vld [vmem:[#allocation59_spill] sm:$0xff] }
 0x978   : > { %v2677_v51 = vadd.f32 %v2653_v31, %v2521_v16  ;;  %v2964_v55 = vadd.f32 %v7181_v36, %v2833_v53  ;;  %v2965_v24 = vadd.f32 %v7182_v19, %v2834_v44  ;;  %v7186_v1 = vrot.slane %v7185_v20, 1  ;;  %v7194_v16 = vld [vmem:[#allocation44_spill] sm:$0xff]  ;;  %v7195_v44 = vld [vmem:[#allocation25_spill] sm:$0xff] }
 0x979   : > { %v2522_v38 = vadd.f32 %v2498_v43, %v2366_v15  ;;  %v7187_v33 = vrot.slane %v5729_v42, 1  ;;  %v918_v41 = vadd.f32 %v5868_v18, %v871_v47  ;;  %v2812_v48 = vsel %vm177_vm1, %v7189_v0, %v7188_v46  ;;  %v7193_v42 = vld [vmem:[#allocation80_spill] sm:$0xff]  ;;  %v7198_v15 = vld [vmem:[#allocation47_spill] sm:$0xff] }
 0x97a   : > { %v2835_v5 = vadd.f32 %v2811_v8, %v2677_v51  ;;  %v1136_v29 = vsel %vm477_vm8, %v7133_v50, %v7192_v49  ;;  %v1137_v53 = vsel %vm477_vm8, %v7192_v49, %v7194_v16  ;;  %v7197_v50 = vld [vmem:[#allocation57_spill] sm:$0xff]  ;;  %v1138_v51 = vsel %vm477_vm8, %v7194_v16, %v7198_v15  ;;  %v7204_v20 = vld [vmem:[#allocation72_spill] sm:$0xff]  ;;  %v7214_v15 = vld [vmem:[#allocation103_spill] sm:$0xff] }
 0x97b   : > { %v986_v37 = vsel %vm970_vm13, %v7187_v33, %v7186_v1  ;;  %v2678_v32 = vadd.f32 %v2654_v59, %v2522_v38  ;;  %v1293_v13 = vsel %vm477_vm8, %v7138_v10, %v7197_v50  ;;  %v1295_v59 = vsel %vm477_vm8, %v7199_v27, %v7202_v4  ;;  %v7205_v1 = vld [vmem:[#allocation86_spill] sm:$0xff]  ;;  %v7209_v16 = vld [vmem:[#allocation88_spill] sm:$0xff] }
 0x97c   : > { %v2966_v62 = vadd.f32 %v7193_v42, %v2835_v5  ;;  %v1008_v18 = vadd.f32 %v986_v37, %v916_v12  ;;  %v1607_v33 = vsel %vm477_vm8, %v7148_v23, %v7205_v1 }
 0x97d   : > { %v2836_v43 = vadd.f32 %v2812_v48, %v2678_v32 }
 0x97e   : > { %v1160_v12 = vadd.f32 %v1136_v29, %v1008_v18  ;;  %v7208_v29 = vld [vmem:[#allocation101_spill] sm:$0xff] }
 0x97f   : > { %v1763_v32 = vsel %vm477_vm8, %v7153_v39, %v7208_v29  ;;  %v7211_v39 = vld [vmem:[#allocation168_spill] sm:$0xff] }
 0x988   : > { %v3066_v21 = vpop.permute.xlu0 %3065 }
 0x989   : > { %v3068_v40 = vpop.permute.xlu1 %3067 }
 0x98a   : > { %v3095_v45 = vsel %vm177_vm1, %v3066_v21, %v3068_v40  ;;  %v7191_v21 = vrot.slane %v7190_v58, 1  ;;  %v7206_v58 = vld [vmem:[#allocation75_spill] sm:$0xff] }
 0x98b   : > { %v6036_v17 = vadd.f32 %v3095_v45, %v7177_v52  ;;  %v7196_v52 = vrot.slane %v7195_v44, 1  ;;  %v7210_v44 = vld [vmem:[#allocation114_spill] sm:$0xff] }
 0x98c   : > { %v3070_v3 = vpop.permute.xlu0 %3069 }
 0x98d   : > { %v3072_v14 = vpop.permute.xlu1 %3071  ;;  %v3096_v63 = vsel %vm177_vm1, %v3068_v40, %v3070_v3  ;;  %v988_v40 = vsel %vm970_vm13, %v978_v11, %v7191_v21  ;;  %v990_v25 = vsel %vm970_vm13, %v981_v2, %v7196_v52  ;;  %v1294_v2 = vsel %vm477_vm8, %v7197_v50, %v7199_v27 }
 0x98e   : > { %v3097_v35 = vsel %vm177_vm1, %v3070_v3, %v3072_v14  ;;  %v6056_v56 = vadd.f32 %v3096_v63, %v2964_v55  ;;  %v1009_v47 = vadd.f32 %v988_v40, %v917_v28  ;;  %v1010_v8 = vadd.f32 %v990_v25, %v918_v41  ;;  %v7200_v55 = vld [vmem:[#allocation73_spill] sm:$0xff]  ;;  %v7203_v63 = vld [vmem:[#allocation46_spill] sm:$0xff] }
 0x98f   : > { %v6058_v26 = vadd.f32 %v3097_v35, %v2965_v24  ;;  %v1450_v19 = vsel %vm477_vm8, %v7143_v60, %v7200_v55  ;;  %v7201_v24 = vld [vmem:[#allocation109_spill] sm:$0xff]  ;;  %v1317_v28 = vadd.f32 %v1293_v13, %v1160_v12  ;;  %v1451_v60 = vsel %vm477_vm8, %v7200_v55, %v7204_v20  ;;  %v7213_v12 = vld [vmem:[#allocation100_spill] sm:$0xff] }
 0x990   : > { %v3074_v45 = vpop.permute.xlu0 %3073  ;;  %v1161_v36 = vadd.f32 %v1137_v53, %v1009_v47  ;;  %v2967_v10 = vadd.f32 %v7201_v24, %v2836_v43  ;;  %v1162_v5 = vadd.f32 %v1138_v51, %v1010_v8  ;;  %v1452_v21 = vsel %vm477_vm8, %v7204_v20, %v7206_v58  ;;  %v7207_v40 = vld [vmem:[#allocation89_spill] sm:$0xff] }
 0x991   : > { %v3076_v31 = vpop.permute.xlu1 %3075  ;;  %v3098_v11 = vsel %vm177_vm1, %v3072_v14, %v3074_v45  ;;  %v1474_v0 = vadd.f32 %v1450_v19, %v1317_v28  ;;  %v1608_v49 = vsel %vm477_vm8, %v7205_v1, %v7207_v40  ;;  %v1609_v53 = vsel %vm477_vm8, %v7207_v40, %v7209_v16  ;;  %v7216_v24 = vld [vmem:[#allocation117_spill] sm:$0xff]  ;;  %v6166_v28 = vld [vmem:[#allocation2 + $0x28] sm:$0xe0] }
 0x992   : > { %v6090_v22 = vadd.f32 %v3098_v11, %v2966_v62  ;;  %v1318_v41 = vadd.f32 %v1294_v2, %v1161_v36  ;;  %v1319_v48 = vadd.f32 %v1295_v59, %v1162_v5  ;;  %v1894_v52 = vsel %vm477_vm8, %v7158_v34, %v7210_v44  ;;  %v7212_v11 = vld [vmem:[#allocation48_spill] sm:$0xff]  ;;  %v7215_v36 = vld [vmem:[#allocation131_spill] sm:$0xff] }
 0x993   : > { %v1764_v8 = vsel %vm477_vm8, %v7208_v29, %v7213_v12  ;;  %v1765_v51 = vsel %vm477_vm8, %v7213_v12, %v7214_v15  ;;  %v2050_v34 = vsel %vm477_vm8, %v7163_v6, %v7215_v36  ;;  %v7217_v6 = vld [vmem:[#allocation116_spill] sm:$0xff]  ;;  %v6180_v5 = vld [vmem:[#allocation2 + $0x20] sm:$0xe0]  ;;  %v7225_v12 = vld [vmem:[#allocation161_spill] sm:$0xff] }
 0x994   : > { %v6104_v3 = vpop.permute.xlu0 %3077  ;;  %v1475_v62 = vadd.f32 %v1451_v60, %v1318_v41  ;;  %v1476_v50 = vadd.f32 %v1452_v21, %v1319_v48  ;;  %v1896_v59 = vsel %vm477_vm8, %v7216_v24, %v7217_v6  ;;  %v7219_v41 = vld [vmem:[#allocation130_spill] sm:$0xff]  ;;  %v7220_v48 = vld [vmem:[#allocation133_spill] sm:$0xff]  ;;  %v7228_v6 = vld [vmem:[#allocation175_spill] sm:$0xff] }
 0x995   : > { %v6102_v14 = vpop.permute.xlu1 %3152  ;;  %v3099_v38 = vsel %vm177_vm1, %v3076_v31, %v6104_v3  ;;  %v1631_v31 = vadd.f32 %v1607_v33, %v1474_v0  ;;  %v2051_v0 = vsel %vm477_vm8, %v7215_v36, %v7219_v41  ;;  %v2052_v58 = vsel %vm477_vm8, %v7219_v41, %v7220_v48  ;;  %v7226_v15 = vld [vmem:[#allocation162_spill] sm:$0xff] }
 0x996   : > { %v3168_v35 = vmul.f32 %v7203_v63, %v6102_v14  ;;  %v6119_v37 = vadd.f32 %v3099_v38, %v2967_v10  ;;  %v1632_v13 = vadd.f32 %v1608_v49, %v1475_v62  ;;  %v1633_v55 = vadd.f32 %v1609_v53, %v1476_v50  ;;  %v7218_v63 = vld [vmem:[#allocation145_spill] sm:$0xff]  ;;  %v7231_v41 = vld [vmem:[#allocation190_spill] sm:$0xff] }
 0x997   : > { %v1787_v43 = vadd.f32 %v1763_v32, %v1631_v31  ;;  %v1895_v10 = vsel %vm477_vm8, %v7210_v44, %v7216_v24  ;;  %v7223_v31 = vld [vmem:[#allocation147_spill] sm:$0xff]  ;;  %v7227_v24 = vld [vmem:[#allocation189_spill] sm:$0xff] }
 0x998   : > { %3198 = vrot.lane.b32.xlu1 %v3168_v35, %s3779_s18  ;;  %v3155_v42 = vpop.permute.xlu0 %3154  ;;  %v2207_v35 = vsel %vm477_vm8, %v7169_v54, %v7218_v63  ;;  %v1788_v60 = vadd.f32 %v1764_v8, %v1632_v13  ;;  %v1789_v1 = vadd.f32 %v1765_v51, %v1633_v55  ;;  %v7221_v54 = vld [vmem:[#allocation160_spill] sm:$0xff]  ;;  %v3763_v44 = vld [vmem:[#allocation2 + $0x40] sm:$0xff]  ;;  %v2345_v51 = vsel %vm477_vm8, %v7225_v12, %v7226_v15 }
 0x999   : > { %v3157_v23 = vpop.permute.xlu1 %3156  ;;  %v6133_v45 = vsel %vm477_vm8, %v6102_v14, %v3155_v42  ;;  %v1918_v19 = vadd.f32 %v1894_v52, %v1787_v43  ;;  %v2343_v21 = vsel %vm477_vm8, %v7174_v9, %v7221_v54  ;;  %v7224_v9 = vld [vmem:[#allocation174_spill] sm:$0xff]  ;;  %v3173_v52 = vmul.f32 %v3763_v44, %v6102_v14 }
 0x99a   : > { %v6136_v18 = vsel %vm477_vm8, %v3155_v42, %v3157_v23  ;;  %v3169_v25 = vmul.f32 %v7211_v39, %v6133_v45  ;;  %v1919_v29 = vadd.f32 %v1895_v10, %v1788_v60  ;;  %v1920_v32 = vadd.f32 %v1896_v59, %v1789_v1  ;;  %v7222_v42 = vld [vmem:[#allocation146_spill] sm:$0xff] }
 0x99b   : > { %v3170_v47 = vmul.f32 %v7212_v11, %v6136_v18  ;;  %v2074_v33 = vadd.f32 %v2050_v34, %v1918_v19  ;;  %v2208_v62 = vsel %vm477_vm8, %v7218_v63, %v7222_v42  ;;  %v2209_v16 = vsel %vm477_vm8, %v7222_v42, %v7223_v31  ;;  %v7229_v63 = vld [vmem:[#allocation176_spill] sm:$0xff]  ;;  %v7233_v42 = vld [vmem:[#allocation210_spill] sm:$0xff] }
 0x99c   : > { %3200 = vrot.lane.b32.xlu0 %v3169_v25, %s3779_s18  ;;  %v6161_v2 = vpop.permute.xlu0 %3158  ;;  %v2499_v53 = vsel %vm477_vm8, %v7178_v61, %v7224_v9  ;;  %v6209_v25 = vld [vmem:[#allocation2 + $0x48] sm:$0xff]  ;;  %v2075_v50 = vadd.f32 %v2051_v0, %v1919_v29  ;;  %v2076_v13 = vadd.f32 %v2052_v58, %v1920_v32  ;;  %v2344_v8 = vsel %vm477_vm8, %v7221_v54, %v7225_v12  ;;  %v7232_v32 = vld [vmem:[#allocation191_spill] sm:$0xff]  ;;  %v3765_v31 = vld [vmem:[#allocation2 + $0x78] sm:$0x1f] }
 0x99d   : > { %v6157_v27 = vpop.permute.xlu1 %3333  ;;  %3202 = vrot.lane.b32.xlu1 %v3170_v47, %s3779_s18  ;;  %v6170_v4 = vsel %vm477_vm8, %v3157_v23, %v6161_v2  ;;  %v3172_v38 = vmul.f32 %v6161_v2, %v6166_v28  ;;  %v2231_v23 = vadd.f32 %v2207_v35, %v2074_v33  ;;  %v3174_v47 = vmul.f32 %v6209_v25, %v6133_v45  ;;  %v7230_v33 = vld [vmem:[#allocation209_spill] sm:$0xff] }
 0x99e   : > { %v3171_v20 = vmul.f32 %v6180_v5, %v6170_v4  ;;  %v2232_v34 = vadd.f32 %v2208_v62, %v2075_v50  ;;  %v2233_v55 = vadd.f32 %v2209_v16, %v2076_v13  ;;  %v2655_v10 = vsel %vm477_vm8, %v7183_v7, %v7227_v24  ;;  %v7236_v13 = vld [vmem:[#allocation108_spill] sm:$0xff] }
 0x99f   : > { %v2367_v43 = vadd.f32 %v2343_v21, %v2231_v23  ;;  %v2500_v59 = vsel %vm477_vm8, %v7224_v9, %v7228_v6  ;;  %v2501_v35 = vsel %vm477_vm8, %v7228_v6, %v7229_v63  ;;  %v2813_v7 = vsel %vm177_vm1, %v7188_v46, %v7230_v33  ;;  %v7234_v9 = vld [vmem:[#allocation49_spill] sm:$0xff]  ;;  %v7238_v63 = vld [vmem:[#allocation123_spill] sm:$0xff] }
 0x9a0   : > { %3204 = vrot.lane.b32.xlu0 %v3171_v20, %s3779_s18  ;;  %v6197_v49 = vpop.permute.xlu0 %3335  ;;  %v3176_v20 = vmul.f32 %v5812_v57, %v6170_v4  ;;  %v2368_v60 = vadd.f32 %v2344_v8, %v2232_v34  ;;  %v2369_v1 = vadd.f32 %v2345_v51, %v2233_v55  ;;  %v2656_v0 = vsel %vm477_vm8, %v7227_v24, %v7231_v41  ;;  %v6269_v34 = vld [vmem:[#allocation2 + $0x80] sm:$0x1f]  ;;  %v7237_v6 = vld [vmem:[#allocation125_spill] sm:$0xff] }
 0x9a1   : > { %v6193_v40 = vpop.permute.xlu1 %3337  ;;  %3206 = vrot.lane.b32.xlu1 %v3172_v38, %s3779_s18  ;;  %v2523_v19 = vadd.f32 %v2499_v53, %v2367_v43  ;;  %v3175_v38 = vmul.f32 %v5803_v30, %v6136_v18  ;;  %v2657_v23 = vsel %vm477_vm8, %v7231_v41, %v7232_v32  ;;  %v2814_v62 = vsel %vm177_vm1, %v7230_v33, %v7233_v42 }
 0x9a2   : > { %v2524_v21 = vadd.f32 %v2500_v59, %v2368_v60  ;;  %v2525_v29 = vadd.f32 %v2501_v35, %v2369_v1  ;;  %v3178_v16 = vmul.f32 %v3765_v31, %v6102_v14  ;;  %v3177_v53 = vmul.f32 %v7234_v9, %v6161_v2 }
 0x9a3   : > { %v2679_v48 = vadd.f32 %v2655_v10, %v2523_v19  ;;  %v3179_v55 = vmul.f32 %v6269_v34, %v6133_v45  ;;  %v6273_v19 = vld [vmem:[#allocation2 + $0x88] sm:$0x1f] }
 0x9a4   : > { %3208 = vrot.lane.b32.xlu0 %v3173_v52, %s3779_s18  ;;  %v6223_v36 = vpop.permute.xlu0 %3339  ;;  %v2680_v44 = vadd.f32 %v2656_v0, %v2524_v21  ;;  %v7235_v52 = vld [vmem:[#allocation211_spill] sm:$0xff]  ;;  %v2681_v50 = vadd.f32 %v2657_v23, %v2525_v29  ;;  %v3180_v24 = vmul.f32 %v6273_v19, %v6136_v18  ;;  %v3341_v0 = vsel %vm254_vm3, %v6157_v27, %v6197_v49 }
 0x9a5   : > { %v6219_v61 = vpop.permute.xlu1 %3464  ;;  %3210 = vrot.lane.b32.xlu1 %v3174_v47, %s3779_s18  ;;  %v2837_v46 = vadd.f32 %v2813_v7, %v2679_v48  ;;  %v2815_v47 = vsel %vm177_vm1, %v7233_v42, %v7235_v52  ;;  %v6293_v7 = vld [vmem:[#allocation2 + $0x90] sm:$0x1f]  ;;  %v3349_v29 = vmul.f32 %v7211_v39, %v6157_v27  ;;  %v3350_v32 = vmul.f32 %v7212_v11, %v3341_v0  ;;  %v7239_v23 = vld [vmem:[#allocation139_spill] sm:$0xff]  ;;  %v7240_v52 = vld [vmem:[#allocation138_spill] sm:$0xff] }
 0x9a6   : > { %v2838_v15 = vadd.f32 %v2814_v62, %v2680_v44  ;;  %v2839_v51 = vadd.f32 %v2815_v47, %v2681_v50  ;;  %v3181_v41 = vmul.f32 %v6293_v7, %v6170_v4  ;;  %v3342_v4 = vsel %vm254_vm3, %v6197_v49, %v6193_v40  ;;  %v7241_v47 = vld [vmem:[#allocation154_spill] sm:$0xff] }
 0x9a7   : > { %v2968_v43 = vadd.f32 %v7236_v13, %v2837_v46  ;;  %v3343_v42 = vsel %vm254_vm3, %v6193_v40, %v6223_v36  ;;  %v3351_v44 = vmul.f32 %v6180_v5, %v3342_v4  ;;  %v3311_v13 = vld [vmem:[#allocation2 + $0x30] sm:$0xe0] }
 0x9a8   : > { %3212 = vrot.lane.b32.xlu0 %v3175_v38, %s3779_s18  ;;  %v6248_v54 = vpop.permute.xlu0 %3466  ;;  %v2969_v59 = vadd.f32 %v7237_v6, %v2838_v15  ;;  %v2970_v35 = vadd.f32 %v7238_v63, %v2839_v51  ;;  %v3352_v40 = vmul.f32 %v3343_v42, %v6166_v28  ;;  %v3355_v15 = vmul.f32 %v5803_v30, %v3341_v0  ;;  %v3312_v51 = vld [vmem:[#allocation2 + $0x68] sm:$0xff] }
 0x9a9   : > { %v6244_v58 = vpop.permute.xlu1 %3468  ;;  %3214 = vrot.lane.b32.xlu1 %v3176_v20, %s3779_s18  ;;  %v6283_v20 = vld [vmem:[#allocation2 + $0x98] sm:$0x1f]  ;;  %v3359_v6 = vmul.f32 %v6269_v34, %v6157_v27  ;;  %v3361_v63 = vmul.f32 %v6293_v7, %v3342_v4 }
 0x9aa   : > { %v3182_v18 = vmul.f32 %v6161_v2, %v6283_v20 }
 0x9ac   : > { %3216 = vrot.lane.b32.xlu0 %v3177_v53, %s3779_s18  ;;  %v6265_v8 = vpop.permute.xlu0 %3470 }
 0x9ad   : > { %v3080_v12 = vpop.permute.xlu1 %3079  ;;  %3218 = vrot.lane.b32.xlu1 %v3178_v16, %s3779_s18 }
 0x9ae   : > { %v3100_v14 = vsel %vm177_vm1, %v6104_v3, %v3080_v12 }
 0x9af   : > { %v6277_v10 = vadd.f32 %v3100_v14, %v2968_v43  ;;  %v3354_v43 = vmul.f32 %v6209_v25, %v6157_v27  ;;  %v3356_v14 = vmul.f32 %v5812_v57, %v3342_v4 }
 0x9b0   : > { %3220 = vrot.lane.b32.xlu0 %v3179_v55, %s3779_s18  ;;  %v3082_v3 = vpop.permute.xlu0 %3081  ;;  %v3358_v55 = vmul.f32 %v6223_v36, %v3312_v51 }
 0x9b1   : > { %v3084_v38 = vpop.permute.xlu1 %3083  ;;  %3222 = vrot.lane.b32.xlu1 %v3180_v24, %s3779_s18  ;;  %v3101_v45 = vsel %vm177_vm1, %v3080_v12, %v3082_v3  ;;  %v3353_v12 = vmul.f32 %v6223_v36, %v3311_v13  ;;  %v3357_v24 = vmul.f32 %v7234_v9, %v3343_v42 }
 0x9b2   : > { %v3102_v60 = vsel %vm177_vm1, %v3082_v3, %v3084_v38  ;;  %v6289_v1 = vadd.f32 %v3101_v45, %v2969_v59  ;;  %v3360_v59 = vmul.f32 %v6273_v19, %v3341_v0  ;;  %v3313_v38 = vld [vmem:[#allocation2 + $0xa0] sm:$0x1f]  ;;  %v3480_v3 = vmul.f32 %v7211_v39, %v6219_v61 }
 0x9b3   : > { %v6291_v33 = vadd.f32 %v3102_v60, %v2970_v35  ;;  %v3362_v35 = vmul.f32 %v3343_v42, %v6283_v20  ;;  %v3363_v27 = vmul.f32 %v6223_v36, %v3313_v38  ;;  %v3472_v45 = vsel %vm177_vm1, %v6219_v61, %v6248_v54 }
 0x9b4   : > { %3224 = vrot.lane.b32.xlu0 %v3181_v41, %s3779_s18  ;;  %v3086_v21 = vpop.permute.xlu0 %3085  ;;  %v3473_v60 = vsel %vm177_vm1, %v6248_v54, %v6244_v58  ;;  %v3474_v36 = vsel %vm177_vm1, %v6244_v58, %v6265_v8  ;;  %v3484_v0 = vmul.f32 %v6265_v8, %v3311_v13 }
 0x9b5   : > { %v3088_v48 = vpop.permute.xlu1 %3087  ;;  %3226 = vrot.lane.b32.xlu1 %v3182_v18, %s3779_s18  ;;  %v3481_v18 = vmul.f32 %v7212_v11, %v3472_v45  ;;  %v3482_v41 = vmul.f32 %v6180_v5, %v3473_v60  ;;  %v3483_v54 = vmul.f32 %v3474_v36, %v6166_v28  ;;  %v3487_v58 = vmul.f32 %v5812_v57, %v3473_v60 }
 0x9b6   : > { %v3103_v2 = vsel %vm177_vm1, %v3086_v21, %v3088_v48  ;;  %v3486_v21 = vmul.f32 %v5803_v30, %v3472_v45  ;;  %v3492_v4 = vmul.f32 %v6293_v7, %v3473_v60  ;;  %v3493_v42 = vmul.f32 %v3474_v36, %v6283_v20 }
 0x9b7   : > { %v6307_v46 = vadd.f32 %v3103_v2, %v7239_v23  ;;  %v3488_v2 = vmul.f32 %v7234_v9, %v3474_v36  ;;  %v3491_v23 = vmul.f32 %v6273_v19, %v3472_v45  ;;  %v3494_v9 = vmul.f32 %v6265_v8, %v3313_v38 }
 0x9b8   : > { %3379 = vrot.lane.b32.xlu0 %v3349_v29, %s3781_s26  ;;  %v3090_v31 = vpop.permute.xlu0 %3089  ;;  %v3490_v29 = vmul.f32 %v6269_v34, %v6219_v61 }
 0x9b9   : > { %v6315_v62 = vpop.permute.xlu1 %3091  ;;  %3381 = vrot.lane.b32.xlu1 %v3350_v32, %s3781_s26  ;;  %v3104_v16 = vsel %vm177_vm1, %v3088_v48, %v3090_v31  ;;  %v3485_v48 = vmul.f32 %v6209_v25, %v6219_v61  ;;  %v3489_v32 = vmul.f32 %v6265_v8, %v3312_v51 }
 0x9ba   : > { %v3105_v53 = vsel %vm177_vm1, %v3090_v31, %v6315_v62  ;;  %v6324_v49 = vadd.f32 %v3104_v16, %v7240_v52 }
 0x9bb   : > { %v6327_v50 = vadd.f32 %v3105_v53, %v7241_v47 }
 0x9bc   : > { %3383 = vrot.lane.b32.xlu0 %v3351_v44, %s3781_s26  ;;  %v3094_v31 = vpop.permute.xlu0 %3093 }
 0x9bd   : > { %3385 = vrot.lane.b32.xlu1 %v3352_v40, %s3781_s26 }
 0x9c0   : > { %3387 = vrot.lane.b32.xlu0 %v3353_v12, %s3781_s26 }
 0x9c1   : > { %3389 = vrot.lane.b32.xlu1 %v3354_v43, %s3781_s26 }
 0x9c4   : > { %3391 = vrot.lane.b32.xlu0 %v3355_v15, %s3781_s26 }
 0x9c5   : > { %3393 = vrot.lane.b32.xlu1 %v3356_v14, %s3781_s26 }
 0x9c8   : > { %3395 = vrot.lane.b32.xlu0 %v3357_v24, %s3781_s26 }
 0x9c9   : > { %3397 = vrot.lane.b32.xlu1 %v3358_v55, %s3781_s26 }
 0x9cc   : > { %3399 = vrot.lane.b32.xlu0 %v3359_v6, %s3781_s26 }
 0x9cd   : > { %3401 = vrot.lane.b32.xlu1 %v3360_v59, %s3781_s26 }
 0x9d0   : > { %3403 = vrot.lane.b32.xlu0 %v3361_v63, %s3781_s26 }
 0x9d1   : > { %3405 = vrot.lane.b32.xlu1 %v3362_v35, %s3781_s26 }
 0x9d4   : > { %3407 = vrot.lane.b32.xlu0 %v3363_v27, %s3781_s26 }
 0x9d5   : > { %3510 = vrot.lane.b32.xlu1 %v3480_v3, %s3780_s23 }
 0x9d8   : > { %3512 = vrot.lane.b32.xlu0 %v3481_v18, %s3780_s23 }
 0x9d9   : > { %3514 = vrot.lane.b32.xlu1 %v3482_v41, %s3780_s23 }
 0x9dc   : > { %3516 = vrot.lane.b32.xlu0 %v3483_v54, %s3780_s23 }
 0x9dd   : > { %3518 = vrot.lane.b32.xlu1 %v3484_v0, %s3780_s23 }
 0x9e0   : > { %3520 = vrot.lane.b32.xlu0 %v3485_v48, %s3780_s23 }
 0x9e1   : > { %3522 = vrot.lane.b32.xlu1 %v3486_v21, %s3780_s23  ;;  %v3709_v21 = vld [vmem:[%s6570_s1 + $0x46] ss:$8 sm:$0xf] }
 0x9e4   : > { %3524 = vrot.lane.b32.xlu0 %v3487_v58, %s3780_s23 }
 0x9e5   : > { %3526 = vrot.lane.b32.xlu1 %v3488_v2, %s3780_s23 }
 0x9e8   : > { %3528 = vrot.lane.b32.xlu0 %v3489_v32, %s3780_s23 }
 0x9e9   : > { %3530 = vrot.lane.b32.xlu1 %v3490_v29, %s3780_s23  ;;  %v7242_v29 = vld [vmem:[#allocation4_spill] sm:$0xff] }
 0x9ea   : > { %v3270_v32 = vrot.slane %v3709_v21, %v7242_v29 }
 0x9ec   : > { %3532 = vrot.lane.b32.xlu0 %v3491_v23, %s3780_s23  ;;  %v7243_v23 = vld [vmem:[#allocation3_spill] sm:$0xff] }
 0x9ed   : > { %3534 = vrot.lane.b32.xlu1 %v3492_v4, %s3780_s23  ;;  %v3274_v4 = vrot.slane %v3709_v21, %v7243_v23  ;;  %v3106_v23 = vsel %vm177_vm1, %v6315_v62, %v3094_v31 }
 0x9ef   : > { %v3288_v29 = vmul.f32 %v7212_v11, %v3274_v4 }
 0x9f0   : > { %3536 = vrot.lane.b32.xlu0 %v3493_v42, %s3780_s23 }
 0x9f1   : > { %3538 = vrot.lane.b32.xlu1 %v3494_v9, %s3780_s23  ;;  %v7244_v9 = vld [vmem:[#allocation6_spill] sm:$0xff] }
 0x9f2   : > { %v3278_v42 = vrot.slane %v3709_v21, %v7244_v9 }
 0x9f4   : > { %v3289_v9 = vmul.f32 %v6180_v5, %v3278_v42  ;;  %v3295_v5 = vmul.f32 %v6269_v34, %v3270_v32 }
 0xa0a   : > { %v3199_v61 = vpop.permute.xlu1 %3198 }
 0xa0e   : > { %v3201_v53 = vpop.permute.xlu0 %3200 }
 0xa0f   : > { %v3203_v16 = vpop.permute.xlu1 %3202  ;;  %v3228_v44 = vsel %vm254_vm3, %v3199_v61, %v3201_v53  ;;  %v7245_v61 = vld [vmem:[#allocation5_spill] sm:$0xff] }
 0xa10   : > { %v3229_v52 = vsel %vm254_vm3, %v3201_v53, %v3203_v16  ;;  %v6401_v47 = vadd.f32 %v3228_v44, %v6036_v17 }
 0xa11   : > { %v6404_v40 = vadd.f32 %v3229_v52, %v6056_v56 }
 0xa12   : > { %v3205_v13 = vpop.permute.xlu0 %3204 }
 0xa13   : > { %v3207_v8 = vpop.permute.xlu1 %3206  ;;  %v3230_v43 = vsel %vm254_vm3, %v3203_v16, %v3205_v13  ;;  %v6445_v16 = vrot.slane %v3709_v21, %v7245_v61  ;;  %v3300_v34 = vadd.f32 %v3288_v29, %v6404_v40 }
 0xa14   : > { %v3231_v12 = vsel %vm254_vm3, %v3205_v13, %v3207_v8  ;;  %v3254_v15 = vadd.f32 %v3230_v43, %v6058_v26  ;;  %v3291_v8 = vmul.f32 %v6209_v25, %v3270_v32 }
 0xa15   : > { %v6410_v14 = vadd.f32 %v3231_v12, %v6090_v22  ;;  %v3287_v12 = vmul.f32 %v7211_v39, %v3270_v32  ;;  %v3293_v39 = vmul.f32 %v5812_v57, %v3278_v42  ;;  %v6477_v57 = vmul.f32 %v6293_v7, %v3278_v42 }
 0xa16   : > { %v3209_v55 = vpop.permute.xlu0 %3208  ;;  %v3301_v32 = vadd.f32 %v3289_v9, %v3254_v15 }
 0xa17   : > { %v3211_v51 = vpop.permute.xlu1 %3210 }
 0xa18   : > { %v3232_v52 = vsel %vm254_vm3, %v3209_v55, %v3211_v51  ;;  %v3290_v55 = vmul.f32 %v6445_v16, %v6166_v28  ;;  %v7247_v28 = vld [vmem:[#allocation153_spill] sm:$0xff] }
 0xa1a   : > { %v3213_v6 = vpop.permute.xlu0 %3212 }
 0xa1b   : > { %v3215_v24 = vpop.permute.xlu1 %3214  ;;  %v3233_v13 = vsel %vm254_vm3, %v3211_v51, %v3213_v6  ;;  %v3256_v51 = vadd.f32 %v3232_v52, %v6119_v37 }
 0xa1c   : > { %v3234_v43 = vsel %vm254_vm3, %v3213_v6, %v3215_v24  ;;  %v3292_v6 = vmul.f32 %v5803_v30, %v3274_v4  ;;  %v3257_v62 = vadd.f32 %v3233_v13, %v6277_v10 }
 0xa1d   : > { %v3258_v31 = vadd.f32 %v3234_v43, %v6289_v1  ;;  %v3299_v1 = vadd.f32 %v3287_v12, %v6401_v47  ;;  %v3303_v52 = vadd.f32 %v3291_v8, %v3256_v51 }
 0xa1e   : > { %v3217_v59 = vpop.permute.xlu0 %3216  ;;  %v3304_v42 = vadd.f32 %v3292_v6, %v3257_v62 }
 0xa1f   : > { %v3219_v17 = vpop.permute.xlu1 %3218  ;;  %v3235_v21 = vsel %vm254_vm3, %v3215_v24, %v3217_v59  ;;  %v6469_v24 = vmul.f32 %v6273_v19, %v3274_v4  ;;  %v6472_v59 = vadd.f32 %v3106_v23, %v7247_v28  ;;  %v3305_v43 = vadd.f32 %v3293_v39, %v3258_v31 }
 0xa20   : > { %v3259_v37 = vadd.f32 %v3235_v21, %v6291_v33 }
 0xa22   : > { %v6414_v56 = vpop.permute.xlu0 %3220 }
 0xa23   : > { %v6412_v63 = vpop.permute.xlu1 %3222  ;;  %v3236_v10 = vsel %vm254_vm3, %v3219_v17, %v6414_v56 }
 0xa24   : > { %v3237_v47 = vsel %vm254_vm3, %v6414_v56, %v6412_v63  ;;  %v3260_v40 = vadd.f32 %v3236_v10, %v6307_v46 }
 0xa25   : > { %v3261_v23 = vadd.f32 %v3237_v47, %v6324_v49 }
 0xa26   : > { %v6418_v38 = vpop.permute.xlu0 %3224 }
 0xa27   : > { %v6416_v35 = vpop.permute.xlu1 %3226 }
 0xa2a   : > { %v3380_v27 = vpop.permute.xlu0 %3379 }
 0xa2b   : > { %v3382_v3 = vpop.permute.xlu1 %3381 }
 0xa2c   : > { %v3409_v30 = vsel %vm477_vm8, %v3380_v27, %v3382_v3 }
 0xa2d   : > { %v3433_v13 = vadd.f32 %v3409_v30, %v3299_v1  ;;  %v3239_v30 = vsel %vm254_vm3, %v6418_v38, %v6416_v35 }
 0xa2e   : > { %v3384_v22 = vpop.permute.xlu0 %3383 }
 0xa2f   : > { %v6420_v26 = vpop.permute.xlu1 %3385  ;;  %v3410_v7 = vsel %vm477_vm8, %v3382_v3, %v3384_v22 }
 0xa30   : > { %v3411_v15 = vsel %vm477_vm8, %v3384_v22, %v6420_v26  ;;  %v3434_v29 = vadd.f32 %v3410_v7, %v3300_v34 }
 0xa31   : > { %v3435_v21 = vadd.f32 %v3411_v15, %v3301_v32 }
 0xa32   : > { %v6422_v60 = vpop.permute.xlu0 %3387 }
 0xa33   : > { %v3390_v45 = vpop.permute.xlu1 %3389 }
 0xa36   : > { %v3392_v41 = vpop.permute.xlu0 %3391 }
 0xa37   : > { %v6424_v18 = vpop.permute.xlu1 %3393  ;;  %v3413_v33 = vsel %vm477_vm8, %v3390_v45, %v3392_v41 }
 0xa38   : > { %v3414_v17 = vsel %vm477_vm8, %v3392_v41, %v6424_v18  ;;  %v3437_v45 = vadd.f32 %v3413_v33, %v3303_v52  ;;  %v3238_v41 = vsel %vm254_vm3, %v6412_v63, %v6418_v38  ;;  %v3263_v38 = vadd.f32 %v3239_v30, %v6472_v59 }
 0xa39   : > { %v3262_v10 = vadd.f32 %v3238_v41, %v6327_v50 }
 0xa3a   : > { %v6428_v0 = vpop.permute.xlu0 %3395 }
 0xa3b   : > { %v6426_v36 = vpop.permute.xlu1 %3397  ;;  %v3415_v56 = vsel %vm477_vm8, %v6424_v18, %v6428_v0 }
 0xa3c   : > { %v3416_v18 = vsel %vm477_vm8, %v6428_v0, %v6426_v36  ;;  %v3439_v49 = vadd.f32 %v3415_v56, %v3305_v43  ;;  %v3309_v43 = vadd.f32 %v6477_v57, %v3262_v10 }
 0xa3e   : > { %v6432_v48 = vpop.permute.xlu0 %3399 }
 0xa3f   : > { %v6430_v54 = vpop.permute.xlu1 %3401 }
 0xa40   : > { %v3417_v33 = vsel %vm477_vm8, %v6432_v48, %v6430_v54  ;;  %v3298_v48 = vmul.f32 %v6445_v16, %v6283_v20 }
 0xa42   : > { %v6439_v2 = vpop.permute.xlu0 %3403 }
 0xa43   : > { %v6437_v58 = vpop.permute.xlu1 %3405  ;;  %v3418_v50 = vsel %vm477_vm8, %v6430_v54, %v6439_v2 }
 0xa44   : > { %v3419_v59 = vsel %vm477_vm8, %v6439_v2, %v6437_v58 }
 0xa46   : > { %v6447_v44 = vpop.permute.xlu0 %3407 }
 0xa47   : > { %v3511_v53 = vpop.permute.xlu1 %3510  ;;  %7246 = vst [vmem:[#allocation51_spill] sm:$0xff] %v6447_v44  ;;  %v3769_v44 = vld [vmem:[#allocation2 + $0x60] sm:$0xff] }
 0xa48   : > { %v3294_v11 = vmul.f32 %v3769_v44, %v6445_v16  ;;  %v3302_v44 = vadd.f32 %v3290_v55, %v6410_v14  ;;  %v3412_v55 = vsel %vm477_vm8, %v6420_v26, %v6422_v60  ;;  %v3307_v60 = vadd.f32 %v3295_v5, %v3260_v40 }
 0xa49   : > { %v3310_v16 = vadd.f32 %v3298_v48, %v3263_v38 }
 0xa4a   : > { %v3513_v25 = vpop.permute.xlu0 %3512  ;;  %v3306_v14 = vadd.f32 %v3294_v11, %v3259_v37  ;;  %v3436_v62 = vadd.f32 %v3412_v55, %v3302_v44 }
 0xa4b   : > { %v3515_v61 = vpop.permute.xlu1 %3514  ;;  %v3540_v27 = vsel %vm177_vm1, %v3511_v53, %v3513_v25 }
 0xa4c   : > { %v3541_v53 = vsel %vm177_vm1, %v3513_v25, %v3515_v61  ;;  %v3564_v3 = vadd.f32 %v3540_v27, %v3433_v13  ;;  %v3438_v25 = vadd.f32 %v3414_v17, %v3304_v42  ;;  %v3440_v1 = vadd.f32 %v3416_v18, %v3306_v14 }
 0xa4d   : > { %v3308_v27 = vadd.f32 %v6469_v24, %v3261_v23  ;;  %v3441_v24 = vadd.f32 %v3417_v33, %v3307_v60 }
 0xa4e   : > { %v3517_v4 = vpop.permute.xlu0 %3516  ;;  %v3588_v63 = vrot.slane %v3564_v3, 5  ;;  %v7248_v17 = vld [vmem:[#allocation51_spill] sm:$0xff] }
 0xa4f   : > { %v3519_v19 = vpop.permute.xlu1 %3518  ;;  %v3542_v46 = vsel %vm177_vm1, %v3515_v61, %v3517_v4  ;;  %v3565_v61 = vadd.f32 %v3541_v53, %v3434_v29  ;;  %v3442_v47 = vadd.f32 %v3418_v50, %v3308_v27  ;;  %v3420_v57 = vsel %vm477_vm8, %v6437_v58, %v7248_v17 }
 0xa50   : > { %v3566_v51 = vadd.f32 %v3542_v46, %v3435_v21  ;;  %v3543_v11 = vsel %vm177_vm1, %v3517_v4, %v3519_v19  ;;  %v3444_v29 = vadd.f32 %v3420_v57, %v3310_v16 }
 0xa51   : > { %v3591_v34 = vrot.slane %v3565_v61, 5  ;;  %v3567_v5 = vadd.f32 %v3543_v11, %v3436_v62 }
 0xa52   : > { %v3521_v12 = vpop.permute.xlu0 %3520  ;;  %v3594_v32 = vrot.slane %v3566_v51, 5 }
 0xa53   : > { %v3523_v8 = vpop.permute.xlu1 %3522  ;;  %v3597_v54 = vrot.slane %v3567_v5, 5 }
 0xa54   : > { %v3544_v22 = vsel %vm177_vm1, %v3521_v12, %v3523_v8  ;;  %v3443_v12 = vadd.f32 %v3419_v59, %v3309_v43 }
 0xa55   : > { %v6505_v9 = vadd.f32 %v3544_v22, %v3437_v45 }
 0xa56   : > { %v3525_v26 = vpop.permute.xlu0 %3524 }
 0xa57   : > { %v3589_v6 = vrot.slane %v6505_v9, 5  ;;  %v3527_v39 = vpop.permute.xlu1 %3526  ;;  %v3545_v36 = vsel %vm177_vm1, %v3523_v8, %v3525_v26 }
 0xa58   : > { %v3546_v0 = vsel %vm177_vm1, %v3525_v26, %v3527_v39  ;;  %v3569_v28 = vadd.f32 %v3545_v36, %v3438_v25 }
 0xa59   : > { %v3590_v31 = vsel %vm1389_vm10, %v3588_v63, %v3589_v6  ;;  %v3570_v37 = vadd.f32 %v3546_v0, %v3439_v49 }
 0xa5a   : > { %3616 = vst [vmem:[%s6518_s30] sm:$0xff] %v3590_v31  ;;  %v3592_v19 = vrot.slane %v3569_v28, 5  ;;  %v3529_v52 = vpop.permute.xlu0 %3528 }
 0xa5b   : > { %v3595_v4 = vrot.slane %v3570_v37, 5  ;;  %v3531_v44 = vpop.permute.xlu1 %3530  ;;  %v3547_v35 = vsel %vm177_vm1, %v3527_v39, %v3529_v52 }
 0xa5c   : > { %v3593_v13 = vsel %vm1389_vm10, %v3591_v34, %v3592_v19  ;;  %v3571_v42 = vadd.f32 %v3547_v35, %v3440_v1 }
 0xa5d   : > { %v3596_v7 = vsel %vm1389_vm10, %v3594_v32, %v3595_v4  ;;  %3617 = vst [vmem:[%s6518_s30 + $0x8] sm:$0xff] %v3593_v13 }
 0xa5e   : > { %3618 = vst [vmem:[%s6518_s30 + $0x10] sm:$0xff] %v3596_v7  ;;  %v3598_v40 = vrot.slane %v3571_v42, 5  ;;  %v3533_v14 = vpop.permute.xlu0 %3532 }
 0xa5f   : > { %v3535_v15 = vpop.permute.xlu1 %3534  ;;  %v3548_v45 = vsel %vm177_vm1, %v3531_v44, %v3533_v14 }
 0xa60   : > { %v3549_v20 = vsel %vm177_vm1, %v3533_v14, %v3535_v15  ;;  %v3599_v53 = vsel %vm1389_vm10, %v3597_v54, %v3598_v40  ;;  %v3572_v3 = vadd.f32 %v3548_v45, %v3441_v24 }
 0xa61   : > { %v3573_v8 = vadd.f32 %v3549_v20, %v3442_v47  ;;  %3619 = vst [vmem:[%s6518_s30 + $0x18] sm:$0xff] %v3599_v53 }
 0xa62   : > { %v3600_v56 = vrot.slane %v3572_v3, 5  ;;  %v3537_v58 = vpop.permute.xlu0 %3536 }
 0xa63   : > { %v3602_v2 = vrot.slane %v3573_v8, 5  ;;  %v3539_v46 = vpop.permute.xlu1 %3538  ;;  %v3550_v22 = vsel %vm177_vm1, %v3535_v15, %v3537_v58 }
 0xa64   : > { %v3551_v23 = vsel %vm177_vm1, %v3537_v58, %v3539_v46  ;;  %v3601_v41 = vsel %vm1389_vm10, %v3589_v6, %v3600_v56  ;;  %v3574_v9 = vadd.f32 %v3550_v22, %v3443_v12 }
 0xa65   : > { %v3603_v21 = vsel %vm1389_vm10, %v3592_v19, %v3602_v2  ;;  %v3575_v55 = vadd.f32 %v3551_v23, %v3444_v29  ;;  %3620 = vst [vmem:[%s6518_s30 + $0x20] sm:$0xff] %v3601_v41 }
 0xa66   : > { %3621 = vst [vmem:[%s6518_s30 + $0x28] sm:$0xff] %v3603_v21  ;;  %v3604_v25 = vrot.slane %v3574_v9, 5 }
 0xa67   : > { %v3606_v18 = vrot.slane %v3575_v55, 5 }
 0xa68   : > { %v3605_v61 = vsel %vm1389_vm10, %v3595_v4, %v3604_v25 }
 0xa69   : > { %v3607_v49 = vsel %vm1389_vm10, %v3598_v40, %v3606_v18  ;;  %3622 = vst [vmem:[%s6518_s30 + $0x30] sm:$0xff] %v3605_v61 }
 0xa6a   : > { %3623 = vst [vmem:[%s6518_s30 + $0x38] sm:$0xff] %v3607_v49 }
 0xa6b PF: > { %s13_s12 = sadd.s32 1, %s3776_s12  }
 0xa6c   : > { %p10_p4 = scmp.ge.s32.totalorder %s13_s12, 4  }
 0xa6e   :  { %12 = sbr.rel (!%p10_p4) target bundleno = 1 (0x1), region = 86 }

</bundles_post_ra>
